<compile_context>
chip_gen: v7x
topology: tpu7x:2x2x1
jax: 0.10.0
libtpu: 0.0.40
codegen_flags: <defaults>
</compile_context>

<pallas_src>
import functools
import math

import jax
import jax.numpy as jnp
from jax.experimental import pallas as pl
from jax.experimental.pallas import tpu as pltpu


# Inputs smaller than this go straight to XLA's fused reduce (a single-step
# Pallas launch is pure launch/DMA overhead at these sizes).
_FAST_PATH_BYTES = 2 * 1024 * 1024

_N_BUFFERS = 2  # BlockSpec double-buffering


def _vmem_budget_and_limit():
    """Generation-aware (tiling budget, vmem_limit_bytes)."""
    cap = None
    try:
        cap = int(pltpu.get_tpu_info().vmem_capacity_bytes)
    except Exception:
        cap = None
    if cap is None or cap <= 64 * 1024 * 1024:
        # v7x-sized VMEM (64 MiB per TensorCore) or unknown: stay conservative.
        return 40 * 1024 * 1024, 56 * 1024 * 1024
    # v5e / v6e: 128 MiB physical VMEM.
    return 56 * 1024 * 1024, 100 * 1024 * 1024


def _acc_dtype(dtype):
    """(accumulation dtype, needs_separate_scratch)."""
    dtype = jnp.dtype(dtype)
    if dtype.itemsize >= 4:
        return dtype, False  # accumulate directly into the output block
    if jnp.issubdtype(dtype, jnp.floating):
        return jnp.dtype(jnp.float32), True
    return jnp.dtype(jnp.int32), True


def _block_bytes(tb, tn, td, in_bytes, out_bytes, needs_scratch):
    inp = _N_BUFFERS * tb * tn * td * in_bytes
    # Sub-32-bit inputs are upcast before the reduce; budget the possible
    # materialized 32-bit temporary so enlarged tiles cannot spill / OOM.
    tmp = tb * tn * td * 4 if in_bytes < 4 else 0
    out = 2 * tb * td * out_bytes
    acc = tb * td * 4 if needs_scratch else 0
    return inp + tmp + out + acc


def _largest_lane_divisor(d, max_d):
    """Largest multiple-of-128 divisor of d that is <= max_d (or None)."""
    best = None
    td = 128
    limit = min(d, max_d)
    while td <= limit:
        if d % td == 0:
            best = td
        td += 128
    return best


def _pick_node_tile(n, tb, td, in_bytes, out_bytes, needs_scratch, budget):
    """Largest multiple-of-8 node tile under the VMEM budget.

    Returns (tile_n, pad_n). Prefers a divisor of n (no padding); otherwise
    n is zero-padded (sum-neutral) up to a multiple of tile_n.
    """
    fixed = 2 * tb * td * out_bytes + (tb * td * 4 if needs_scratch else 0)
    per_n = tb * td * (_N_BUFFERS * in_bytes + (4 if in_bytes < 4 else 0))
    avail = max(budget - fixed, 8 * per_n)
    max_n = max(8, avail // per_n)
    if max_n >= n:
        return n, 0
    tile_n = (max_n // 8) * 8
    # Prefer a clean divisor of n near the cap (no padding, no remainder).
    t = tile_n
    lo = max(8, tile_n // 2)
    while t >= lo:
        if n % t == 0:
            return t, 0
        t -= 8
    return tile_n, (-n) % tile_n


# ----------------------------- kernels ------------------------------------


def _whole_kernel(x_ref, o_ref, *, acc_dtype):
    # Whole reduction axis resident in one block.
    o_ref[...] = jnp.sum(x_ref[...].astype(acc_dtype), axis=-2).astype(o_ref.dtype)


def _acc_direct_kernel(x_ref, o_ref):
    # >=32-bit output: accumulate directly into the resident output block.
    k = pl.program_id(2)
    part = jnp.sum(x_ref[...], axis=-2)

    @pl.when(k == 0)
    def _():
        o_ref[...] = part

    @pl.when(k > 0)
    def _():
        o_ref[...] += part


def _acc_scratch_kernel(x_ref, o_ref, acc_ref):
    # Sub-32-bit output: accumulate in a 32-bit scratch, cast on finalize.
    k = pl.program_id(2)

    @pl.when(k == 0)
    def _():
        acc_ref[...] = jnp.zeros_like(acc_ref)

    acc_ref[...] += jnp.sum(x_ref[...].astype(acc_ref.dtype), axis=-2)

    @pl.when(k == pl.num_programs(2) - 1)
    def _():
        o_ref[...] = acc_ref[...].astype(o_ref.dtype)


# ----------------------------- dispatcher ----------------------------------


def _pallas_sum(x, budget, vmem_limit):
    b, n, d = x.shape
    dtype = x.dtype
    in_bytes = dtype.itemsize
    out_bytes = in_bytes
    acc_dt, needs_scratch = _acc_dtype(dtype)

    # ---- batch tile: small sublane-friendly tile; full extent otherwise.
    # (Callers guarantee b % 8 == 0 or b <= 8.)
    tile_b = 8 if b % 8 == 0 else b

    # ---- lane tile: prefer the full (contiguous) feature extent.
    n_min = min(n, 8)
    if _block_bytes(tile_b, n_min, d, in_bytes, out_bytes, needs_scratch) <= budget:
        tile_d = d
    elif d % 128 == 0:
        per_d = tile_b * (
            n_min * (_N_BUFFERS * in_bytes + (4 if in_bytes < 4 else 0))
            + 2 * out_bytes
            + (4 if needs_scratch else 0)
        )
        max_d = max(128, budget // per_d)
        tile_d = _largest_lane_divisor(d, max_d) or 128
    else:
        # Full extent is the only legal lane block when D % 128 != 0.
        tile_d = d

    grid_b = b // tile_b
    grid_d = d // tile_d

    # ---- megacore: avoid handing v7x's two TensorCores a (1, 1[, k]) grid.
    if grid_b * grid_d == 1 and d % 256 == 0 and d >= 512:
        tile_d = d // 2
        grid_d = 2

    # ---- node tile: spend the remaining budget on the reduction axis.
    tile_n, pad_n = _pick_node_tile(
        n, tile_b, tile_d, in_bytes, out_bytes, needs_scratch, budget
    )
    if pad_n:
        x = jnp.pad(x, ((0, 0), (0, pad_n), (0, 0)))
    n_p = n + pad_n
    grid_n = n_p // tile_n

    cost = pl.CostEstimate(
        flops=b * n_p * d,
        transcendentals=0,
        bytes_accessed=b * n_p * d * in_bytes + b * d * out_bytes,
    )

    if grid_n == 1:
        # Whole reduction axis resident per grid step.
        return pl.pallas_call(
            functools.partial(_whole_kernel, acc_dtype=acc_dt),
            out_shape=jax.ShapeDtypeStruct((b, d), dtype),
            grid_spec=pltpu.PrefetchScalarGridSpec(
                num_scalar_prefetch=0,
                grid=(grid_b, grid_d),
                in_specs=[
                    pl.BlockSpec((tile_b, n_p, tile_d), lambda i, j: (i, 0, j)),
                ],
                out_specs=pl.BlockSpec((tile_b, tile_d), lambda i, j: (i, j)),
            ),
            compiler_params=pltpu.CompilerParams(
                dimension_semantics=("parallel", "parallel"),
                vmem_limit_bytes=vmem_limit,
            ),
            cost_estimate=cost,
        )(x)

    # Large N: reduction axis tiled along the trailing "arbitrary" grid axis.
    if needs_scratch:
        kernel = _acc_scratch_kernel
        scratch = [pltpu.VMEM((tile_b, tile_d), acc_dt)]
    else:
        kernel = _acc_direct_kernel
        scratch = []

    return pl.pallas_call(
        kernel,
        out_shape=jax.ShapeDtypeStruct((b, d), dtype),
        grid_spec=pltpu.PrefetchScalarGridSpec(
            num_scalar_prefetch=0,
            grid=(grid_b, grid_d, grid_n),
            in_specs=[
                pl.BlockSpec((tile_b, tile_n, tile_d), lambda i, j, k: (i, k, j)),
            ],
            out_specs=pl.BlockSpec((tile_b, tile_d), lambda i, j, k: (i, j)),
            scratch_shapes=scratch,
        ),
        compiler_params=pltpu.CompilerParams(
            dimension_semantics=("parallel", "parallel", "arbitrary"),
            vmem_limit_bytes=vmem_limit,
        ),
        cost_estimate=cost,
    )(x)


def centrality_encoding(spatial_encoding: jax.Array) -> jax.Array:
    """Sum over dim=-2 of `spatial_encoding` (Graphormer CentralityEncoding).

    spatial_encoding: (..., N, D) array  ->  (..., D)
    """
    shape = spatial_encoding.shape
    assert spatial_encoding.ndim >= 2, "need at least an (N, D) input"
    n, d = shape[-2], shape[-1]
    lead = shape[:-2]
    b = math.prod(lead) if lead else 1
    x = spatial_encoding.reshape(b, n, d)
    dtype = x.dtype
    acc_dt, _ = _acc_dtype(dtype)

    # Tiny inputs: a single-step Pallas launch is pure overhead.
    total_bytes = b * n * d * dtype.itemsize
    if total_bytes <= _FAST_PATH_BYTES:
        out = jnp.sum(x.astype(acc_dt), axis=-2).astype(dtype)
        return out.reshape(lead + (d,))

    budget, vmem_limit = _vmem_budget_and_limit()

    if b > 8 and b % 8 != 0:
        # Keep kernel batch blocks sublane-dense (multiple of 8) without
        # padding the whole array: Pallas handles the multiple-of-8 prefix,
        # XLA the (<8 row) tail.
        b_main = (b // 8) * 8
        out_main = _pallas_sum(x[:b_main], budget, vmem_limit)
        out_tail = jnp.sum(x[b_main:].astype(acc_dt), axis=-2).astype(dtype)
        out = jnp.concatenate([out_main, out_tail], axis=0)
    else:
        out = _pallas_sum(x, budget, vmem_limit)

    return out.reshape(lead + (d,))


if __name__ == "__main__":
    root = jax.random.PRNGKey(0)
    k0, k1, k2, k3 = jax.random.split(root, 4)

    # 1) Small shape consistent with the module (fast path): batch=2, nodes=16, D=256.
    x0 = jax.random.normal(k0, (2, 16, 256), dtype=jnp.float32)
    o0 = jax.block_until_ready(centrality_encoding(x0))
    r0 = jnp.sum(x0, axis=-2)
    assert o0.shape == (2, 256)
    assert jnp.allclose(o0, r0, atol=1e-5, rtol=1e-5)

    # 2) bf16 input large enough to take the Pallas whole-N path
    #    (f32 accumulation, lane split keeps the parallel grid >= 2).
    x1 = jax.random.normal(k1, (8, 512, 512), dtype=jnp.bfloat16)
    o1 = jax.block_until_ready(centrality_encoding(x1))
    r1 = jnp.sum(x1.astype(jnp.float32), axis=-2).astype(jnp.bfloat16)
    assert o1.shape == (8, 512)
    assert jnp.allclose(o1.astype(jnp.float32), r1.astype(jnp.float32),
                        atol=5e-1, rtol=2e-2)

    # 3) f32 large-N input exercising the accumulator ("arbitrary" k-axis) path
    #    with direct accumulation into the resident output block.
    x2 = jax.random.normal(k2, (8, 4096, 512), dtype=jnp.float32)
    o2 = jax.block_until_ready(centrality_encoding(x2))
    r2 = jnp.sum(x2, axis=-2)
    assert o2.shape == (8, 512)
    assert jnp.allclose(o2, r2, atol=5e-3, rtol=1e-5)

    # 4) Awkward shapes: B < 8, N not a multiple of 8, D not a multiple of 128
    #    (full-extent block paths).
    x3 = jax.random.normal(k3, (4, 1000, 192), dtype=jnp.float32)
    o3 = jax.block_until_ready(centrality_encoding(x3))
    r3 = jnp.sum(x3, axis=-2)
    assert o3.shape == (4, 192)
    assert jnp.allclose(o3, r3, atol=1e-3, rtol=1e-5)

    print("KERNEL_OK")
</pallas_src>

<mosaic_0001>
module attributes {stable_mosaic.version = 11 : i64} {
  func.func @_whole_kernel(%arg0: i32, %arg1: i32, %arg2: memref<8x512x256xbf16, #tpu.memory_space<vmem>>, %arg3: memref<8x256xbf16, #tpu.memory_space<vmem>>) attributes {dimension_semantics = [#tpu.dimension_semantics<parallel>, #tpu.dimension_semantics<parallel>], iteration_bounds = array<i64: 1, 2>, scalar_prefetch = 0 : i64, scratch_operands = 0 : i64, tpu.core_type = #tpu.core_type<tc>, window_params = [{transform_indices = @transform_0, window_bounds = array<i64: 8, 512, 256>}, {transform_indices = @transform_1, window_bounds = array<i64: 8, 256>}]} {
    %c0 = arith.constant 0 : index
    %c0_0 = arith.constant 0 : index
    %c0_1 = arith.constant 0 : index
    %0 = vector.load %arg2[%c0, %c0_0, %c0_1] : memref<8x512x256xbf16, #tpu.memory_space<vmem>>, vector<8x512x256xbf16>
    %1 = arith.extf %0 : vector<8x512x256xbf16> to vector<8x512x256xf32>
    %cst = arith.constant dense<0.000000e+00> : vector<8x256xf32>
    %2 = vector.multi_reduction <add>, %1, %cst [1] : vector<8x512x256xf32> to vector<8x256xf32>
    %3 = arith.truncf %2 : vector<8x256xf32> to vector<8x256xbf16>
    %c0_2 = arith.constant 0 : index
    %c0_3 = arith.constant 0 : index
    %4 = vector.load %arg3[%c0_2, %c0_3] : memref<8x256xbf16, #tpu.memory_space<vmem>>, vector<8x256xbf16>
    tpu.vector_store %arg3[%c0_2, %c0_3], %3 {strides = array<i32>} : memref<8x256xbf16, #tpu.memory_space<vmem>>, vector<8x256xbf16>,
    return
  }
  func.func @transform_0(%arg0: i32, %arg1: i32) -> (i32, i32, i32) {
    %c0_i32 = arith.constant 0 : i32
    %c0_i32_0 = arith.constant 0 : i32
    return %arg0, %c0_i32, %arg1 : i32, i32, i32
  }
  func.func @transform_1(%arg0: i32, %arg1: i32) -> (i32, i32) {
    %c0_i32 = arith.constant 0 : i32
    return %arg0, %arg1 : i32, i32
  }
}

</mosaic_0001>

<bundles_post_ra>
// kernel: tpu_custom_call.1
= control target key start
LH: loop header
LB: loop body
LE: loop exit
PB: predicated region body
PF: predicated region fallthrough
CT: control target
= control target key end

     0   :  { %6 = vsyncpa [#allocation3], 0  ;;  %s8029_s0 = inlined_call_operand.hbm [shape: bf16[8,512,512], index: 0, kind: input, shape index: {}]   ;;  %s8030_s1 = inlined_call_operand.hbm [shape: bf16[8,512], index: 1, kind: output, shape index: {}]  }
   0x1   :  { %8 = vsyncpa [#allocation3 + $0x1], 0 }
   0x2   :  { %9 = vsyncpa [#allocation4], 0 }
   0x3   :  { %11 = vsyncpa [#allocation4 + $0x1], 0  ;;  %s3221_s6 = smov 0   ;;  %s3223_s7 = smov 0  }
   0x4   :  { %s3225_s8 = smov 0   ;;  %s3227_s9 = smov 0  }
   0x5   :  { %s3229_s10 = smov 0   ;;  %s3231_s11 = smov 0  }
   0x6 LB: > { %s2994_s12 = sadd.s32 4294967295, %s3204_s11   ;;  %s2995_s13 = sadd.s32 4294967294, %s3204_s11   ;;  %s3204_s11 = sphi %s3231_s11, %s17_s11   ;;  %s3200_s10 = sphi %s3229_s10, %s10920_s10   ;;  %s3196_s9 = sphi %s3227_s9, %s10919_s9   ;;  %s3192_s8 = sphi %s3225_s8, %s10918_s8   ;;  %s3188_s7 = sphi %s3223_s7, %s10917_s7   ;;  %s3184_s6 = sphi %s3221_s6, %s10916_s6  }
   0x7   : > { %s26_s14 = sadd.s32 1, %s3200_s10  ;;  %s38_s15 = sadd.s32 1, %s3192_s8 }
   0x8   : > { %p27_p0 = scmp.ge.s32.totalorder %s26_s14, 2  ;;  %p45_p1 = scmp.ne.s32.totalorder %s3192_s8, %s3188_s7 }
   0x9   : > { %p46_p2 = scmp.eq.s32.totalorder %s3204_s11, 0  ;;  %p51_p3 = scmp.ne.s32.totalorder %s3188_s7, %s3184_s6 }
   0xa   : > { %s10922_s14 = smov (%p27_p0, %s26_s14), 0  ;;  %p52_p5 = scmp.eq.s32.totalorder %s2994_s12, 0 }
   0xb   : > { %p3262_p4 = por %p46_p2, %p45_p1  ;;  %s34_s17 = ssub.s32 %s3200_s10, %s10922_s14 }
   0xc   : > { %p77_p6 = scmp.eq.s32.totalorder %s2994_s12, 1  ;;  %p36_p7 = scmp.eq.s32.totalorder %s34_s17, 0 }
   0xd   : > { %p3268_p8 = por %p52_p5, %p51_p3  ;;  %p83_p10 = scmp.eq.s32.totalorder %s2995_s13, 1 }
   0xe   : > { %p3272_p9 = por %p77_p6, %p45_p1  ;;  %p3039_p13 = scmp.lt.s32.totalorder %s3204_s11, 2 }
   0xf   : > { %s3277_s20 = scalar_select %p36_p7, %s3192_s8, %s38_s15  }
  0x10   : > { %s8960_s19 = scalar_select %p3272_p9, 1, 0 }
  0x11   : > { %p3279_p11 = por %p83_p10, %p51_p3  ;;  %s103_s22 = sand.u32 1, %s3192_s8  }
  0x12   : > { %s2998_s23 = sshll.u32 %s103_s22, 12  ;;  %s3017_s24 = sshll.u32 %s3200_s10, 7 }
  0x13   : > { %s8961_s21 = scalar_select %p3279_p11, 1, 0 }
  0x14   : > { %s3290_s27 = scalar_lea.hbm %s8029_s0, %s3017_s24  ;;  %s107_s28 = scalar_lea.vmem [#allocation2], %s2998_s23 }
  0x15   : > { %s117_s29 = sshll.u32 %s107_s28, 4  ;;  %p3296_p0 = pnand %p3039_p13, %p3262_p4  ;;  %s3292_s29 = int_to_ptr.vmem [resolvable:$true] %s117_s29 }
  0x16   : > { %s3300_s2 = scalar_lea.sflag [#allocation3], %s103_s22  ;;  %s3092_s3 = scalar_lea.hbm %s3290_s27, 65536 }
  0x17   : > { %p3093_p1 = scmp.ne.s32.totalorder %s3290_s27, %s3092_s3  ;;  %p3094_p2 = pneg %p3296_p0 }
  0x18   : > { %s3097_s12 = scalar_lea.hbm %s8029_s0, 131072  ;;  %p3098_p4 = scmp.lt.u32.totalorder %s3290_s27, %s8029_s0 }
  0x19   : > { %p3095_p3 = pnand %p3094_p2, %p3093_p1  ;;  %p3099_p6 = scmp.lt.u32.totalorder %s3097_s12, %s3092_s3 }
  0x1a   : > { %p3101_p10 = scmp.lt.u32.totalorder %s3092_s3, %s3290_s27 }
  0x1b   : > { %p3096_p5 = pneg %p3095_p3  ;;  %p3100_p7 = por %p3099_p6, %p3098_p4 }
  0x1d   : > { %p3102_p13 = por %p3101_p10, %p3100_p7 }
  0x1f   : > { %p3103_p12 = pnand %p3102_p13, %p3096_p5 }
  0x21   : > { %3106 = shalt.err (!%p3103_p12)
}
  0x22   : > { %s3107_s16 = scalar_lea.vmem %s3292_s29, 65536  ;;  %s3206_s17 = smov [#allocation2]  }
  0x23   : > { %p3108_p1 = scmp.ne.s32.totalorder %s3292_s29, %s3107_s16  ;;  %s3112_s22 = sshll.u32 %s3206_s17, 4  ;;  %s3113_s22 = int_to_ptr.vmem [resolvable:$false] %s3112_s22 }
  0x24   : > { %s3114_s23 = scalar_lea.vmem %s3113_s22, 131072  ;;  %p3115_p9 = scmp.lt.s32.totalorder %s3292_s29, %s3113_s22 }
  0x25   : > { %p3110_p3 = pnand %p3108_p1, %p3094_p2  ;;  %p3116_p4 = scmp.lt.s32.totalorder %s3114_s23, %s3107_s16 }
  0x27   : > { %p3111_p11 = pneg %p3110_p3  ;;  %p3117_p6 = por %p3116_p4, %p3115_p9 }
  0x29   : > { %p3118_p7 = pnand %p3117_p6, %p3111_p11 }
  0x2b   : > { %3121 = shalt.err (!%p3118_p7)
}
  0x2c   : > { %s3207_s24 = smov 256   ;;  %s3208_s25 = smov 128  }
  0x2d   : > { %s3209_s26 = smov 8   ;;  %p3001_p12 = scmp.ge.s32.totalorder %s3204_s11, 1 }
  0x2e   : > { %3034 = dma.hbm_to_vmem [thread:$0]  (!%p3296_p0), %s3290_s27, 65536, %s3292_s29, %s3300_s2, %s3207_s24, %s3208_s25, %s3209_s26  }
  0x2f   : > { %p125_p2 = scmp.lt.s32.totalorder %s3204_s11, 3 }
  0x31   : > { %p126_p5 = pnand %p3001_p12, %p125_p2 }
  0x33   : > { %129 = sbr.rel (%p126_p5) target bundleno = 865 (0x361), region = 24 }
  0x3a   : > { %s3331_s28 = sand.u32 1, %s3188_s7  }
  0x3b   : > { %s3002_s3 = sshll.u32 %s3331_s28, 12  ;;  %s132_s4 = scalar_lea.sflag [#allocation3], %s3331_s28 }
  0x3c   : > { %s3335_s5 = scalar_lea.vmem [#allocation2], %s3002_s3 }
  0x3d   : > { %3175 = dma.done.wait (%p3268_p8), %s132_s4, 65536  }
  0x3e   : > { %3177 = vsyncadd (%p3268_p8), %s132_s4, 4294901760  ;;  %v3342_v0 = vld [vmem:[%s3335_s5] sm:$0xff]  ;;  %v3345_v1 = vld [vmem:[%s3335_s5 + $0x8] sm:$0xff]  ;;  %s3003_s18 = sshll.u32 %s3331_s28, 3  ;;  %vm2869_vm0 = vcmask 1041409   ;;  %vm2871_vm1 = vcmask 1042434  }
  0x3f   : > { %v3348_v2 = vld [vmem:[%s3335_s5 + $0x10] sm:$0xff]  ;;  %v3351_v3 = vld [vmem:[%s3335_s5 + $0x18] sm:$0xff]  ;;  %v3354_v4 = vld [vmem:[%s3335_s5 + $0x20] sm:$0xff]  ;;  %vm2873_vm2 = vcmask 1043459   ;;  %vm2875_vm3 = vcmask 1044484   ;;  %vm2877_vm4 = vcmask 1045509  }
  0x40   : > { %v3357_v5 = vld [vmem:[%s3335_s5 + $0x200] sm:$0xff]  ;;  %v3360_v6 = vld [vmem:[%s3335_s5 + $0x208] sm:$0xff]  ;;  %v3363_v7 = vld [vmem:[%s3335_s5 + $0x210] sm:$0xff]  ;;  %vm2879_vm5 = vcmask 1046534   ;;  %vm2881_vm6 = vcmask 1047559   ;;  %s3026_s27 = sshll.u32 %s3196_s9, 7 }
  0x41   : > { %v3370_v12 = vld [vmem:[%s3335_s5 + $0x28] sm:$0xff]  ;;  %v3373_v13 = vld [vmem:[%s3335_s5 + $0x218] sm:$0xff]  ;;  %v3380_v18 = vld [vmem:[%s3335_s5 + $0x220] sm:$0xff]  ;;  %s153_s29 = scalar_lea.vmem [#allocation5], %s3003_s18  ;;  %s7980_s13 = scalar_lea.hbm %s8030_s1, %s3026_s27 }
  0x42   : > { %v3383_v19 = vld [vmem:[%s3335_s5 + $0x228] sm:$0xff]  ;;  %v3390_v24 = vld [vmem:[%s3335_s5 + $0x30] sm:$0xff]  ;;  %v3400_v30 = vld [vmem:[%s3335_s5 + $0x38] sm:$0xff]  ;;  %s2910_s30 = sshll.u32 %s153_s29, 4  ;;  %s2894_s15 = scalar_lea.sflag [#allocation4], %s3331_s28  ;;  %s7982_s30 = int_to_ptr.vmem [resolvable:$true] %s2910_s30 }
  0x43   : > { %v3393_v25 = vld [vmem:[%s3335_s5 + $0x230] sm:$0xff]  ;;  %v3403_v31 = vld [vmem:[%s3335_s5 + $0x238] sm:$0xff]  ;;  %v3410_v36 = vld [vmem:[%s3335_s5 + $0x40] sm:$0xff]  ;;  %s3122_s16 = scalar_lea.vmem %s7982_s30, 128  ;;  %p10913_p9 = scmp.ne.s32.totalorder %s8960_s19, 0 }
  0x44   : > { %v3413_v37 = vld [vmem:[%s3335_s5 + $0x240] sm:$0xff]  ;;  %v3420_v42 = vld [vmem:[%s3335_s5 + $0x48] sm:$0xff]  ;;  %v3430_v48 = vld [vmem:[%s3335_s5 + $0x50] sm:$0xff]  ;;  %p3123_p8 = scmp.ne.s32.totalorder %s7982_s30, %s3122_s16  ;;  %s3210_s9 = smov [#allocation5]  }
  0x45   : > { %v3423_v43 = vld [vmem:[%s3335_s5 + $0x248] sm:$0xff]  ;;  %v3433_v49 = vld [vmem:[%s3335_s5 + $0x250] sm:$0xff]  ;;  %v3440_v54 = vld [vmem:[%s3335_s5 + $0x58] sm:$0xff]  ;;  %s3126_s17 = sshll.u32 %s3210_s9, 4  ;;  %s3127_s17 = int_to_ptr.vmem [resolvable:$false] %s3126_s17 }
  0x46   : > { %v3443_v55 = vld [vmem:[%s3335_s5 + $0x258] sm:$0xff]  ;;  %v3450_v60 = vld [vmem:[%s3335_s5 + $0x60] sm:$0xff]  ;;  %v3460_v57 = vld [vmem:[%s3335_s5 + $0x68] sm:$0xff]  ;;  %p3124_p11 = pnand %p3123_p8, %p10913_p9  ;;  %s3128_s22 = scalar_lea.vmem %s3127_s17, 256 }
  0x47   : > { %8963 = vst [vmem:[#allocation8_spill] sm:$0xff] %v3443_v55  ;;  %8964 = vst [vmem:[#allocation9_spill] sm:$0xff] %v3450_v60  ;;  %v3453_v61 = vld [vmem:[%s3335_s5 + $0x260] sm:$0xff]  ;;  %v3463_v52 = vld [vmem:[%s3335_s5 + $0x268] sm:$0xff]  ;;  %p3129_p10 = scmp.lt.s32.totalorder %s7982_s30, %s3127_s17  ;;  %p3130_p13 = scmp.lt.s32.totalorder %s3128_s22, %s3122_s16 }
  0x48   : > { %8965 = vst [vmem:[#allocation10_spill] sm:$0xff] %v3453_v61  ;;  %8966 = vst [vmem:[#allocation11_spill] sm:$0xff] %v3460_v57  ;;  %v3470_v63 = vld [vmem:[%s3335_s5 + $0x70] sm:$0xff]  ;;  %v3473_v50 = vld [vmem:[%s3335_s5 + $0x78] sm:$0xff]  ;;  %p3125_p0 = pneg %p3124_p11 }
  0x49   : > { %8967 = vst [vmem:[#allocation12_spill] sm:$0xff] %v3463_v52  ;;  %8968 = vst [vmem:[#allocation13_spill] sm:$0xff] %v3470_v63  ;;  %v3480_v58 = vld [vmem:[%s3335_s5 + $0x80] sm:$0xff]  ;;  %v3483_v46 = vld [vmem:[%s3335_s5 + $0x88] sm:$0xff]  ;;  %p3131_p1 = por %p3130_p13, %p3129_p10 }
  0x4a   : > { %8969 = vst [vmem:[#allocation14_spill] sm:$0xff] %v3473_v50  ;;  %8970 = vst [vmem:[#allocation15_spill] sm:$0xff] %v3480_v58  ;;  %v3490_v56 = vld [vmem:[%s3335_s5 + $0x90] sm:$0xff]  ;;  %v3493_v44 = vld [vmem:[%s3335_s5 + $0x98] sm:$0xff] }
  0x4b   : > { %8971 = vst [vmem:[#allocation16_spill] sm:$0xff] %v3483_v46  ;;  %8972 = vst [vmem:[#allocation17_spill] sm:$0xff] %v3490_v56  ;;  %v3500_v62 = vld [vmem:[%s3335_s5 + $0xa0] sm:$0xff]  ;;  %v3503_v40 = vld [vmem:[%s3335_s5 + $0xa8] sm:$0xff]  ;;  %p3132_p3 = pnand %p3131_p1, %p3125_p0 }
  0x4c   : > { %8973 = vst [vmem:[#allocation18_spill] sm:$0xff] %v3493_v44  ;;  %8974 = vst [vmem:[#allocation19_spill] sm:$0xff] %v3500_v62  ;;  %v3510_v59 = vld [vmem:[%s3335_s5 + $0xb0] sm:$0xff]  ;;  %v3513_v32 = vld [vmem:[%s3335_s5 + $0xb8] sm:$0xff] }
  0x4d   : > { %8975 = vst [vmem:[#allocation20_spill] sm:$0xff] %v3503_v40  ;;  %8976 = vst [vmem:[#allocation21_spill] sm:$0xff] %v3510_v59  ;;  %v3520_v53 = vld [vmem:[%s3335_s5 + $0xc0] sm:$0xff]  ;;  %v3523_v38 = vld [vmem:[%s3335_s5 + $0xc8] sm:$0xff] }
  0x4e   : > { %8977 = vst [vmem:[#allocation22_spill] sm:$0xff] %v3513_v32  ;;  %8978 = vst [vmem:[#allocation23_spill] sm:$0xff] %v3520_v53  ;;  %v3530_v51 = vld [vmem:[%s3335_s5 + $0xd0] sm:$0xff]  ;;  %v3533_v20 = vld [vmem:[%s3335_s5 + $0xd8] sm:$0xff] }
  0x4f   : > { %8979 = vst [vmem:[#allocation24_spill] sm:$0xff] %v3523_v38  ;;  %8980 = vst [vmem:[#allocation25_spill] sm:$0xff] %v3530_v51  ;;  %v3540_v47 = vld [vmem:[%s3335_s5 + $0xe0] sm:$0xff]  ;;  %v3543_v34 = vld [vmem:[%s3335_s5 + $0xe8] sm:$0xff] }
  0x50   : > { %8981 = vst [vmem:[#allocation26_spill] sm:$0xff] %v3533_v20  ;;  %8982 = vst [vmem:[#allocation27_spill] sm:$0xff] %v3540_v47  ;;  %v3550_v45 = vld [vmem:[%s3335_s5 + $0xf0] sm:$0xff]  ;;  %v3553_v16 = vld [vmem:[%s3335_s5 + $0xf8] sm:$0xff] }
  0x51   : > { %8983 = vst [vmem:[#allocation28_spill] sm:$0xff] %v3543_v34  ;;  %8984 = vst [vmem:[#allocation29_spill] sm:$0xff] %v3550_v45  ;;  %v3560_v41 = vld [vmem:[%s3335_s5 + $0x100] sm:$0xff]  ;;  %v3563_v28 = vld [vmem:[%s3335_s5 + $0x108] sm:$0xff] }
  0x52   : > { %8985 = vst [vmem:[#allocation30_spill] sm:$0xff] %v3553_v16  ;;  %8986 = vst [vmem:[#allocation31_spill] sm:$0xff] %v3560_v41  ;;  %v3570_v33 = vld [vmem:[%s3335_s5 + $0x110] sm:$0xff]  ;;  %v3573_v14 = vld [vmem:[%s3335_s5 + $0x118] sm:$0xff] }
  0x53   : > { %8987 = vst [vmem:[#allocation32_spill] sm:$0xff] %v3563_v28  ;;  %8988 = vst [vmem:[#allocation33_spill] sm:$0xff] %v3570_v33  ;;  %v3580_v39 = vld [vmem:[%s3335_s5 + $0x120] sm:$0xff]  ;;  %v3583_v23 = vld [vmem:[%s3335_s5 + $0x128] sm:$0xff] }
  0x54   : > { %8989 = vst [vmem:[#allocation34_spill] sm:$0xff] %v3573_v14  ;;  %8990 = vst [vmem:[#allocation35_spill] sm:$0xff] %v3580_v39  ;;  %v3590_v21 = vld [vmem:[%s3335_s5 + $0x130] sm:$0xff]  ;;  %v3593_v22 = vld [vmem:[%s3335_s5 + $0x138] sm:$0xff] }
  0x55   : > { %8991 = vst [vmem:[#allocation36_spill] sm:$0xff] %v3583_v23  ;;  %8992 = vst [vmem:[#allocation37_spill] sm:$0xff] %v3590_v21  ;;  %v3600_v35 = vld [vmem:[%s3335_s5 + $0x140] sm:$0xff]  ;;  %v3603_v9 = vld [vmem:[%s3335_s5 + $0x148] sm:$0xff] }
  0x56   : > { %8993 = vst [vmem:[#allocation38_spill] sm:$0xff] %v3593_v22  ;;  %8994 = vst [vmem:[#allocation39_spill] sm:$0xff] %v3600_v35  ;;  %v3610_v17 = vld [vmem:[%s3335_s5 + $0x150] sm:$0xff]  ;;  %v3613_v8 = vld [vmem:[%s3335_s5 + $0x158] sm:$0xff] }
  0x57   : > { %8995 = vst [vmem:[#allocation40_spill] sm:$0xff] %v3603_v9  ;;  %8996 = vst [vmem:[#allocation41_spill] sm:$0xff] %v3610_v17  ;;  %v3620_v29 = vld [vmem:[%s3335_s5 + $0x160] sm:$0xff]  ;;  %v3623_v33 = vld [vmem:[%s3335_s5 + $0x168] sm:$0xff] }
  0x58   : > { %8997 = vst [vmem:[#allocation42_spill] sm:$0xff] %v3613_v8  ;;  %8998 = vst [vmem:[#allocation43_spill] sm:$0xff] %v3620_v29  ;;  %v3630_v15 = vld [vmem:[%s3335_s5 + $0x170] sm:$0xff]  ;;  %v3633_v39 = vld [vmem:[%s3335_s5 + $0x178] sm:$0xff] }
  0x59   : > { %8999 = vst [vmem:[#allocation44_spill] sm:$0xff] %v3623_v33  ;;  %9000 = vst [vmem:[#allocation45_spill] sm:$0xff] %v3630_v15  ;;  %v3640_v27 = vld [vmem:[%s3335_s5 + $0x180] sm:$0xff]  ;;  %v3643_v21 = vld [vmem:[%s3335_s5 + $0x188] sm:$0xff] }
  0x5a   : > { %9001 = vst [vmem:[#allocation46_spill] sm:$0xff] %v3633_v39  ;;  %9002 = vst [vmem:[#allocation47_spill] sm:$0xff] %v3640_v27  ;;  %v3650_v26 = vld [vmem:[%s3335_s5 + $0x190] sm:$0xff]  ;;  %v3653_v35 = vld [vmem:[%s3335_s5 + $0x198] sm:$0xff] }
  0x5b   : > { %9003 = vst [vmem:[#allocation48_spill] sm:$0xff] %v3643_v21  ;;  %9004 = vst [vmem:[#allocation49_spill] sm:$0xff] %v3650_v26  ;;  %v3660_v11 = vld [vmem:[%s3335_s5 + $0x1a0] sm:$0xff]  ;;  %v3663_v17 = vld [vmem:[%s3335_s5 + $0x1a8] sm:$0xff] }
  0x5c   : > { %9005 = vst [vmem:[#allocation50_spill] sm:$0xff] %v3653_v35  ;;  %9006 = vst [vmem:[#allocation51_spill] sm:$0xff] %v3660_v11  ;;  %v3670_v10 = vld [vmem:[%s3335_s5 + $0x1b0] sm:$0xff]  ;;  %v3673_v29 = vld [vmem:[%s3335_s5 + $0x1b8] sm:$0xff] }
  0x5d   : > { %9007 = vst [vmem:[#allocation52_spill] sm:$0xff] %v3663_v17  ;;  %9008 = vst [vmem:[#allocation53_spill] sm:$0xff] %v3670_v10  ;;  %v3680_v28 = vld [vmem:[%s3335_s5 + $0x1c0] sm:$0xff]  ;;  %v3683_v15 = vld [vmem:[%s3335_s5 + $0x1c8] sm:$0xff] }
  0x5e   : > { %9009 = vst [vmem:[#allocation54_spill] sm:$0xff] %v3673_v29  ;;  %9010 = vst [vmem:[#allocation55_spill] sm:$0xff] %v3680_v28  ;;  %v3690_v14 = vld [vmem:[%s3335_s5 + $0x1d0] sm:$0xff]  ;;  %v3693_v27 = vld [vmem:[%s3335_s5 + $0x1d8] sm:$0xff] }
  0x5f   : > { %9011 = vst [vmem:[#allocation56_spill] sm:$0xff] %v3683_v15  ;;  %9012 = vst [vmem:[#allocation57_spill] sm:$0xff] %v3690_v14  ;;  %v3700_v23 = vld [vmem:[%s3335_s5 + $0x1e0] sm:$0xff]  ;;  %v3703_v26 = vld [vmem:[%s3335_s5 + $0x1e8] sm:$0xff] }
  0x60   : > { %9013 = vst [vmem:[#allocation58_spill] sm:$0xff] %v3693_v27  ;;  %9014 = vst [vmem:[#allocation59_spill] sm:$0xff] %v3700_v23  ;;  %v3710_v22 = vld [vmem:[%s3335_s5 + $0x1f0] sm:$0xff]  ;;  %v3713_v11 = vld [vmem:[%s3335_s5 + $0x1f8] sm:$0xff] }
  0x61   : > { %9015 = vst [vmem:[#allocation60_spill] sm:$0xff] %v3703_v26  ;;  %9016 = vst [vmem:[#allocation61_spill] sm:$0xff] %v3710_v22  ;;  %v3720_v9 = vld [vmem:[%s3335_s5 + $0x270] sm:$0xff]  ;;  %v3723_v10 = vld [vmem:[%s3335_s5 + $0x278] sm:$0xff] }
  0x62   : > { %9017 = vst [vmem:[#allocation62_spill] sm:$0xff] %v3713_v11  ;;  %9018 = vst [vmem:[#allocation63_spill] sm:$0xff] %v3720_v9  ;;  %v3730_v8 = vld [vmem:[%s3335_s5 + $0x280] sm:$0xff]  ;;  %v3733_v28 = vld [vmem:[%s3335_s5 + $0x288] sm:$0xff] }
  0x63   : > { %9019 = vst [vmem:[#allocation64_spill] sm:$0xff] %v3723_v10  ;;  %9020 = vst [vmem:[#allocation65_spill] sm:$0xff] %v3730_v8  ;;  %v3740_v33 = vld [vmem:[%s3335_s5 + $0x290] sm:$0xff]  ;;  %v3743_v14 = vld [vmem:[%s3335_s5 + $0x298] sm:$0xff] }
  0x64   : > { %9021 = vst [vmem:[#allocation66_spill] sm:$0xff] %v3733_v28  ;;  %9022 = vst [vmem:[#allocation67_spill] sm:$0xff] %v3740_v33  ;;  %v3750_v39 = vld [vmem:[%s3335_s5 + $0x2a0] sm:$0xff]  ;;  %v3753_v23 = vld [vmem:[%s3335_s5 + $0x2a8] sm:$0xff] }
  0x65   : > { %9023 = vst [vmem:[#allocation68_spill] sm:$0xff] %v3743_v14  ;;  %9024 = vst [vmem:[#allocation69_spill] sm:$0xff] %v3750_v39  ;;  %v3760_v21 = vld [vmem:[%s3335_s5 + $0x2b0] sm:$0xff]  ;;  %v3763_v22 = vld [vmem:[%s3335_s5 + $0x2b8] sm:$0xff] }
  0x66   : > { %9025 = vst [vmem:[#allocation70_spill] sm:$0xff] %v3753_v23  ;;  %9026 = vst [vmem:[#allocation71_spill] sm:$0xff] %v3760_v21  ;;  %v3770_v35 = vld [vmem:[%s3335_s5 + $0x2c0] sm:$0xff]  ;;  %v3773_v41 = vld [vmem:[%s3335_s5 + $0x2c8] sm:$0xff] }
  0x67   : > { %9027 = vst [vmem:[#allocation72_spill] sm:$0xff] %v3763_v22  ;;  %9028 = vst [vmem:[#allocation73_spill] sm:$0xff] %v3770_v35  ;;  %v3780_v17 = vld [vmem:[%s3335_s5 + $0x2d0] sm:$0xff]  ;;  %v3783_v45 = vld [vmem:[%s3335_s5 + $0x2d8] sm:$0xff] }
  0x68   : > { %9029 = vst [vmem:[#allocation74_spill] sm:$0xff] %v3773_v41  ;;  %9030 = vst [vmem:[#allocation75_spill] sm:$0xff] %v3780_v17  ;;  %v3790_v29 = vld [vmem:[%s3335_s5 + $0x2e0] sm:$0xff]  ;;  %v3793_v47 = vld [vmem:[%s3335_s5 + $0x2e8] sm:$0xff] }
  0x69   : > { %9031 = vst [vmem:[#allocation76_spill] sm:$0xff] %v3783_v45  ;;  %9032 = vst [vmem:[#allocation77_spill] sm:$0xff] %v3790_v29  ;;  %v3800_v15 = vld [vmem:[%s3335_s5 + $0x2f0] sm:$0xff]  ;;  %v3803_v51 = vld [vmem:[%s3335_s5 + $0x2f8] sm:$0xff] }
  0x6a   : > { %9033 = vst [vmem:[#allocation78_spill] sm:$0xff] %v3793_v47  ;;  %9034 = vst [vmem:[#allocation79_spill] sm:$0xff] %v3800_v15  ;;  %v3810_v27 = vld [vmem:[%s3335_s5 + $0x300] sm:$0xff]  ;;  %v3813_v53 = vld [vmem:[%s3335_s5 + $0x308] sm:$0xff] }
  0x6b   : > { %9035 = vst [vmem:[#allocation80_spill] sm:$0xff] %v3803_v51  ;;  %9036 = vst [vmem:[#allocation81_spill] sm:$0xff] %v3810_v27  ;;  %v3820_v26 = vld [vmem:[%s3335_s5 + $0x310] sm:$0xff]  ;;  %v3823_v35 = vld [vmem:[%s3335_s5 + $0x318] sm:$0xff] }
  0x6c   : > { %9037 = vst [vmem:[#allocation82_spill] sm:$0xff] %v3813_v53  ;;  %9038 = vst [vmem:[#allocation83_spill] sm:$0xff] %v3820_v26  ;;  %v3830_v11 = vld [vmem:[%s3335_s5 + $0x320] sm:$0xff]  ;;  %v3833_v17 = vld [vmem:[%s3335_s5 + $0x328] sm:$0xff] }
  0x6d   : > { %9039 = vst [vmem:[#allocation84_spill] sm:$0xff] %v3823_v35  ;;  %9040 = vst [vmem:[#allocation85_spill] sm:$0xff] %v3830_v11  ;;  %v3840_v16 = vld [vmem:[%s3335_s5 + $0x330] sm:$0xff]  ;;  %v3843_v29 = vld [vmem:[%s3335_s5 + $0x338] sm:$0xff] }
  0x6e   : > { %9041 = vst [vmem:[#allocation86_spill] sm:$0xff] %v3833_v17  ;;  %9042 = vst [vmem:[#allocation87_spill] sm:$0xff] %v3840_v16  ;;  %v3850_v34 = vld [vmem:[%s3335_s5 + $0x340] sm:$0xff]  ;;  %v3853_v15 = vld [vmem:[%s3335_s5 + $0x348] sm:$0xff] }
  0x6f   : > { %9043 = vst [vmem:[#allocation88_spill] sm:$0xff] %v3843_v29  ;;  %9044 = vst [vmem:[#allocation89_spill] sm:$0xff] %v3850_v34  ;;  %v3860_v20 = vld [vmem:[%s3335_s5 + $0x350] sm:$0xff]  ;;  %v3863_v27 = vld [vmem:[%s3335_s5 + $0x358] sm:$0xff] }
  0x70   : > { %9045 = vst [vmem:[#allocation90_spill] sm:$0xff] %v3853_v15  ;;  %9046 = vst [vmem:[#allocation91_spill] sm:$0xff] %v3860_v20  ;;  %v3870_v38 = vld [vmem:[%s3335_s5 + $0x360] sm:$0xff]  ;;  %v3873_v26 = vld [vmem:[%s3335_s5 + $0x368] sm:$0xff] }
  0x71   : > { %9047 = vst [vmem:[#allocation92_spill] sm:$0xff] %v3863_v27  ;;  %9048 = vst [vmem:[#allocation93_spill] sm:$0xff] %v3870_v38  ;;  %v3880_v22 = vld [vmem:[%s3335_s5 + $0x370] sm:$0xff]  ;;  %v3883_v11 = vld [vmem:[%s3335_s5 + $0x378] sm:$0xff] }
  0x72   : > { %9049 = vst [vmem:[#allocation94_spill] sm:$0xff] %v3873_v26  ;;  %9050 = vst [vmem:[#allocation95_spill] sm:$0xff] %v3880_v22  ;;  %v3890_v41 = vld [vmem:[%s3335_s5 + $0x380] sm:$0xff]  ;;  %v3893_v16 = vld [vmem:[%s3335_s5 + $0x388] sm:$0xff] }
  0x73   : > { %9051 = vst [vmem:[#allocation96_spill] sm:$0xff] %v3883_v11  ;;  %9052 = vst [vmem:[#allocation97_spill] sm:$0xff] %v3890_v41  ;;  %v3900_v45 = vld [vmem:[%s3335_s5 + $0x390] sm:$0xff]  ;;  %v3903_v34 = vld [vmem:[%s3335_s5 + $0x398] sm:$0xff] }
  0x74   : > { %9053 = vst [vmem:[#allocation98_spill] sm:$0xff] %v3893_v16  ;;  %9054 = vst [vmem:[#allocation99_spill] sm:$0xff] %v3900_v45  ;;  %v3910_v47 = vld [vmem:[%s3335_s5 + $0x3a0] sm:$0xff]  ;;  %v3913_v20 = vld [vmem:[%s3335_s5 + $0x3a8] sm:$0xff] }
  0x75   : > { %9055 = vst [vmem:[#allocation100_spill] sm:$0xff] %v3903_v34  ;;  %9056 = vst [vmem:[#allocation101_spill] sm:$0xff] %v3910_v47  ;;  %v3920_v51 = vld [vmem:[%s3335_s5 + $0x3b0] sm:$0xff]  ;;  %v3923_v38 = vld [vmem:[%s3335_s5 + $0x3b8] sm:$0xff] }
  0x76   : > { %9057 = vst [vmem:[#allocation102_spill] sm:$0xff] %v3913_v20  ;;  %9058 = vst [vmem:[#allocation103_spill] sm:$0xff] %v3920_v51  ;;  %v3930_v53 = vld [vmem:[%s3335_s5 + $0x3c0] sm:$0xff]  ;;  %v3933_v22 = vld [vmem:[%s3335_s5 + $0x3c8] sm:$0xff] }
  0x77   : > { %9059 = vst [vmem:[#allocation104_spill] sm:$0xff] %v3923_v38  ;;  %9060 = vst [vmem:[#allocation105_spill] sm:$0xff] %v3930_v53  ;;  %v3940_v35 = vld [vmem:[%s3335_s5 + $0x3d0] sm:$0xff]  ;;  %v3943_v41 = vld [vmem:[%s3335_s5 + $0x3d8] sm:$0xff] }
  0x78   : > { %9061 = vst [vmem:[#allocation106_spill] sm:$0xff] %v3933_v22  ;;  %9062 = vst [vmem:[#allocation107_spill] sm:$0xff] %v3940_v35  ;;  %v3950_v17 = vld [vmem:[%s3335_s5 + $0x3e0] sm:$0xff]  ;;  %v3953_v45 = vld [vmem:[%s3335_s5 + $0x3e8] sm:$0xff] }
  0x79   : > { %9063 = vst [vmem:[#allocation108_spill] sm:$0xff] %v3943_v41  ;;  %9064 = vst [vmem:[#allocation109_spill] sm:$0xff] %v3950_v17  ;;  %v3960_v29 = vld [vmem:[%s3335_s5 + $0x3f0] sm:$0xff]  ;;  %v3963_v47 = vld [vmem:[%s3335_s5 + $0x3f8] sm:$0xff] }
  0x7a   : > { %9065 = vst [vmem:[#allocation110_spill] sm:$0xff] %v3953_v45  ;;  %9066 = vst [vmem:[#allocation111_spill] sm:$0xff] %v3960_v29  ;;  %v3970_v15 = vld [vmem:[%s3335_s5 + $0x400] sm:$0xff]  ;;  %v3973_v51 = vld [vmem:[%s3335_s5 + $0x408] sm:$0xff] }
  0x7b   : > { %9067 = vst [vmem:[#allocation112_spill] sm:$0xff] %v3963_v47  ;;  %v3980_v27 = vld [vmem:[%s3335_s5 + $0x410] sm:$0xff]  ;;  %v3983_v53 = vld [vmem:[%s3335_s5 + $0x418] sm:$0xff]  ;;  %v3990_v26 = vld [vmem:[%s3335_s5 + $0x420] sm:$0xff] }
  0x7c   : > { %v3993_v35 = vld [vmem:[%s3335_s5 + $0x428] sm:$0xff]  ;;  %v4000_v11 = vld [vmem:[%s3335_s5 + $0x430] sm:$0xff]  ;;  %v4003_v17 = vld [vmem:[%s3335_s5 + $0x438] sm:$0xff] }
  0x7d   : > { %v4010_v16 = vld [vmem:[%s3335_s5 + $0x440] sm:$0xff]  ;;  %v4013_v29 = vld [vmem:[%s3335_s5 + $0x448] sm:$0xff]  ;;  %v4020_v34 = vld [vmem:[%s3335_s5 + $0x450] sm:$0xff] }
  0x7e   : > { %v4023_v32 = vld [vmem:[%s3335_s5 + $0x458] sm:$0xff]  ;;  %v4030_v20 = vld [vmem:[%s3335_s5 + $0x460] sm:$0xff]  ;;  %v4033_v59 = vld [vmem:[%s3335_s5 + $0x468] sm:$0xff] }
  0x7f   : > { %9068 = vst [vmem:[#allocation113_spill] sm:$0xff] %v4023_v32  ;;  %9069 = vst [vmem:[#allocation114_spill] sm:$0xff] %v4030_v20  ;;  %v4040_v38 = vld [vmem:[%s3335_s5 + $0x470] sm:$0xff]  ;;  %v4043_v40 = vld [vmem:[%s3335_s5 + $0x478] sm:$0xff] }
  0x80   : > { %9070 = vst [vmem:[#allocation115_spill] sm:$0xff] %v4033_v59  ;;  %9071 = vst [vmem:[#allocation116_spill] sm:$0xff] %v4040_v38  ;;  %v4050_v22 = vld [vmem:[%s3335_s5 + $0x480] sm:$0xff]  ;;  %v4053_v62 = vld [vmem:[%s3335_s5 + $0x488] sm:$0xff] }
  0x81   : > { %9072 = vst [vmem:[#allocation117_spill] sm:$0xff] %v4043_v40  ;;  %9073 = vst [vmem:[#allocation118_spill] sm:$0xff] %v4050_v22  ;;  %v4060_v41 = vld [vmem:[%s3335_s5 + $0x490] sm:$0xff]  ;;  %v4063_v44 = vld [vmem:[%s3335_s5 + $0x498] sm:$0xff] }
  0x82   : > { %9074 = vst [vmem:[#allocation119_spill] sm:$0xff] %v4053_v62  ;;  %9075 = vst [vmem:[#allocation120_spill] sm:$0xff] %v4060_v41  ;;  %v4070_v45 = vld [vmem:[%s3335_s5 + $0x4a0] sm:$0xff]  ;;  %v4073_v56 = vld [vmem:[%s3335_s5 + $0x4a8] sm:$0xff] }
  0x83   : > { %9076 = vst [vmem:[#allocation121_spill] sm:$0xff] %v4063_v44  ;;  %9077 = vst [vmem:[#allocation122_spill] sm:$0xff] %v4070_v45  ;;  %v4080_v47 = vld [vmem:[%s3335_s5 + $0x4b0] sm:$0xff]  ;;  %v4083_v46 = vld [vmem:[%s3335_s5 + $0x4b8] sm:$0xff] }
  0x84   : > { %9078 = vst [vmem:[#allocation123_spill] sm:$0xff] %v4073_v56  ;;  %9079 = vst [vmem:[#allocation124_spill] sm:$0xff] %v4080_v47  ;;  %v4090_v21 = vld [vmem:[%s3335_s5 + $0x4c0] sm:$0xff]  ;;  %v4093_v58 = vld [vmem:[%s3335_s5 + $0x4c8] sm:$0xff] }
  0x85   : > { %9080 = vst [vmem:[#allocation125_spill] sm:$0xff] %v4083_v46  ;;  %9081 = vst [vmem:[#allocation126_spill] sm:$0xff] %v4090_v21  ;;  %v4100_v23 = vld [vmem:[%s3335_s5 + $0x4d0] sm:$0xff]  ;;  %v4103_v22 = vld [vmem:[%s3335_s5 + $0x4d8] sm:$0xff] }
  0x86   : > { %9082 = vst [vmem:[#allocation127_spill] sm:$0xff] %v4093_v58  ;;  %9083 = vst [vmem:[#allocation128_spill] sm:$0xff] %v4100_v23  ;;  %v4110_v39 = vld [vmem:[%s3335_s5 + $0x4e0] sm:$0xff]  ;;  %v4113_v41 = vld [vmem:[%s3335_s5 + $0x4e8] sm:$0xff] }
  0x87   : > { %9084 = vst [vmem:[#allocation129_spill] sm:$0xff] %v4103_v22  ;;  %9085 = vst [vmem:[#allocation130_spill] sm:$0xff] %v4110_v39  ;;  %v4120_v14 = vld [vmem:[%s3335_s5 + $0x4f0] sm:$0xff]  ;;  %v4123_v45 = vld [vmem:[%s3335_s5 + $0x4f8] sm:$0xff] }
  0x88   : > { %9086 = vst [vmem:[#allocation131_spill] sm:$0xff] %v4113_v41  ;;  %9087 = vst [vmem:[#allocation132_spill] sm:$0xff] %v4120_v14  ;;  %v4130_v33 = vld [vmem:[%s3335_s5 + $0x500] sm:$0xff]  ;;  %v4133_v47 = vld [vmem:[%s3335_s5 + $0x508] sm:$0xff] }
  0x89   : > { %9088 = vst [vmem:[#allocation133_spill] sm:$0xff] %v4123_v45  ;;  %9089 = vst [vmem:[#allocation134_spill] sm:$0xff] %v4130_v33  ;;  %v4140_v28 = vld [vmem:[%s3335_s5 + $0x510] sm:$0xff]  ;;  %v4143_v21 = vld [vmem:[%s3335_s5 + $0x518] sm:$0xff] }
  0x8a   : > { %9090 = vst [vmem:[#allocation135_spill] sm:$0xff] %v4133_v47  ;;  %9091 = vst [vmem:[#allocation136_spill] sm:$0xff] %v4140_v28  ;;  %v4150_v8 = vld [vmem:[%s3335_s5 + $0x520] sm:$0xff]  ;;  %v4153_v23 = vld [vmem:[%s3335_s5 + $0x528] sm:$0xff] }
  0x8b   : > { %9092 = vst [vmem:[#allocation137_spill] sm:$0xff] %v4143_v21  ;;  %9093 = vst [vmem:[#allocation138_spill] sm:$0xff] %v4150_v8  ;;  %v4160_v40 = vld [vmem:[%s3335_s5 + $0x530] sm:$0xff]  ;;  %v4163_v39 = vld [vmem:[%s3335_s5 + $0x538] sm:$0xff] }
  0x8c   : > { %9094 = vst [vmem:[#allocation139_spill] sm:$0xff] %v4153_v23  ;;  %9095 = vst [vmem:[#allocation140_spill] sm:$0xff] %v4160_v40  ;;  %v4170_v62 = vld [vmem:[%s3335_s5 + $0x540] sm:$0xff]  ;;  %v4173_v14 = vld [vmem:[%s3335_s5 + $0x548] sm:$0xff] }
  0x8d   : > { %9096 = vst [vmem:[#allocation141_spill] sm:$0xff] %v4163_v39  ;;  %9097 = vst [vmem:[#allocation142_spill] sm:$0xff] %v4170_v62  ;;  %v4180_v44 = vld [vmem:[%s3335_s5 + $0x550] sm:$0xff]  ;;  %v4183_v33 = vld [vmem:[%s3335_s5 + $0x558] sm:$0xff] }
  0x8e   : > { %9098 = vst [vmem:[#allocation143_spill] sm:$0xff] %v4173_v14  ;;  %9099 = vst [vmem:[#allocation144_spill] sm:$0xff] %v4180_v44  ;;  %v4190_v56 = vld [vmem:[%s3335_s5 + $0x560] sm:$0xff]  ;;  %v4193_v28 = vld [vmem:[%s3335_s5 + $0x568] sm:$0xff] }
  0x8f   : > { %9100 = vst [vmem:[#allocation145_spill] sm:$0xff] %v4183_v33  ;;  %9101 = vst [vmem:[#allocation146_spill] sm:$0xff] %v4190_v56  ;;  %v4200_v46 = vld [vmem:[%s3335_s5 + $0x570] sm:$0xff]  ;;  %v4203_v8 = vld [vmem:[%s3335_s5 + $0x578] sm:$0xff] }
  0x90   : > { %9102 = vst [vmem:[#allocation147_spill] sm:$0xff] %v4193_v28  ;;  %9103 = vst [vmem:[#allocation148_spill] sm:$0xff] %v4200_v46  ;;  %v4210_v58 = vld [vmem:[%s3335_s5 + $0x580] sm:$0xff]  ;;  %v4213_v40 = vld [vmem:[%s3335_s5 + $0x588] sm:$0xff] }
  0x91   : > { %9104 = vst [vmem:[#allocation149_spill] sm:$0xff] %v4203_v8  ;;  %9105 = vst [vmem:[#allocation150_spill] sm:$0xff] %v4210_v58  ;;  %v4220_v22 = vld [vmem:[%s3335_s5 + $0x590] sm:$0xff]  ;;  %v4223_v62 = vld [vmem:[%s3335_s5 + $0x598] sm:$0xff] }
  0x92   : > { %9106 = vst [vmem:[#allocation151_spill] sm:$0xff] %v4213_v40  ;;  %9107 = vst [vmem:[#allocation152_spill] sm:$0xff] %v4220_v22  ;;  %v4230_v41 = vld [vmem:[%s3335_s5 + $0x5a0] sm:$0xff]  ;;  %v4233_v44 = vld [vmem:[%s3335_s5 + $0x5a8] sm:$0xff] }
  0x93   : > { %9108 = vst [vmem:[#allocation153_spill] sm:$0xff] %v4223_v62  ;;  %9109 = vst [vmem:[#allocation154_spill] sm:$0xff] %v4230_v41  ;;  %v4240_v45 = vld [vmem:[%s3335_s5 + $0x5b0] sm:$0xff]  ;;  %v4243_v56 = vld [vmem:[%s3335_s5 + $0x5b8] sm:$0xff] }
  0x94   : > { %9110 = vst [vmem:[#allocation155_spill] sm:$0xff] %v4233_v44  ;;  %9111 = vst [vmem:[#allocation156_spill] sm:$0xff] %v4240_v45  ;;  %v4250_v47 = vld [vmem:[%s3335_s5 + $0x5c0] sm:$0xff]  ;;  %v4253_v46 = vld [vmem:[%s3335_s5 + $0x5c8] sm:$0xff] }
  0x95   : > { %9112 = vst [vmem:[#allocation157_spill] sm:$0xff] %v4243_v56  ;;  %9113 = vst [vmem:[#allocation158_spill] sm:$0xff] %v4250_v47  ;;  %v4260_v21 = vld [vmem:[%s3335_s5 + $0x5d0] sm:$0xff]  ;;  %v4263_v58 = vld [vmem:[%s3335_s5 + $0x5d8] sm:$0xff] }
  0x96   : > { %9114 = vst [vmem:[#allocation159_spill] sm:$0xff] %v4253_v46  ;;  %9115 = vst [vmem:[#allocation160_spill] sm:$0xff] %v4260_v21  ;;  %v4270_v23 = vld [vmem:[%s3335_s5 + $0x5e0] sm:$0xff]  ;;  %v4273_v22 = vld [vmem:[%s3335_s5 + $0x5e8] sm:$0xff] }
  0x97   : > { %9116 = vst [vmem:[#allocation161_spill] sm:$0xff] %v4263_v58  ;;  %9117 = vst [vmem:[#allocation162_spill] sm:$0xff] %v4270_v23  ;;  %v4280_v39 = vld [vmem:[%s3335_s5 + $0x5f0] sm:$0xff]  ;;  %v4283_v41 = vld [vmem:[%s3335_s5 + $0x5f8] sm:$0xff] }
  0x98   : > { %9118 = vst [vmem:[#allocation163_spill] sm:$0xff] %v4273_v22  ;;  %9119 = vst [vmem:[#allocation164_spill] sm:$0xff] %v4280_v39  ;;  %v4290_v14 = vld [vmem:[%s3335_s5 + $0x600] sm:$0xff]  ;;  %v4293_v45 = vld [vmem:[%s3335_s5 + $0x608] sm:$0xff] }
  0x99   : > { %9120 = vst [vmem:[#allocation165_spill] sm:$0xff] %v4283_v41  ;;  %v4300_v33 = vld [vmem:[%s3335_s5 + $0x610] sm:$0xff]  ;;  %v4303_v47 = vld [vmem:[%s3335_s5 + $0x618] sm:$0xff]  ;;  %v4310_v28 = vld [vmem:[%s3335_s5 + $0x620] sm:$0xff] }
  0x9a   : > { %v4313_v21 = vld [vmem:[%s3335_s5 + $0x628] sm:$0xff]  ;;  %v4320_v8 = vld [vmem:[%s3335_s5 + $0x630] sm:$0xff]  ;;  %v4323_v23 = vld [vmem:[%s3335_s5 + $0x638] sm:$0xff] }
  0x9b   : > { %v4330_v40 = vld [vmem:[%s3335_s5 + $0x640] sm:$0xff]  ;;  %v4333_v39 = vld [vmem:[%s3335_s5 + $0x648] sm:$0xff]  ;;  %v4340_v62 = vld [vmem:[%s3335_s5 + $0x650] sm:$0xff] }
  0x9c   : > { %v4343_v10 = vld [vmem:[%s3335_s5 + $0x658] sm:$0xff]  ;;  %v4350_v44 = vld [vmem:[%s3335_s5 + $0x660] sm:$0xff]  ;;  %v4353_v38 = vld [vmem:[%s3335_s5 + $0x668] sm:$0xff] }
  0x9d   : > { %9121 = vst [vmem:[#allocation166_spill] sm:$0xff] %v4343_v10  ;;  %9122 = vst [vmem:[#allocation167_spill] sm:$0xff] %v4350_v44  ;;  %v4360_v56 = vld [vmem:[%s3335_s5 + $0x670] sm:$0xff]  ;;  %v4363_v63 = vld [vmem:[%s3335_s5 + $0x678] sm:$0xff] }
  0x9e   : > { %9123 = vst [vmem:[#allocation168_spill] sm:$0xff] %v4353_v38  ;;  %9124 = vst [vmem:[#allocation169_spill] sm:$0xff] %v4360_v56  ;;  %v4370_v46 = vld [vmem:[%s3335_s5 + $0x680] sm:$0xff]  ;;  %v4373_v52 = vld [vmem:[%s3335_s5 + $0x688] sm:$0xff] }
  0x9f   : > { %9125 = vst [vmem:[#allocation170_spill] sm:$0xff] %v4363_v63  ;;  %9126 = vst [vmem:[#allocation171_spill] sm:$0xff] %v4370_v46  ;;  %v4380_v58 = vld [vmem:[%s3335_s5 + $0x690] sm:$0xff]  ;;  %v4383_v20 = vld [vmem:[%s3335_s5 + $0x698] sm:$0xff] }
  0xa0   : > { %9127 = vst [vmem:[#allocation172_spill] sm:$0xff] %v4373_v52  ;;  %9128 = vst [vmem:[#allocation173_spill] sm:$0xff] %v4380_v58  ;;  %v4390_v22 = vld [vmem:[%s3335_s5 + $0x6a0] sm:$0xff]  ;;  %v4393_v60 = vld [vmem:[%s3335_s5 + $0x6a8] sm:$0xff] }
  0xa1   : > { %9129 = vst [vmem:[#allocation174_spill] sm:$0xff] %v4383_v20  ;;  %9130 = vst [vmem:[#allocation175_spill] sm:$0xff] %v4390_v22  ;;  %v4400_v41 = vld [vmem:[%s3335_s5 + $0x6b0] sm:$0xff]  ;;  %v4403_v44 = vld [vmem:[%s3335_s5 + $0x6b8] sm:$0xff] }
  0xa2   : > { %9131 = vst [vmem:[#allocation176_spill] sm:$0xff] %v4393_v60  ;;  %9132 = vst [vmem:[#allocation177_spill] sm:$0xff] %v4400_v41  ;;  %v4410_v50 = vld [vmem:[%s3335_s5 + $0x6c0] sm:$0xff]  ;;  %v4413_v56 = vld [vmem:[%s3335_s5 + $0x6c8] sm:$0xff] }
  0xa3   : > { %9133 = vst [vmem:[#allocation178_spill] sm:$0xff] %v4403_v44  ;;  %9134 = vst [vmem:[#allocation179_spill] sm:$0xff] %v4410_v50  ;;  %v4420_v9 = vld [vmem:[%s3335_s5 + $0x6d0] sm:$0xff]  ;;  %v4423_v46 = vld [vmem:[%s3335_s5 + $0x6d8] sm:$0xff] }
  0xa4   : > { %9135 = vst [vmem:[#allocation180_spill] sm:$0xff] %v4413_v56  ;;  %9136 = vst [vmem:[#allocation181_spill] sm:$0xff] %v4420_v9  ;;  %v4430_v59 = vld [vmem:[%s3335_s5 + $0x6e0] sm:$0xff]  ;;  %v4433_v58 = vld [vmem:[%s3335_s5 + $0x6e8] sm:$0xff] }
  0xa5   : > { %9137 = vst [vmem:[#allocation182_spill] sm:$0xff] %v4423_v46  ;;  %9138 = vst [vmem:[#allocation183_spill] sm:$0xff] %v4430_v59  ;;  %v4440_v57 = vld [vmem:[%s3335_s5 + $0x6f0] sm:$0xff]  ;;  %v4443_v22 = vld [vmem:[%s3335_s5 + $0x6f8] sm:$0xff] }
  0xa6   : > { %9139 = vst [vmem:[#allocation184_spill] sm:$0xff] %v4433_v58  ;;  %9140 = vst [vmem:[#allocation185_spill] sm:$0xff] %v4440_v57  ;;  %v4450_v61 = vld [vmem:[%s3335_s5 + $0x700] sm:$0xff]  ;;  %v4453_v41 = vld [vmem:[%s3335_s5 + $0x708] sm:$0xff] }
  0xa7   : > { %9141 = vst [vmem:[#allocation186_spill] sm:$0xff] %v4443_v22  ;;  %9142 = vst [vmem:[#allocation187_spill] sm:$0xff] %v4450_v61  ;;  %v4460_v10 = vld [vmem:[%s3335_s5 + $0x710] sm:$0xff]  ;;  %v4463_v50 = vld [vmem:[%s3335_s5 + $0x718] sm:$0xff] }
  0xa8   : > { %9143 = vst [vmem:[#allocation188_spill] sm:$0xff] %v4453_v41  ;;  %9144 = vst [vmem:[#allocation189_spill] sm:$0xff] %v4460_v10  ;;  %v4470_v38 = vld [vmem:[%s3335_s5 + $0x720] sm:$0xff]  ;;  %v4473_v9 = vld [vmem:[%s3335_s5 + $0x728] sm:$0xff] }
  0xa9   : > { %9145 = vst [vmem:[#allocation190_spill] sm:$0xff] %v4463_v50  ;;  %9146 = vst [vmem:[#allocation191_spill] sm:$0xff] %v4470_v38  ;;  %v4480_v63 = vld [vmem:[%s3335_s5 + $0x730] sm:$0xff]  ;;  %v4483_v59 = vld [vmem:[%s3335_s5 + $0x738] sm:$0xff] }
  0xaa   : > { %9147 = vst [vmem:[#allocation192_spill] sm:$0xff] %v4473_v9  ;;  %9148 = vst [vmem:[#allocation193_spill] sm:$0xff] %v4480_v63  ;;  %v4490_v52 = vld [vmem:[%s3335_s5 + $0x740] sm:$0xff]  ;;  %v4493_v57 = vld [vmem:[%s3335_s5 + $0x748] sm:$0xff] }
  0xab   : > { %9149 = vst [vmem:[#allocation194_spill] sm:$0xff] %v4483_v59  ;;  %9150 = vst [vmem:[#allocation195_spill] sm:$0xff] %v4490_v52  ;;  %v4500_v20 = vld [vmem:[%s3335_s5 + $0x750] sm:$0xff]  ;;  %v4503_v61 = vld [vmem:[%s3335_s5 + $0x758] sm:$0xff] }
  0xac   : > { %9151 = vst [vmem:[#allocation196_spill] sm:$0xff] %v4493_v57  ;;  %9152 = vst [vmem:[#allocation197_spill] sm:$0xff] %v4500_v20  ;;  %v4510_v60 = vld [vmem:[%s3335_s5 + $0x760] sm:$0xff]  ;;  %v4513_v10 = vld [vmem:[%s3335_s5 + $0x768] sm:$0xff] }
  0xad   : > { %9153 = vst [vmem:[#allocation198_spill] sm:$0xff] %v4503_v61  ;;  %9154 = vst [vmem:[#allocation199_spill] sm:$0xff] %v4510_v60  ;;  %v4520_v44 = vld [vmem:[%s3335_s5 + $0x770] sm:$0xff]  ;;  %v4523_v38 = vld [vmem:[%s3335_s5 + $0x778] sm:$0xff] }
  0xae   : > { %9155 = vst [vmem:[#allocation200_spill] sm:$0xff] %v4513_v10  ;;  %9156 = vst [vmem:[#allocation201_spill] sm:$0xff] %v4520_v44  ;;  %v4530_v56 = vld [vmem:[%s3335_s5 + $0x780] sm:$0xff]  ;;  %v4533_v63 = vld [vmem:[%s3335_s5 + $0x788] sm:$0xff] }
  0xaf   : > { %9157 = vst [vmem:[#allocation202_spill] sm:$0xff] %v4523_v38  ;;  %9158 = vst [vmem:[#allocation203_spill] sm:$0xff] %v4530_v56  ;;  %v4540_v46 = vld [vmem:[%s3335_s5 + $0x790] sm:$0xff]  ;;  %v4543_v52 = vld [vmem:[%s3335_s5 + $0x798] sm:$0xff] }
  0xb0   : > { %9159 = vst [vmem:[#allocation204_spill] sm:$0xff] %v4533_v63  ;;  %9160 = vst [vmem:[#allocation205_spill] sm:$0xff] %v4540_v46  ;;  %v4550_v58 = vld [vmem:[%s3335_s5 + $0x7a0] sm:$0xff]  ;;  %v4553_v20 = vld [vmem:[%s3335_s5 + $0x7a8] sm:$0xff] }
  0xb1   : > { %9161 = vst [vmem:[#allocation206_spill] sm:$0xff] %v4543_v52  ;;  %9162 = vst [vmem:[#allocation207_spill] sm:$0xff] %v4550_v58  ;;  %v4560_v22 = vld [vmem:[%s3335_s5 + $0x7b0] sm:$0xff]  ;;  %v4563_v60 = vld [vmem:[%s3335_s5 + $0x7b8] sm:$0xff] }
  0xb2   : > { %9163 = vst [vmem:[#allocation208_spill] sm:$0xff] %v4553_v20  ;;  %9164 = vst [vmem:[#allocation209_spill] sm:$0xff] %v4560_v22  ;;  %v4570_v41 = vld [vmem:[%s3335_s5 + $0x7c0] sm:$0xff]  ;;  %v4573_v44 = vld [vmem:[%s3335_s5 + $0x7c8] sm:$0xff] }
  0xb3   : > { %9165 = vst [vmem:[#allocation210_spill] sm:$0xff] %v4563_v60  ;;  %9166 = vst [vmem:[#allocation211_spill] sm:$0xff] %v4570_v41  ;;  %v4580_v50 = vld [vmem:[%s3335_s5 + $0x7d0] sm:$0xff]  ;;  %v4583_v56 = vld [vmem:[%s3335_s5 + $0x7d8] sm:$0xff] }
  0xb4   : > { %9167 = vst [vmem:[#allocation212_spill] sm:$0xff] %v4573_v44  ;;  %9168 = vst [vmem:[#allocation213_spill] sm:$0xff] %v4580_v50  ;;  %v4590_v9 = vld [vmem:[%s3335_s5 + $0x7e0] sm:$0xff]  ;;  %v4593_v46 = vld [vmem:[%s3335_s5 + $0x7e8] sm:$0xff] }
  0xb5   : > { %9169 = vst [vmem:[#allocation214_spill] sm:$0xff] %v4583_v56  ;;  %9170 = vst [vmem:[#allocation215_spill] sm:$0xff] %v4590_v9  ;;  %v4600_v59 = vld [vmem:[%s3335_s5 + $0x7f0] sm:$0xff]  ;;  %v4603_v58 = vld [vmem:[%s3335_s5 + $0x7f8] sm:$0xff] }
  0xb6   : > { %9171 = vst [vmem:[#allocation216_spill] sm:$0xff] %v4593_v46  ;;  %9172 = vst [vmem:[#allocation217_spill] sm:$0xff] %v4600_v59  ;;  %v4610_v57 = vld [vmem:[%s3335_s5 + $0x800] sm:$0xff]  ;;  %v4613_v22 = vld [vmem:[%s3335_s5 + $0x808] sm:$0xff] }
  0xb7   : > { %9173 = vst [vmem:[#allocation218_spill] sm:$0xff] %v4603_v58  ;;  %9174 = vst [vmem:[#allocation219_spill] sm:$0xff] %v4610_v57  ;;  %v4620_v61 = vld [vmem:[%s3335_s5 + $0x810] sm:$0xff]  ;;  %v4623_v41 = vld [vmem:[%s3335_s5 + $0x818] sm:$0xff] }
  0xb8   : > { %9175 = vst [vmem:[#allocation220_spill] sm:$0xff] %v4613_v22  ;;  %9176 = vst [vmem:[#allocation221_spill] sm:$0xff] %v4620_v61  ;;  %v4630_v10 = vld [vmem:[%s3335_s5 + $0x820] sm:$0xff]  ;;  %v4633_v50 = vld [vmem:[%s3335_s5 + $0x828] sm:$0xff] }
  0xb9   : > { %9177 = vst [vmem:[#allocation222_spill] sm:$0xff] %v4623_v41  ;;  %9178 = vst [vmem:[#allocation223_spill] sm:$0xff] %v4630_v10  ;;  %v4640_v38 = vld [vmem:[%s3335_s5 + $0x830] sm:$0xff]  ;;  %v4643_v9 = vld [vmem:[%s3335_s5 + $0x838] sm:$0xff] }
  0xba   : > { %9179 = vst [vmem:[#allocation224_spill] sm:$0xff] %v4633_v50  ;;  %9180 = vst [vmem:[#allocation225_spill] sm:$0xff] %v4640_v38  ;;  %v4650_v63 = vld [vmem:[%s3335_s5 + $0x840] sm:$0xff]  ;;  %v4653_v59 = vld [vmem:[%s3335_s5 + $0x848] sm:$0xff] }
  0xbb   : > { %9181 = vst [vmem:[#allocation226_spill] sm:$0xff] %v4643_v9  ;;  %9182 = vst [vmem:[#allocation227_spill] sm:$0xff] %v4650_v63  ;;  %v4660_v52 = vld [vmem:[%s3335_s5 + $0x850] sm:$0xff]  ;;  %v4663_v57 = vld [vmem:[%s3335_s5 + $0x858] sm:$0xff] }
  0xbc   : > { %9183 = vst [vmem:[#allocation228_spill] sm:$0xff] %v4653_v59  ;;  %9184 = vst [vmem:[#allocation229_spill] sm:$0xff] %v4660_v52  ;;  %v4670_v20 = vld [vmem:[%s3335_s5 + $0x860] sm:$0xff]  ;;  %v4673_v61 = vld [vmem:[%s3335_s5 + $0x868] sm:$0xff] }
  0xbd   : > { %9185 = vst [vmem:[#allocation230_spill] sm:$0xff] %v4663_v57  ;;  %9186 = vst [vmem:[#allocation231_spill] sm:$0xff] %v4670_v20  ;;  %v4680_v60 = vld [vmem:[%s3335_s5 + $0x870] sm:$0xff]  ;;  %v4683_v10 = vld [vmem:[%s3335_s5 + $0x878] sm:$0xff] }
  0xbe   : > { %9187 = vst [vmem:[#allocation232_spill] sm:$0xff] %v4673_v61  ;;  %9188 = vst [vmem:[#allocation233_spill] sm:$0xff] %v4680_v60  ;;  %v4690_v44 = vld [vmem:[%s3335_s5 + $0x880] sm:$0xff]  ;;  %v4693_v38 = vld [vmem:[%s3335_s5 + $0x888] sm:$0xff] }
  0xbf   : > { %9189 = vst [vmem:[#allocation234_spill] sm:$0xff] %v4683_v10  ;;  %9190 = vst [vmem:[#allocation235_spill] sm:$0xff] %v4690_v44  ;;  %v4700_v56 = vld [vmem:[%s3335_s5 + $0x890] sm:$0xff]  ;;  %v4703_v63 = vld [vmem:[%s3335_s5 + $0x898] sm:$0xff] }
  0xc0   : > { %9191 = vst [vmem:[#allocation236_spill] sm:$0xff] %v4693_v38  ;;  %9192 = vst [vmem:[#allocation237_spill] sm:$0xff] %v4700_v56  ;;  %v4710_v46 = vld [vmem:[%s3335_s5 + $0x8a0] sm:$0xff]  ;;  %v4713_v52 = vld [vmem:[%s3335_s5 + $0x8a8] sm:$0xff] }
  0xc1   : > { %9193 = vst [vmem:[#allocation238_spill] sm:$0xff] %v4703_v63  ;;  %9194 = vst [vmem:[#allocation239_spill] sm:$0xff] %v4710_v46  ;;  %v4720_v58 = vld [vmem:[%s3335_s5 + $0x8b0] sm:$0xff]  ;;  %v4723_v20 = vld [vmem:[%s3335_s5 + $0x8b8] sm:$0xff] }
  0xc2   : > { %9195 = vst [vmem:[#allocation240_spill] sm:$0xff] %v4713_v52  ;;  %9196 = vst [vmem:[#allocation241_spill] sm:$0xff] %v4720_v58  ;;  %v4730_v22 = vld [vmem:[%s3335_s5 + $0x8c0] sm:$0xff]  ;;  %v4733_v60 = vld [vmem:[%s3335_s5 + $0x8c8] sm:$0xff] }
  0xc3   : > { %9197 = vst [vmem:[#allocation242_spill] sm:$0xff] %v4723_v20  ;;  %9198 = vst [vmem:[#allocation243_spill] sm:$0xff] %v4730_v22  ;;  %v4740_v41 = vld [vmem:[%s3335_s5 + $0x8d0] sm:$0xff]  ;;  %v4743_v44 = vld [vmem:[%s3335_s5 + $0x8d8] sm:$0xff] }
  0xc4   : > { %9199 = vst [vmem:[#allocation244_spill] sm:$0xff] %v4733_v60  ;;  %9200 = vst [vmem:[#allocation245_spill] sm:$0xff] %v4740_v41  ;;  %v4750_v50 = vld [vmem:[%s3335_s5 + $0x8e0] sm:$0xff]  ;;  %v4753_v56 = vld [vmem:[%s3335_s5 + $0x8e8] sm:$0xff] }
  0xc5   : > { %9201 = vst [vmem:[#allocation246_spill] sm:$0xff] %v4743_v44  ;;  %9202 = vst [vmem:[#allocation247_spill] sm:$0xff] %v4750_v50  ;;  %v4760_v9 = vld [vmem:[%s3335_s5 + $0x8f0] sm:$0xff]  ;;  %v4763_v46 = vld [vmem:[%s3335_s5 + $0x8f8] sm:$0xff] }
  0xc6   : > { %9203 = vst [vmem:[#allocation248_spill] sm:$0xff] %v4753_v56  ;;  %9204 = vst [vmem:[#allocation249_spill] sm:$0xff] %v4760_v9  ;;  %v4770_v59 = vld [vmem:[%s3335_s5 + $0x900] sm:$0xff]  ;;  %v4773_v58 = vld [vmem:[%s3335_s5 + $0x908] sm:$0xff] }
  0xc7   : > { %9205 = vst [vmem:[#allocation250_spill] sm:$0xff] %v4763_v46  ;;  %9206 = vst [vmem:[#allocation251_spill] sm:$0xff] %v4770_v59  ;;  %v4780_v57 = vld [vmem:[%s3335_s5 + $0x910] sm:$0xff]  ;;  %v4783_v22 = vld [vmem:[%s3335_s5 + $0x918] sm:$0xff] }
  0xc8   : > { %9207 = vst [vmem:[#allocation252_spill] sm:$0xff] %v4773_v58  ;;  %9208 = vst [vmem:[#allocation253_spill] sm:$0xff] %v4780_v57  ;;  %v4790_v61 = vld [vmem:[%s3335_s5 + $0x920] sm:$0xff]  ;;  %v4793_v41 = vld [vmem:[%s3335_s5 + $0x928] sm:$0xff] }
  0xc9   : > { %9209 = vst [vmem:[#allocation254_spill] sm:$0xff] %v4783_v22  ;;  %9210 = vst [vmem:[#allocation255_spill] sm:$0xff] %v4790_v61  ;;  %v4800_v10 = vld [vmem:[%s3335_s5 + $0x930] sm:$0xff]  ;;  %v4803_v50 = vld [vmem:[%s3335_s5 + $0x938] sm:$0xff] }
  0xca   : > { %9211 = vst [vmem:[#allocation256_spill] sm:$0xff] %v4793_v41  ;;  %9212 = vst [vmem:[#allocation257_spill] sm:$0xff] %v4800_v10  ;;  %v4810_v38 = vld [vmem:[%s3335_s5 + $0x940] sm:$0xff]  ;;  %v4813_v9 = vld [vmem:[%s3335_s5 + $0x948] sm:$0xff] }
  0xcb   : > { %9213 = vst [vmem:[#allocation258_spill] sm:$0xff] %v4803_v50  ;;  %9214 = vst [vmem:[#allocation259_spill] sm:$0xff] %v4810_v38  ;;  %v4820_v63 = vld [vmem:[%s3335_s5 + $0x950] sm:$0xff]  ;;  %v4823_v59 = vld [vmem:[%s3335_s5 + $0x958] sm:$0xff] }
  0xcc   : > { %9215 = vst [vmem:[#allocation260_spill] sm:$0xff] %v4813_v9  ;;  %9216 = vst [vmem:[#allocation261_spill] sm:$0xff] %v4820_v63  ;;  %v4830_v52 = vld [vmem:[%s3335_s5 + $0x960] sm:$0xff]  ;;  %v4833_v57 = vld [vmem:[%s3335_s5 + $0x968] sm:$0xff] }
  0xcd   : > { %9217 = vst [vmem:[#allocation262_spill] sm:$0xff] %v4823_v59  ;;  %9218 = vst [vmem:[#allocation263_spill] sm:$0xff] %v4830_v52  ;;  %v4840_v20 = vld [vmem:[%s3335_s5 + $0x970] sm:$0xff]  ;;  %v4843_v61 = vld [vmem:[%s3335_s5 + $0x978] sm:$0xff] }
  0xce   : > { %9219 = vst [vmem:[#allocation264_spill] sm:$0xff] %v4833_v57  ;;  %9220 = vst [vmem:[#allocation265_spill] sm:$0xff] %v4840_v20  ;;  %v4850_v60 = vld [vmem:[%s3335_s5 + $0x980] sm:$0xff]  ;;  %v4853_v10 = vld [vmem:[%s3335_s5 + $0x988] sm:$0xff] }
  0xcf   : > { %9221 = vst [vmem:[#allocation266_spill] sm:$0xff] %v4843_v61  ;;  %9222 = vst [vmem:[#allocation267_spill] sm:$0xff] %v4850_v60  ;;  %v4860_v44 = vld [vmem:[%s3335_s5 + $0x990] sm:$0xff]  ;;  %v4863_v38 = vld [vmem:[%s3335_s5 + $0x998] sm:$0xff] }
  0xd0   : > { %9223 = vst [vmem:[#allocation268_spill] sm:$0xff] %v4853_v10  ;;  %9224 = vst [vmem:[#allocation269_spill] sm:$0xff] %v4860_v44  ;;  %v4870_v56 = vld [vmem:[%s3335_s5 + $0x9a0] sm:$0xff]  ;;  %v4873_v63 = vld [vmem:[%s3335_s5 + $0x9a8] sm:$0xff] }
  0xd1   : > { %9225 = vst [vmem:[#allocation270_spill] sm:$0xff] %v4863_v38  ;;  %9226 = vst [vmem:[#allocation271_spill] sm:$0xff] %v4870_v56  ;;  %v4880_v46 = vld [vmem:[%s3335_s5 + $0x9b0] sm:$0xff]  ;;  %v4883_v52 = vld [vmem:[%s3335_s5 + $0x9b8] sm:$0xff] }
  0xd2   : > { %9227 = vst [vmem:[#allocation272_spill] sm:$0xff] %v4873_v63  ;;  %9228 = vst [vmem:[#allocation273_spill] sm:$0xff] %v4880_v46  ;;  %v4890_v58 = vld [vmem:[%s3335_s5 + $0x9c0] sm:$0xff]  ;;  %v4893_v20 = vld [vmem:[%s3335_s5 + $0x9c8] sm:$0xff] }
  0xd3   : > { %9229 = vst [vmem:[#allocation274_spill] sm:$0xff] %v4883_v52  ;;  %9230 = vst [vmem:[#allocation275_spill] sm:$0xff] %v4890_v58  ;;  %v4900_v22 = vld [vmem:[%s3335_s5 + $0x9d0] sm:$0xff]  ;;  %v4903_v60 = vld [vmem:[%s3335_s5 + $0x9d8] sm:$0xff] }
  0xd4   : > { %9231 = vst [vmem:[#allocation276_spill] sm:$0xff] %v4893_v20  ;;  %9232 = vst [vmem:[#allocation277_spill] sm:$0xff] %v4900_v22  ;;  %v4910_v41 = vld [vmem:[%s3335_s5 + $0x9e0] sm:$0xff]  ;;  %v4913_v44 = vld [vmem:[%s3335_s5 + $0x9e8] sm:$0xff] }
  0xd5   : > { %9233 = vst [vmem:[#allocation278_spill] sm:$0xff] %v4903_v60  ;;  %9234 = vst [vmem:[#allocation279_spill] sm:$0xff] %v4910_v41  ;;  %v4920_v50 = vld [vmem:[%s3335_s5 + $0x9f0] sm:$0xff]  ;;  %v4923_v56 = vld [vmem:[%s3335_s5 + $0x9f8] sm:$0xff] }
  0xd6   : > { %9235 = vst [vmem:[#allocation280_spill] sm:$0xff] %v4913_v44  ;;  %9236 = vst [vmem:[#allocation281_spill] sm:$0xff] %v4920_v50  ;;  %v4930_v9 = vld [vmem:[%s3335_s5 + $0xa00] sm:$0xff]  ;;  %v4933_v46 = vld [vmem:[%s3335_s5 + $0xa08] sm:$0xff] }
  0xd7   : > { %9237 = vst [vmem:[#allocation282_spill] sm:$0xff] %v4923_v56  ;;  %9238 = vst [vmem:[#allocation283_spill] sm:$0xff] %v4930_v9  ;;  %v4940_v59 = vld [vmem:[%s3335_s5 + $0xa10] sm:$0xff]  ;;  %v4943_v58 = vld [vmem:[%s3335_s5 + $0xa18] sm:$0xff] }
  0xd8   : > { %9239 = vst [vmem:[#allocation284_spill] sm:$0xff] %v4933_v46  ;;  %9240 = vst [vmem:[#allocation285_spill] sm:$0xff] %v4940_v59  ;;  %v4950_v57 = vld [vmem:[%s3335_s5 + $0xa20] sm:$0xff]  ;;  %v4953_v22 = vld [vmem:[%s3335_s5 + $0xa28] sm:$0xff] }
  0xd9   : > { %9241 = vst [vmem:[#allocation286_spill] sm:$0xff] %v4943_v58  ;;  %9242 = vst [vmem:[#allocation287_spill] sm:$0xff] %v4950_v57  ;;  %v4960_v61 = vld [vmem:[%s3335_s5 + $0xa30] sm:$0xff]  ;;  %v4963_v41 = vld [vmem:[%s3335_s5 + $0xa38] sm:$0xff] }
  0xda   : > { %9243 = vst [vmem:[#allocation288_spill] sm:$0xff] %v4953_v22  ;;  %9244 = vst [vmem:[#allocation289_spill] sm:$0xff] %v4960_v61  ;;  %v4970_v10 = vld [vmem:[%s3335_s5 + $0xa40] sm:$0xff]  ;;  %v4973_v50 = vld [vmem:[%s3335_s5 + $0xa48] sm:$0xff] }
  0xdb   : > { %9245 = vst [vmem:[#allocation290_spill] sm:$0xff] %v4963_v41  ;;  %9246 = vst [vmem:[#allocation291_spill] sm:$0xff] %v4970_v10  ;;  %v4980_v38 = vld [vmem:[%s3335_s5 + $0xa50] sm:$0xff]  ;;  %v4983_v9 = vld [vmem:[%s3335_s5 + $0xa58] sm:$0xff] }
  0xdc   : > { %9247 = vst [vmem:[#allocation292_spill] sm:$0xff] %v4973_v50  ;;  %9248 = vst [vmem:[#allocation293_spill] sm:$0xff] %v4980_v38  ;;  %v4990_v63 = vld [vmem:[%s3335_s5 + $0xa60] sm:$0xff]  ;;  %v4993_v59 = vld [vmem:[%s3335_s5 + $0xa68] sm:$0xff] }
  0xdd   : > { %9249 = vst [vmem:[#allocation294_spill] sm:$0xff] %v4983_v9  ;;  %9250 = vst [vmem:[#allocation295_spill] sm:$0xff] %v4990_v63  ;;  %v5000_v52 = vld [vmem:[%s3335_s5 + $0xa70] sm:$0xff]  ;;  %v5003_v57 = vld [vmem:[%s3335_s5 + $0xa78] sm:$0xff] }
  0xde   : > { %9251 = vst [vmem:[#allocation296_spill] sm:$0xff] %v4993_v59  ;;  %9252 = vst [vmem:[#allocation297_spill] sm:$0xff] %v5000_v52  ;;  %v5010_v20 = vld [vmem:[%s3335_s5 + $0xa80] sm:$0xff]  ;;  %v5013_v61 = vld [vmem:[%s3335_s5 + $0xa88] sm:$0xff] }
  0xdf   : > { %9253 = vst [vmem:[#allocation298_spill] sm:$0xff] %v5003_v57  ;;  %9254 = vst [vmem:[#allocation299_spill] sm:$0xff] %v5010_v20  ;;  %v5020_v60 = vld [vmem:[%s3335_s5 + $0xa90] sm:$0xff]  ;;  %v5023_v10 = vld [vmem:[%s3335_s5 + $0xa98] sm:$0xff] }
  0xe0   : > { %9255 = vst [vmem:[#allocation300_spill] sm:$0xff] %v5013_v61  ;;  %9256 = vst [vmem:[#allocation301_spill] sm:$0xff] %v5020_v60  ;;  %v5030_v44 = vld [vmem:[%s3335_s5 + $0xaa0] sm:$0xff]  ;;  %v5033_v38 = vld [vmem:[%s3335_s5 + $0xaa8] sm:$0xff] }
  0xe1   : > { %9257 = vst [vmem:[#allocation302_spill] sm:$0xff] %v5023_v10  ;;  %9258 = vst [vmem:[#allocation303_spill] sm:$0xff] %v5030_v44  ;;  %v5040_v56 = vld [vmem:[%s3335_s5 + $0xab0] sm:$0xff]  ;;  %v5043_v63 = vld [vmem:[%s3335_s5 + $0xab8] sm:$0xff] }
  0xe2   : > { %9259 = vst [vmem:[#allocation304_spill] sm:$0xff] %v5033_v38  ;;  %9260 = vst [vmem:[#allocation305_spill] sm:$0xff] %v5040_v56  ;;  %v5050_v46 = vld [vmem:[%s3335_s5 + $0xac0] sm:$0xff]  ;;  %v5053_v52 = vld [vmem:[%s3335_s5 + $0xac8] sm:$0xff] }
  0xe3   : > { %9261 = vst [vmem:[#allocation306_spill] sm:$0xff] %v5043_v63  ;;  %9262 = vst [vmem:[#allocation307_spill] sm:$0xff] %v5050_v46  ;;  %v5060_v58 = vld [vmem:[%s3335_s5 + $0xad0] sm:$0xff]  ;;  %v5063_v20 = vld [vmem:[%s3335_s5 + $0xad8] sm:$0xff] }
  0xe4   : > { %9263 = vst [vmem:[#allocation308_spill] sm:$0xff] %v5053_v52  ;;  %9264 = vst [vmem:[#allocation309_spill] sm:$0xff] %v5060_v58  ;;  %v5070_v22 = vld [vmem:[%s3335_s5 + $0xae0] sm:$0xff]  ;;  %v5073_v60 = vld [vmem:[%s3335_s5 + $0xae8] sm:$0xff] }
  0xe5   : > { %9265 = vst [vmem:[#allocation310_spill] sm:$0xff] %v5063_v20  ;;  %9266 = vst [vmem:[#allocation311_spill] sm:$0xff] %v5070_v22  ;;  %v5080_v41 = vld [vmem:[%s3335_s5 + $0xaf0] sm:$0xff]  ;;  %v5083_v44 = vld [vmem:[%s3335_s5 + $0xaf8] sm:$0xff] }
  0xe6   : > { %9267 = vst [vmem:[#allocation312_spill] sm:$0xff] %v5073_v60  ;;  %9268 = vst [vmem:[#allocation313_spill] sm:$0xff] %v5080_v41  ;;  %v5090_v50 = vld [vmem:[%s3335_s5 + $0xb00] sm:$0xff]  ;;  %v5093_v56 = vld [vmem:[%s3335_s5 + $0xb08] sm:$0xff] }
  0xe7   : > { %9269 = vst [vmem:[#allocation314_spill] sm:$0xff] %v5083_v44  ;;  %9270 = vst [vmem:[#allocation315_spill] sm:$0xff] %v5090_v50  ;;  %v5100_v9 = vld [vmem:[%s3335_s5 + $0xb10] sm:$0xff]  ;;  %v5103_v46 = vld [vmem:[%s3335_s5 + $0xb18] sm:$0xff] }
  0xe8   : > { %9271 = vst [vmem:[#allocation316_spill] sm:$0xff] %v5093_v56  ;;  %9272 = vst [vmem:[#allocation317_spill] sm:$0xff] %v5100_v9  ;;  %v5110_v59 = vld [vmem:[%s3335_s5 + $0xb20] sm:$0xff]  ;;  %v5113_v58 = vld [vmem:[%s3335_s5 + $0xb28] sm:$0xff] }
  0xe9   : > { %9273 = vst [vmem:[#allocation318_spill] sm:$0xff] %v5103_v46  ;;  %9274 = vst [vmem:[#allocation319_spill] sm:$0xff] %v5110_v59  ;;  %v5120_v57 = vld [vmem:[%s3335_s5 + $0xb30] sm:$0xff]  ;;  %v5123_v22 = vld [vmem:[%s3335_s5 + $0xb38] sm:$0xff] }
  0xea   : > { %9275 = vst [vmem:[#allocation320_spill] sm:$0xff] %v5113_v58  ;;  %9276 = vst [vmem:[#allocation321_spill] sm:$0xff] %v5120_v57  ;;  %v5130_v61 = vld [vmem:[%s3335_s5 + $0xb40] sm:$0xff]  ;;  %v5133_v41 = vld [vmem:[%s3335_s5 + $0xb48] sm:$0xff] }
  0xeb   : > { %9277 = vst [vmem:[#allocation322_spill] sm:$0xff] %v5123_v22  ;;  %9278 = vst [vmem:[#allocation323_spill] sm:$0xff] %v5130_v61  ;;  %v5140_v10 = vld [vmem:[%s3335_s5 + $0xb50] sm:$0xff]  ;;  %v5143_v50 = vld [vmem:[%s3335_s5 + $0xb58] sm:$0xff] }
  0xec   : > { %9279 = vst [vmem:[#allocation324_spill] sm:$0xff] %v5133_v41  ;;  %9280 = vst [vmem:[#allocation325_spill] sm:$0xff] %v5140_v10  ;;  %v5150_v38 = vld [vmem:[%s3335_s5 + $0xb60] sm:$0xff]  ;;  %v5153_v9 = vld [vmem:[%s3335_s5 + $0xb68] sm:$0xff] }
  0xed   : > { %9281 = vst [vmem:[#allocation326_spill] sm:$0xff] %v5143_v50  ;;  %9282 = vst [vmem:[#allocation327_spill] sm:$0xff] %v5150_v38  ;;  %v5160_v63 = vld [vmem:[%s3335_s5 + $0xb70] sm:$0xff]  ;;  %v5163_v59 = vld [vmem:[%s3335_s5 + $0xb78] sm:$0xff] }
  0xee   : > { %9283 = vst [vmem:[#allocation328_spill] sm:$0xff] %v5153_v9  ;;  %9284 = vst [vmem:[#allocation329_spill] sm:$0xff] %v5160_v63  ;;  %v5170_v52 = vld [vmem:[%s3335_s5 + $0xb80] sm:$0xff]  ;;  %v5173_v57 = vld [vmem:[%s3335_s5 + $0xb88] sm:$0xff] }
  0xef   : > { %9285 = vst [vmem:[#allocation330_spill] sm:$0xff] %v5163_v59  ;;  %9286 = vst [vmem:[#allocation331_spill] sm:$0xff] %v5170_v52  ;;  %v5180_v20 = vld [vmem:[%s3335_s5 + $0xb90] sm:$0xff]  ;;  %v5183_v61 = vld [vmem:[%s3335_s5 + $0xb98] sm:$0xff] }
  0xf0   : > { %9287 = vst [vmem:[#allocation332_spill] sm:$0xff] %v5173_v57  ;;  %9288 = vst [vmem:[#allocation333_spill] sm:$0xff] %v5180_v20  ;;  %v5190_v60 = vld [vmem:[%s3335_s5 + $0xba0] sm:$0xff]  ;;  %v5193_v10 = vld [vmem:[%s3335_s5 + $0xba8] sm:$0xff] }
  0xf1   : > { %9289 = vst [vmem:[#allocation334_spill] sm:$0xff] %v5183_v61  ;;  %9290 = vst [vmem:[#allocation335_spill] sm:$0xff] %v5190_v60  ;;  %v5200_v44 = vld [vmem:[%s3335_s5 + $0xbb0] sm:$0xff]  ;;  %v5203_v38 = vld [vmem:[%s3335_s5 + $0xbb8] sm:$0xff] }
  0xf2   : > { %9291 = vst [vmem:[#allocation336_spill] sm:$0xff] %v5193_v10  ;;  %9292 = vst [vmem:[#allocation337_spill] sm:$0xff] %v5200_v44  ;;  %v5210_v56 = vld [vmem:[%s3335_s5 + $0xbc0] sm:$0xff]  ;;  %v5213_v63 = vld [vmem:[%s3335_s5 + $0xbc8] sm:$0xff] }
  0xf3   : > { %9293 = vst [vmem:[#allocation338_spill] sm:$0xff] %v5203_v38  ;;  %9294 = vst [vmem:[#allocation339_spill] sm:$0xff] %v5210_v56  ;;  %v5220_v46 = vld [vmem:[%s3335_s5 + $0xbd0] sm:$0xff]  ;;  %v5223_v52 = vld [vmem:[%s3335_s5 + $0xbd8] sm:$0xff] }
  0xf4   : > { %9295 = vst [vmem:[#allocation340_spill] sm:$0xff] %v5213_v63  ;;  %9296 = vst [vmem:[#allocation341_spill] sm:$0xff] %v5220_v46  ;;  %v5230_v58 = vld [vmem:[%s3335_s5 + $0xbe0] sm:$0xff]  ;;  %v5233_v20 = vld [vmem:[%s3335_s5 + $0xbe8] sm:$0xff] }
  0xf5   : > { %9297 = vst [vmem:[#allocation342_spill] sm:$0xff] %v5223_v52  ;;  %9298 = vst [vmem:[#allocation343_spill] sm:$0xff] %v5230_v58  ;;  %v5240_v22 = vld [vmem:[%s3335_s5 + $0xbf0] sm:$0xff]  ;;  %v5243_v60 = vld [vmem:[%s3335_s5 + $0xbf8] sm:$0xff] }
  0xf6   : > { %9299 = vst [vmem:[#allocation344_spill] sm:$0xff] %v5233_v20  ;;  %9300 = vst [vmem:[#allocation345_spill] sm:$0xff] %v5240_v22  ;;  %v5250_v41 = vld [vmem:[%s3335_s5 + $0xc00] sm:$0xff]  ;;  %v5253_v44 = vld [vmem:[%s3335_s5 + $0xc08] sm:$0xff] }
  0xf7   : > { %9301 = vst [vmem:[#allocation346_spill] sm:$0xff] %v5243_v60  ;;  %9302 = vst [vmem:[#allocation347_spill] sm:$0xff] %v5250_v41  ;;  %v5260_v50 = vld [vmem:[%s3335_s5 + $0xc10] sm:$0xff]  ;;  %v5263_v56 = vld [vmem:[%s3335_s5 + $0xc18] sm:$0xff] }
  0xf8   : > { %9303 = vst [vmem:[#allocation348_spill] sm:$0xff] %v5253_v44  ;;  %9304 = vst [vmem:[#allocation349_spill] sm:$0xff] %v5260_v50  ;;  %v5270_v9 = vld [vmem:[%s3335_s5 + $0xc20] sm:$0xff]  ;;  %v5273_v46 = vld [vmem:[%s3335_s5 + $0xc28] sm:$0xff] }
  0xf9   : > { %9305 = vst [vmem:[#allocation350_spill] sm:$0xff] %v5263_v56  ;;  %9306 = vst [vmem:[#allocation351_spill] sm:$0xff] %v5270_v9  ;;  %v5280_v59 = vld [vmem:[%s3335_s5 + $0xc30] sm:$0xff]  ;;  %v5283_v58 = vld [vmem:[%s3335_s5 + $0xc38] sm:$0xff] }
  0xfa   : > { %9307 = vst [vmem:[#allocation352_spill] sm:$0xff] %v5273_v46  ;;  %9308 = vst [vmem:[#allocation353_spill] sm:$0xff] %v5280_v59  ;;  %v5290_v57 = vld [vmem:[%s3335_s5 + $0xc40] sm:$0xff]  ;;  %v5293_v22 = vld [vmem:[%s3335_s5 + $0xc48] sm:$0xff] }
  0xfb   : > { %9309 = vst [vmem:[#allocation354_spill] sm:$0xff] %v5283_v58  ;;  %9310 = vst [vmem:[#allocation355_spill] sm:$0xff] %v5290_v57  ;;  %v5300_v61 = vld [vmem:[%s3335_s5 + $0xc50] sm:$0xff]  ;;  %v5303_v41 = vld [vmem:[%s3335_s5 + $0xc58] sm:$0xff] }
  0xfc   : > { %9311 = vst [vmem:[#allocation356_spill] sm:$0xff] %v5293_v22  ;;  %9312 = vst [vmem:[#allocation357_spill] sm:$0xff] %v5300_v61  ;;  %v5310_v10 = vld [vmem:[%s3335_s5 + $0xc60] sm:$0xff]  ;;  %v5313_v50 = vld [vmem:[%s3335_s5 + $0xc68] sm:$0xff] }
  0xfd   : > { %9313 = vst [vmem:[#allocation358_spill] sm:$0xff] %v5303_v41  ;;  %9314 = vst [vmem:[#allocation359_spill] sm:$0xff] %v5310_v10  ;;  %v5320_v38 = vld [vmem:[%s3335_s5 + $0xc70] sm:$0xff]  ;;  %v5323_v9 = vld [vmem:[%s3335_s5 + $0xc78] sm:$0xff] }
  0xfe   : > { %9315 = vst [vmem:[#allocation360_spill] sm:$0xff] %v5313_v50  ;;  %9316 = vst [vmem:[#allocation361_spill] sm:$0xff] %v5320_v38  ;;  %v5330_v63 = vld [vmem:[%s3335_s5 + $0xc80] sm:$0xff]  ;;  %v5333_v59 = vld [vmem:[%s3335_s5 + $0xc88] sm:$0xff] }
  0xff   : > { %9317 = vst [vmem:[#allocation362_spill] sm:$0xff] %v5323_v9  ;;  %9318 = vst [vmem:[#allocation363_spill] sm:$0xff] %v5330_v63  ;;  %v5340_v52 = vld [vmem:[%s3335_s5 + $0xc90] sm:$0xff]  ;;  %v5343_v57 = vld [vmem:[%s3335_s5 + $0xc98] sm:$0xff] }
 0x100   : > { %9319 = vst [vmem:[#allocation364_spill] sm:$0xff] %v5333_v59  ;;  %9320 = vst [vmem:[#allocation365_spill] sm:$0xff] %v5340_v52  ;;  %v5350_v20 = vld [vmem:[%s3335_s5 + $0xca0] sm:$0xff]  ;;  %v5353_v61 = vld [vmem:[%s3335_s5 + $0xca8] sm:$0xff] }
 0x101   : > { %9321 = vst [vmem:[#allocation366_spill] sm:$0xff] %v5343_v57  ;;  %9322 = vst [vmem:[#allocation367_spill] sm:$0xff] %v5350_v20  ;;  %v5360_v60 = vld [vmem:[%s3335_s5 + $0xcb0] sm:$0xff]  ;;  %v5363_v10 = vld [vmem:[%s3335_s5 + $0xcb8] sm:$0xff] }
 0x102   : > { %9323 = vst [vmem:[#allocation368_spill] sm:$0xff] %v5353_v61  ;;  %9324 = vst [vmem:[#allocation369_spill] sm:$0xff] %v5360_v60  ;;  %v5370_v44 = vld [vmem:[%s3335_s5 + $0xcc0] sm:$0xff]  ;;  %v5373_v38 = vld [vmem:[%s3335_s5 + $0xcc8] sm:$0xff] }
 0x103   : > { %9325 = vst [vmem:[#allocation370_spill] sm:$0xff] %v5363_v10  ;;  %9326 = vst [vmem:[#allocation371_spill] sm:$0xff] %v5370_v44  ;;  %v5380_v56 = vld [vmem:[%s3335_s5 + $0xcd0] sm:$0xff]  ;;  %v5383_v63 = vld [vmem:[%s3335_s5 + $0xcd8] sm:$0xff] }
 0x104   : > { %9327 = vst [vmem:[#allocation372_spill] sm:$0xff] %v5373_v38  ;;  %9328 = vst [vmem:[#allocation373_spill] sm:$0xff] %v5380_v56  ;;  %v5390_v46 = vld [vmem:[%s3335_s5 + $0xce0] sm:$0xff]  ;;  %v5393_v52 = vld [vmem:[%s3335_s5 + $0xce8] sm:$0xff] }
 0x105   : > { %9329 = vst [vmem:[#allocation374_spill] sm:$0xff] %v5383_v63  ;;  %9330 = vst [vmem:[#allocation375_spill] sm:$0xff] %v5390_v46  ;;  %v5400_v58 = vld [vmem:[%s3335_s5 + $0xcf0] sm:$0xff]  ;;  %v5403_v20 = vld [vmem:[%s3335_s5 + $0xcf8] sm:$0xff] }
 0x106   : > { %9331 = vst [vmem:[#allocation376_spill] sm:$0xff] %v5393_v52  ;;  %9332 = vst [vmem:[#allocation377_spill] sm:$0xff] %v5400_v58  ;;  %v5410_v22 = vld [vmem:[%s3335_s5 + $0xd00] sm:$0xff]  ;;  %v5413_v60 = vld [vmem:[%s3335_s5 + $0xd08] sm:$0xff] }
 0x107   : > { %9333 = vst [vmem:[#allocation378_spill] sm:$0xff] %v5403_v20  ;;  %9334 = vst [vmem:[#allocation379_spill] sm:$0xff] %v5410_v22  ;;  %v5420_v41 = vld [vmem:[%s3335_s5 + $0xd10] sm:$0xff]  ;;  %v5423_v44 = vld [vmem:[%s3335_s5 + $0xd18] sm:$0xff] }
 0x108   : > { %9335 = vst [vmem:[#allocation380_spill] sm:$0xff] %v5413_v60  ;;  %9336 = vst [vmem:[#allocation381_spill] sm:$0xff] %v5420_v41  ;;  %v5430_v50 = vld [vmem:[%s3335_s5 + $0xd20] sm:$0xff]  ;;  %v5433_v56 = vld [vmem:[%s3335_s5 + $0xd28] sm:$0xff] }
 0x109   : > { %9337 = vst [vmem:[#allocation382_spill] sm:$0xff] %v5423_v44  ;;  %9338 = vst [vmem:[#allocation383_spill] sm:$0xff] %v5430_v50  ;;  %v5440_v9 = vld [vmem:[%s3335_s5 + $0xd30] sm:$0xff]  ;;  %v5443_v46 = vld [vmem:[%s3335_s5 + $0xd38] sm:$0xff] }
 0x10a   : > { %9339 = vst [vmem:[#allocation384_spill] sm:$0xff] %v5433_v56  ;;  %9340 = vst [vmem:[#allocation385_spill] sm:$0xff] %v5440_v9  ;;  %v5450_v59 = vld [vmem:[%s3335_s5 + $0xd40] sm:$0xff]  ;;  %v5453_v58 = vld [vmem:[%s3335_s5 + $0xd48] sm:$0xff] }
 0x10b   : > { %9341 = vst [vmem:[#allocation386_spill] sm:$0xff] %v5443_v46  ;;  %9342 = vst [vmem:[#allocation387_spill] sm:$0xff] %v5450_v59  ;;  %v5460_v57 = vld [vmem:[%s3335_s5 + $0xd50] sm:$0xff]  ;;  %v5463_v22 = vld [vmem:[%s3335_s5 + $0xd58] sm:$0xff] }
 0x10c   : > { %9343 = vst [vmem:[#allocation388_spill] sm:$0xff] %v5453_v58  ;;  %9344 = vst [vmem:[#allocation389_spill] sm:$0xff] %v5460_v57  ;;  %v5470_v61 = vld [vmem:[%s3335_s5 + $0xd60] sm:$0xff]  ;;  %v5473_v41 = vld [vmem:[%s3335_s5 + $0xd68] sm:$0xff] }
 0x10d   : > { %9345 = vst [vmem:[#allocation390_spill] sm:$0xff] %v5463_v22  ;;  %9346 = vst [vmem:[#allocation391_spill] sm:$0xff] %v5470_v61  ;;  %v5480_v10 = vld [vmem:[%s3335_s5 + $0xd70] sm:$0xff]  ;;  %v5483_v50 = vld [vmem:[%s3335_s5 + $0xd78] sm:$0xff] }
 0x10e   : > { %9347 = vst [vmem:[#allocation392_spill] sm:$0xff] %v5473_v41  ;;  %9348 = vst [vmem:[#allocation393_spill] sm:$0xff] %v5480_v10  ;;  %v5490_v38 = vld [vmem:[%s3335_s5 + $0xd80] sm:$0xff]  ;;  %v5493_v9 = vld [vmem:[%s3335_s5 + $0xd88] sm:$0xff] }
 0x10f   : > { %9349 = vst [vmem:[#allocation394_spill] sm:$0xff] %v5483_v50  ;;  %9350 = vst [vmem:[#allocation395_spill] sm:$0xff] %v5490_v38  ;;  %v5500_v63 = vld [vmem:[%s3335_s5 + $0xd90] sm:$0xff]  ;;  %v5503_v59 = vld [vmem:[%s3335_s5 + $0xd98] sm:$0xff] }
 0x110   : > { %9351 = vst [vmem:[#allocation396_spill] sm:$0xff] %v5493_v9  ;;  %9352 = vst [vmem:[#allocation397_spill] sm:$0xff] %v5500_v63  ;;  %v5510_v52 = vld [vmem:[%s3335_s5 + $0xda0] sm:$0xff]  ;;  %v5513_v57 = vld [vmem:[%s3335_s5 + $0xda8] sm:$0xff] }
 0x111   : > { %9353 = vst [vmem:[#allocation398_spill] sm:$0xff] %v5503_v59  ;;  %9354 = vst [vmem:[#allocation399_spill] sm:$0xff] %v5510_v52  ;;  %v5520_v20 = vld [vmem:[%s3335_s5 + $0xdb0] sm:$0xff]  ;;  %v5523_v61 = vld [vmem:[%s3335_s5 + $0xdb8] sm:$0xff] }
 0x112   : > { %9355 = vst [vmem:[#allocation400_spill] sm:$0xff] %v5513_v57  ;;  %9356 = vst [vmem:[#allocation401_spill] sm:$0xff] %v5520_v20  ;;  %v5530_v60 = vld [vmem:[%s3335_s5 + $0xdc0] sm:$0xff]  ;;  %v5533_v10 = vld [vmem:[%s3335_s5 + $0xdc8] sm:$0xff] }
 0x113   : > { %9357 = vst [vmem:[#allocation402_spill] sm:$0xff] %v5523_v61  ;;  %9358 = vst [vmem:[#allocation403_spill] sm:$0xff] %v5530_v60  ;;  %v5540_v44 = vld [vmem:[%s3335_s5 + $0xdd0] sm:$0xff]  ;;  %v5543_v38 = vld [vmem:[%s3335_s5 + $0xdd8] sm:$0xff] }
 0x114   : > { %9359 = vst [vmem:[#allocation404_spill] sm:$0xff] %v5533_v10  ;;  %9360 = vst [vmem:[#allocation405_spill] sm:$0xff] %v5540_v44  ;;  %v5550_v56 = vld [vmem:[%s3335_s5 + $0xde0] sm:$0xff]  ;;  %v5553_v63 = vld [vmem:[%s3335_s5 + $0xde8] sm:$0xff] }
 0x115   : > { %9361 = vst [vmem:[#allocation406_spill] sm:$0xff] %v5543_v38  ;;  %9362 = vst [vmem:[#allocation407_spill] sm:$0xff] %v5550_v56  ;;  %v5560_v46 = vld [vmem:[%s3335_s5 + $0xdf0] sm:$0xff]  ;;  %v5563_v52 = vld [vmem:[%s3335_s5 + $0xdf8] sm:$0xff] }
 0x116   : > { %9363 = vst [vmem:[#allocation408_spill] sm:$0xff] %v5553_v63  ;;  %9364 = vst [vmem:[#allocation409_spill] sm:$0xff] %v5560_v46  ;;  %v5570_v58 = vld [vmem:[%s3335_s5 + $0xe00] sm:$0xff]  ;;  %v5573_v20 = vld [vmem:[%s3335_s5 + $0xe08] sm:$0xff] }
 0x117   : > { %9365 = vst [vmem:[#allocation410_spill] sm:$0xff] %v5563_v52  ;;  %9366 = vst [vmem:[#allocation411_spill] sm:$0xff] %v5570_v58  ;;  %v5580_v22 = vld [vmem:[%s3335_s5 + $0xe10] sm:$0xff]  ;;  %v5583_v60 = vld [vmem:[%s3335_s5 + $0xe18] sm:$0xff] }
 0x118   : > { %9367 = vst [vmem:[#allocation412_spill] sm:$0xff] %v5573_v20  ;;  %9368 = vst [vmem:[#allocation413_spill] sm:$0xff] %v5580_v22  ;;  %v5590_v41 = vld [vmem:[%s3335_s5 + $0xe20] sm:$0xff]  ;;  %v5593_v44 = vld [vmem:[%s3335_s5 + $0xe28] sm:$0xff] }
 0x119   : > { %9369 = vst [vmem:[#allocation414_spill] sm:$0xff] %v5583_v60  ;;  %9370 = vst [vmem:[#allocation415_spill] sm:$0xff] %v5590_v41  ;;  %v5600_v50 = vld [vmem:[%s3335_s5 + $0xe30] sm:$0xff]  ;;  %v5603_v56 = vld [vmem:[%s3335_s5 + $0xe38] sm:$0xff] }
 0x11a   : > { %9371 = vst [vmem:[#allocation416_spill] sm:$0xff] %v5593_v44  ;;  %9372 = vst [vmem:[#allocation417_spill] sm:$0xff] %v5600_v50  ;;  %v5610_v9 = vld [vmem:[%s3335_s5 + $0xe40] sm:$0xff]  ;;  %v5613_v46 = vld [vmem:[%s3335_s5 + $0xe48] sm:$0xff] }
 0x11b   : > { %9373 = vst [vmem:[#allocation418_spill] sm:$0xff] %v5603_v56  ;;  %9374 = vst [vmem:[#allocation419_spill] sm:$0xff] %v5610_v9  ;;  %v5620_v59 = vld [vmem:[%s3335_s5 + $0xe50] sm:$0xff]  ;;  %v5623_v58 = vld [vmem:[%s3335_s5 + $0xe58] sm:$0xff] }
 0x11c   : > { %9375 = vst [vmem:[#allocation420_spill] sm:$0xff] %v5613_v46  ;;  %9376 = vst [vmem:[#allocation421_spill] sm:$0xff] %v5620_v59  ;;  %v5630_v57 = vld [vmem:[%s3335_s5 + $0xe60] sm:$0xff]  ;;  %v5633_v22 = vld [vmem:[%s3335_s5 + $0xe68] sm:$0xff] }
 0x11d   : > { %9377 = vst [vmem:[#allocation422_spill] sm:$0xff] %v5623_v58  ;;  %9378 = vst [vmem:[#allocation423_spill] sm:$0xff] %v5630_v57  ;;  %v5640_v61 = vld [vmem:[%s3335_s5 + $0xe70] sm:$0xff]  ;;  %v5643_v41 = vld [vmem:[%s3335_s5 + $0xe78] sm:$0xff] }
 0x11e   : > { %9379 = vst [vmem:[#allocation424_spill] sm:$0xff] %v5633_v22  ;;  %9380 = vst [vmem:[#allocation425_spill] sm:$0xff] %v5640_v61  ;;  %v5650_v10 = vld [vmem:[%s3335_s5 + $0xe80] sm:$0xff]  ;;  %v5653_v50 = vld [vmem:[%s3335_s5 + $0xe88] sm:$0xff] }
 0x11f   : > { %9381 = vst [vmem:[#allocation426_spill] sm:$0xff] %v5643_v41  ;;  %9382 = vst [vmem:[#allocation427_spill] sm:$0xff] %v5650_v10  ;;  %v5660_v38 = vld [vmem:[%s3335_s5 + $0xe90] sm:$0xff]  ;;  %v5663_v9 = vld [vmem:[%s3335_s5 + $0xe98] sm:$0xff] }
 0x120   : > { %9383 = vst [vmem:[#allocation428_spill] sm:$0xff] %v5653_v50  ;;  %9384 = vst [vmem:[#allocation429_spill] sm:$0xff] %v5660_v38  ;;  %v5670_v63 = vld [vmem:[%s3335_s5 + $0xea0] sm:$0xff]  ;;  %v5673_v59 = vld [vmem:[%s3335_s5 + $0xea8] sm:$0xff] }
 0x121   : > { %9385 = vst [vmem:[#allocation430_spill] sm:$0xff] %v5663_v9  ;;  %9386 = vst [vmem:[#allocation431_spill] sm:$0xff] %v5670_v63  ;;  %v5680_v52 = vld [vmem:[%s3335_s5 + $0xeb0] sm:$0xff]  ;;  %v5683_v57 = vld [vmem:[%s3335_s5 + $0xeb8] sm:$0xff] }
 0x122   : > { %9387 = vst [vmem:[#allocation432_spill] sm:$0xff] %v5673_v59  ;;  %9388 = vst [vmem:[#allocation433_spill] sm:$0xff] %v5680_v52  ;;  %v5690_v20 = vld [vmem:[%s3335_s5 + $0xec0] sm:$0xff]  ;;  %v5693_v61 = vld [vmem:[%s3335_s5 + $0xec8] sm:$0xff] }
 0x123   : > { %9389 = vst [vmem:[#allocation434_spill] sm:$0xff] %v5683_v57  ;;  %9390 = vst [vmem:[#allocation435_spill] sm:$0xff] %v5690_v20  ;;  %v5700_v60 = vld [vmem:[%s3335_s5 + $0xed0] sm:$0xff]  ;;  %v5703_v10 = vld [vmem:[%s3335_s5 + $0xed8] sm:$0xff] }
 0x124   : > { %9391 = vst [vmem:[#allocation436_spill] sm:$0xff] %v5693_v61  ;;  %9392 = vst [vmem:[#allocation437_spill] sm:$0xff] %v5700_v60  ;;  %v5710_v44 = vld [vmem:[%s3335_s5 + $0xee0] sm:$0xff]  ;;  %v5713_v38 = vld [vmem:[%s3335_s5 + $0xee8] sm:$0xff] }
 0x125   : > { %9393 = vst [vmem:[#allocation438_spill] sm:$0xff] %v5703_v10  ;;  %9394 = vst [vmem:[#allocation439_spill] sm:$0xff] %v5710_v44  ;;  %v5720_v56 = vld [vmem:[%s3335_s5 + $0xef0] sm:$0xff]  ;;  %v5723_v63 = vld [vmem:[%s3335_s5 + $0xef8] sm:$0xff] }
 0x126   : > { %9395 = vst [vmem:[#allocation440_spill] sm:$0xff] %v5713_v38  ;;  %9396 = vst [vmem:[#allocation441_spill] sm:$0xff] %v5720_v56  ;;  %v5730_v46 = vld [vmem:[%s3335_s5 + $0xf00] sm:$0xff]  ;;  %v5733_v52 = vld [vmem:[%s3335_s5 + $0xf08] sm:$0xff] }
 0x127   : > { %9397 = vst [vmem:[#allocation442_spill] sm:$0xff] %v5723_v63  ;;  %9398 = vst [vmem:[#allocation443_spill] sm:$0xff] %v5730_v46  ;;  %v5740_v58 = vld [vmem:[%s3335_s5 + $0xf10] sm:$0xff]  ;;  %v5743_v20 = vld [vmem:[%s3335_s5 + $0xf18] sm:$0xff] }
 0x128   : > { %9399 = vst [vmem:[#allocation444_spill] sm:$0xff] %v5733_v52  ;;  %9400 = vst [vmem:[#allocation445_spill] sm:$0xff] %v5740_v58  ;;  %v5750_v22 = vld [vmem:[%s3335_s5 + $0xf20] sm:$0xff]  ;;  %v5753_v60 = vld [vmem:[%s3335_s5 + $0xf28] sm:$0xff] }
 0x129   : > { %9401 = vst [vmem:[#allocation446_spill] sm:$0xff] %v5743_v20  ;;  %9402 = vst [vmem:[#allocation447_spill] sm:$0xff] %v5750_v22  ;;  %v5760_v41 = vld [vmem:[%s3335_s5 + $0xf30] sm:$0xff]  ;;  %v5763_v44 = vld [vmem:[%s3335_s5 + $0xf38] sm:$0xff] }
 0x12a   : > { %9403 = vst [vmem:[#allocation448_spill] sm:$0xff] %v5753_v60  ;;  %9404 = vst [vmem:[#allocation449_spill] sm:$0xff] %v5760_v41  ;;  %v5770_v50 = vld [vmem:[%s3335_s5 + $0xf40] sm:$0xff]  ;;  %v5773_v56 = vld [vmem:[%s3335_s5 + $0xf48] sm:$0xff] }
 0x12b   : > { %9405 = vst [vmem:[#allocation450_spill] sm:$0xff] %v5763_v44  ;;  %9406 = vst [vmem:[#allocation451_spill] sm:$0xff] %v5770_v50  ;;  %v5780_v9 = vld [vmem:[%s3335_s5 + $0xf50] sm:$0xff]  ;;  %v5783_v46 = vld [vmem:[%s3335_s5 + $0xf58] sm:$0xff]  ;;  %v9431_v44 = vunpack.c.l.bf16 %v3360_v6 }
 0x12c   : > { %9407 = vst [vmem:[#allocation452_spill] sm:$0xff] %v5773_v56  ;;  %9408 = vst [vmem:[#allocation453_spill] sm:$0xff] %v5780_v9  ;;  %v5790_v59 = vld [vmem:[%s3335_s5 + $0xf60] sm:$0xff]  ;;  %v5793_v58 = vld [vmem:[%s3335_s5 + $0xf68] sm:$0xff]  ;;  %v9433_v56 = vunpack.c.h.bf16 %v3360_v6  ;;  %v9441_v6 = vunpack.c.h.bf16 %v4293_v45 }
 0x12d   : > { %9409 = vst [vmem:[#allocation454_spill] sm:$0xff] %v5783_v46  ;;  %9410 = vst [vmem:[#allocation455_spill] sm:$0xff] %v5790_v59  ;;  %v5800_v57 = vld [vmem:[%s3335_s5 + $0xf70] sm:$0xff]  ;;  %v5803_v22 = vld [vmem:[%s3335_s5 + $0xf78] sm:$0xff]  ;;  %v9430_v46 = vunpack.c.l.bf16 %v3357_v5 }
 0x12e   : > { %9411 = vst [vmem:[#allocation456_spill] sm:$0xff] %v5793_v58  ;;  %9412 = vst [vmem:[#allocation457_spill] sm:$0xff] %v5800_v57  ;;  %v5810_v61 = vld [vmem:[%s3335_s5 + $0xf80] sm:$0xff]  ;;  %v5813_v41 = vld [vmem:[%s3335_s5 + $0xf88] sm:$0xff] }
 0x12f   : > { %9413 = vst [vmem:[#allocation458_spill] sm:$0xff] %v5803_v22  ;;  %9414 = vst [vmem:[#allocation459_spill] sm:$0xff] %v5810_v61  ;;  %v5820_v10 = vld [vmem:[%s3335_s5 + $0xf90] sm:$0xff]  ;;  %v5823_v50 = vld [vmem:[%s3335_s5 + $0xf98] sm:$0xff] }
 0x130   : > { %9415 = vst [vmem:[#allocation460_spill] sm:$0xff] %v5813_v41  ;;  %9416 = vst [vmem:[#allocation461_spill] sm:$0xff] %v5820_v10  ;;  %v5830_v38 = vld [vmem:[%s3335_s5 + $0xfa0] sm:$0xff]  ;;  %v5833_v9 = vld [vmem:[%s3335_s5 + $0xfa8] sm:$0xff]  ;;  %v9427_v10 = vunpack.c.l.bf16 %v3345_v1 }
 0x131   : > { %9417 = vst [vmem:[#allocation462_spill] sm:$0xff] %v5823_v50  ;;  %9418 = vst [vmem:[#allocation463_spill] sm:$0xff] %v5833_v9  ;;  %v5840_v63 = vld [vmem:[%s3335_s5 + $0xfb0] sm:$0xff]  ;;  %v5843_v59 = vld [vmem:[%s3335_s5 + $0xfb8] sm:$0xff]  ;;  %v9426_v50 = vunpack.c.l.bf16 %v3342_v0  ;;  %v9432_v9 = vunpack.c.h.bf16 %v3357_v5  ;;  %v9440_v5 = vunpack.c.h.bf16 %v4290_v14 }
 0x132   : > { %9419 = vst [vmem:[#allocation464_spill] sm:$0xff] %v5840_v63  ;;  %9420 = vst [vmem:[#allocation465_spill] sm:$0xff] %v5843_v59  ;;  %v5850_v52 = vld [vmem:[%s3335_s5 + $0xfc0] sm:$0xff]  ;;  %v5853_v57 = vld [vmem:[%s3335_s5 + $0xfc8] sm:$0xff]  ;;  %v9428_v59 = vunpack.c.h.bf16 %v3342_v0  ;;  %v9429_v63 = vunpack.c.h.bf16 %v3345_v1  ;;  %v9436_v0 = vunpack.c.h.bf16 %v3970_v15  ;;  %v9437_v1 = vunpack.c.h.bf16 %v3973_v51 }
 0x133   : > { %v5860_v20 = vld [vmem:[%s3335_s5 + $0xfd0] sm:$0xff]  ;;  %v5863_v61 = vld [vmem:[%s3335_s5 + $0xfd8] sm:$0xff]  ;;  %v5870_v32 = vld [vmem:[%s3335_s5 + $0xfe0] sm:$0xff]  ;;  %v1900_v22 = vadd.f32 %v9433_v56, %v9432_v9  ;;  %v2176_v9 = vadd.f32 %v9441_v6, %v9440_v5 }
 0x134   : > { %9421 = vst [vmem:[#allocation466_spill] sm:$0xff] %v5863_v61  ;;  %9422 = vst [vmem:[#allocation467_spill] sm:$0xff] %v5870_v32  ;;  %v5873_v60 = vld [vmem:[%s3335_s5 + $0xfe8] sm:$0xff]  ;;  %v5880_v55 = vld [vmem:[%s3335_s5 + $0xff0] sm:$0xff]  ;;  %v1693_v61 = vadd.f32 %v9427_v10, %v9426_v50  ;;  %v1762_v41 = vadd.f32 %v9429_v63, %v9428_v59  ;;  %v2038_v50 = vadd.f32 %v9437_v1, %v9436_v0  ;;  %v9438_v59 = vunpack.c.l.bf16 %v4290_v14 }
 0x135   : > { %9423 = vst [vmem:[#allocation468_spill] sm:$0xff] %v5873_v60  ;;  %9424 = vst [vmem:[#allocation469_spill] sm:$0xff] %v5880_v55  ;;  %v5883_v58 = vld [vmem:[%s3335_s5 + $0xff8] sm:$0xff]  ;;  %v1831_v60 = vadd.f32 %v9431_v44, %v9430_v46  ;;  %v9435_v55 = vunpack.c.l.bf16 %v3973_v51  ;;  %v9439_v63 = vunpack.c.l.bf16 %v4293_v45  ;;  %v9442_v46 = vunpack.c.l.bf16 %v3348_v2 }
 0x136   : > { %9425 = vst [vmem:[#allocation470_spill] sm:$0xff] %v5883_v58  ;;  %v9434_v58 = vunpack.c.l.bf16 %v3970_v15  ;;  %v9444_v15 = vunpack.c.l.bf16 %v3363_v7  ;;  %v9445_v0 = vunpack.c.h.bf16 %v3363_v7  ;;  %v9446_v32 = vunpack.c.l.bf16 %v3980_v27 }
 0x137   : > { %v2107_v44 = vadd.f32 %v9439_v63, %v9438_v59  ;;  %v1694_v56 = vadd.f32 %v1693_v61, %v9442_v46  ;;  %v9447_v14 = vunpack.c.h.bf16 %v3980_v27  ;;  %v9448_v45 = vunpack.c.l.bf16 %v4300_v33 }
 0x138   : > { %v1969_v10 = vadd.f32 %v9435_v55, %v9434_v58  ;;  %v9443_v55 = vunpack.c.h.bf16 %v3348_v2  ;;  %v1832_v51 = vadd.f32 %v1831_v60, %v9444_v15  ;;  %v1901_v1 = vadd.f32 %v1900_v22, %v9445_v0 }
 0x139   : > { %v2039_v63 = vadd.f32 %v2038_v50, %v9447_v14  ;;  %v2108_v5 = vadd.f32 %v2107_v44, %v9448_v45  ;;  %v9449_v61 = vunpack.c.h.bf16 %v4300_v33  ;;  %v9450_v2 = vunpack.c.l.bf16 %v3351_v3 }
 0x13a   : > { %v1763_v58 = vadd.f32 %v1762_v41, %v9443_v55  ;;  %v1970_v59 = vadd.f32 %v1969_v10, %v9446_v32  ;;  %v9451_v60 = vunpack.c.h.bf16 %v3351_v3  ;;  %v9452_v7 = vunpack.c.l.bf16 %v3373_v13 }
 0x13b   : > { %v2177_v6 = vadd.f32 %v2176_v9, %v9449_v61  ;;  %v1695_v41 = vadd.f32 %v1694_v56, %v9450_v2  ;;  %v9453_v32 = vunpack.c.h.bf16 %v3373_v13  ;;  %v9454_v27 = vunpack.c.l.bf16 %v3983_v53 }
 0x13c   : > { %v1764_v46 = vadd.f32 %v1763_v58, %v9451_v60  ;;  %v1833_v22 = vadd.f32 %v1832_v51, %v9452_v7  ;;  %v9455_v44 = vunpack.c.h.bf16 %v3983_v53  ;;  %v9456_v33 = vunpack.c.l.bf16 %v4303_v47 }
 0x13d   : > { %v1902_v10 = vadd.f32 %v1901_v1, %v9453_v32  ;;  %v1971_v50 = vadd.f32 %v1970_v59, %v9454_v27  ;;  %v9457_v56 = vunpack.c.h.bf16 %v4303_v47  ;;  %v9458_v3 = vunpack.c.l.bf16 %v3354_v4 }
 0x13e   : > { %v2040_v55 = vadd.f32 %v2039_v63, %v9455_v44  ;;  %v2109_v9 = vadd.f32 %v2108_v5, %v9456_v33  ;;  %v9459_v51 = vunpack.c.h.bf16 %v3354_v4  ;;  %v9460_v13 = vunpack.c.l.bf16 %v3380_v18 }
 0x13f   : > { %v2178_v15 = vadd.f32 %v2177_v6, %v9457_v56  ;;  %v1696_v58 = vadd.f32 %v1695_v41, %v9458_v3  ;;  %v9461_v59 = vunpack.c.h.bf16 %v3380_v18  ;;  %v9462_v53 = vunpack.c.l.bf16 %v3990_v26 }
 0x140   : > { %v1765_v0 = vadd.f32 %v1764_v46, %v9459_v51  ;;  %v1834_v1 = vadd.f32 %v1833_v22, %v9460_v13  ;;  %v9463_v45 = vunpack.c.h.bf16 %v3990_v26  ;;  %v9464_v47 = vunpack.c.l.bf16 %v4310_v28 }
 0x141   : > { %v1903_v14 = vadd.f32 %v1902_v10, %v9461_v59  ;;  %v1972_v63 = vadd.f32 %v1971_v50, %v9462_v53  ;;  %v9465_v6 = vunpack.c.h.bf16 %v4310_v28  ;;  %v9466_v4 = vunpack.c.l.bf16 %v3370_v12 }
 0x142   : > { %v2041_v5 = vadd.f32 %v2040_v55, %v9463_v45  ;;  %v2110_v61 = vadd.f32 %v2109_v9, %v9464_v47  ;;  %v9467_v60 = vunpack.c.h.bf16 %v3370_v12  ;;  %v9468_v18 = vunpack.c.l.bf16 %v3383_v19 }
 0x143   : > { %v2179_v2 = vadd.f32 %v2178_v15, %v9465_v6  ;;  %v1697_v41 = vadd.f32 %v1696_v58, %v9466_v4  ;;  %v9469_v22 = vunpack.c.h.bf16 %v3383_v19  ;;  %v9470_v26 = vunpack.c.l.bf16 %v3993_v35 }
 0x144   : > { %v1766_v46 = vadd.f32 %v1765_v0, %v9467_v60  ;;  %v1835_v7 = vadd.f32 %v1834_v1, %v9468_v18  ;;  %v9471_v27 = vunpack.c.h.bf16 %v3993_v35  ;;  %v9472_v28 = vunpack.c.l.bf16 %v4313_v21 }
 0x145   : > { %v1904_v32 = vadd.f32 %v1903_v14, %v9469_v22  ;;  %v1973_v10 = vadd.f32 %v1972_v63, %v9470_v26  ;;  %v9473_v55 = vunpack.c.h.bf16 %v4313_v21  ;;  %v9474_v12 = vunpack.c.l.bf16 %v3390_v24 }
 0x146   : > { %v2042_v50 = vadd.f32 %v2041_v5, %v9471_v27  ;;  %v2111_v44 = vadd.f32 %v2110_v61, %v9472_v28  ;;  %v9475_v56 = vunpack.c.h.bf16 %v3390_v24  ;;  %v9476_v19 = vunpack.c.l.bf16 %v3393_v25 }
 0x147   : > { %v2180_v33 = vadd.f32 %v2179_v2, %v9473_v55  ;;  %v1698_v9 = vadd.f32 %v1697_v41, %v9474_v12  ;;  %v9477_v58 = vunpack.c.h.bf16 %v3393_v25  ;;  %v9478_v35 = vunpack.c.l.bf16 %v4000_v11 }
 0x148   : > { %v1767_v15 = vadd.f32 %v1766_v46, %v9475_v56  ;;  %v1836_v3 = vadd.f32 %v1835_v7, %v9476_v19  ;;  %v9479_v13 = vunpack.c.h.bf16 %v4000_v11  ;;  %v9480_v21 = vunpack.c.l.bf16 %v4320_v8 }
 0x149   : > { %v1905_v51 = vadd.f32 %v1904_v32, %v9477_v58  ;;  %v1974_v0 = vadd.f32 %v1973_v10, %v9478_v35  ;;  %v9481_v14 = vunpack.c.h.bf16 %v4320_v8  ;;  %v9482_v24 = vunpack.c.l.bf16 %v3400_v30 }
 0x14a   : > { %v2043_v1 = vadd.f32 %v2042_v50, %v9479_v13  ;;  %v2112_v59 = vadd.f32 %v2111_v44, %v9480_v21  ;;  %v9483_v45 = vunpack.c.h.bf16 %v3400_v30  ;;  %v9484_v25 = vunpack.c.l.bf16 %v3403_v31 }
 0x14b   : > { %v2181_v53 = vadd.f32 %v2180_v33, %v9481_v14  ;;  %v1699_v63 = vadd.f32 %v1698_v9, %v9482_v24  ;;  %v9485_v61 = vunpack.c.h.bf16 %v3403_v31  ;;  %v9486_v11 = vunpack.c.l.bf16 %v4003_v17 }
 0x14c   : > { %v1768_v5 = vadd.f32 %v1767_v15, %v9483_v45  ;;  %v1837_v47 = vadd.f32 %v1836_v3, %v9484_v25  ;;  %v9487_v4 = vunpack.c.h.bf16 %v4003_v17  ;;  %v9488_v8 = vunpack.c.l.bf16 %v4323_v23 }
 0x14d   : > { %v1906_v6 = vadd.f32 %v1905_v51, %v9485_v61  ;;  %v1975_v2 = vadd.f32 %v1974_v0, %v9486_v11  ;;  %v9489_v46 = vunpack.c.h.bf16 %v4323_v23  ;;  %v9490_v30 = vunpack.c.l.bf16 %v3410_v36 }
 0x14e   : > { %v2044_v41 = vadd.f32 %v2043_v1, %v9487_v4  ;;  %v2113_v60 = vadd.f32 %v2112_v59, %v9488_v8  ;;  %v9491_v22 = vunpack.c.h.bf16 %v3410_v36  ;;  %v9492_v31 = vunpack.c.l.bf16 %v3413_v37 }
 0x14f   : > { %v2182_v18 = vadd.f32 %v2181_v53, %v9489_v46  ;;  %v1700_v7 = vadd.f32 %v1699_v63, %v9490_v30  ;;  %v9493_v10 = vunpack.c.h.bf16 %v3413_v37  ;;  %v9494_v17 = vunpack.c.l.bf16 %v4010_v16 }
 0x150   : > { %v1769_v32 = vadd.f32 %v1768_v5, %v9491_v22  ;;  %v1838_v26 = vadd.f32 %v1837_v47, %v9492_v31  ;;  %v9495_v28 = vunpack.c.h.bf16 %v4010_v16  ;;  %v9496_v23 = vunpack.c.l.bf16 %v4330_v40 }
 0x151   : > { %v1907_v27 = vadd.f32 %v1906_v6, %v9493_v10  ;;  %v1976_v50 = vadd.f32 %v1975_v2, %v9494_v17  ;;  %v9497_v33 = vunpack.c.h.bf16 %v4330_v40  ;;  %v9498_v36 = vunpack.c.l.bf16 %v3420_v42 }
 0x152   : > { %v2045_v44 = vadd.f32 %v2044_v41, %v9495_v28  ;;  %v2114_v55 = vadd.f32 %v2113_v60, %v9496_v23  ;;  %v9499_v56 = vunpack.c.h.bf16 %v3420_v42  ;;  %v9500_v37 = vunpack.c.l.bf16 %v3423_v43  ;;  %v9528_v23 = vld [vmem:[#allocation10_spill] sm:$0xff] }
 0x153   : > { %v2183_v12 = vadd.f32 %v2182_v18, %v9497_v33  ;;  %v1701_v9 = vadd.f32 %v1700_v7, %v9498_v36  ;;  %v9501_v3 = vunpack.c.h.bf16 %v3423_v43  ;;  %v9502_v16 = vunpack.c.l.bf16 %v4013_v29 }
 0x154   : > { %v1770_v15 = vadd.f32 %v1769_v32, %v9499_v56  ;;  %v1839_v19 = vadd.f32 %v1838_v26, %v9500_v37  ;;  %v9503_v35 = vunpack.c.h.bf16 %v4013_v29  ;;  %v9504_v40 = vunpack.c.l.bf16 %v4333_v39 }
 0x155   : > { %v1908_v58 = vadd.f32 %v1907_v27, %v9501_v3  ;;  %v1977_v51 = vadd.f32 %v1976_v50, %v9502_v16  ;;  %v9505_v1 = vunpack.c.h.bf16 %v4333_v39  ;;  %v9506_v42 = vunpack.c.l.bf16 %v3430_v48  ;;  %v9534_v3 = vld [vmem:[#allocation167_spill] sm:$0xff] }
 0x156   : > { %v2046_v0 = vadd.f32 %v2045_v44, %v9503_v35  ;;  %v2115_v13 = vadd.f32 %v2114_v55, %v9504_v40  ;;  %v9507_v14 = vunpack.c.h.bf16 %v3430_v48  ;;  %v9508_v43 = vunpack.c.l.bf16 %v3433_v49 }
 0x157   : > { %v2184_v21 = vadd.f32 %v2183_v12, %v9505_v1  ;;  %v1702_v59 = vadd.f32 %v1701_v9, %v9506_v42  ;;  %v9509_v63 = vunpack.c.h.bf16 %v3433_v49  ;;  %v9510_v29 = vunpack.c.l.bf16 %v4020_v34  ;;  %v9516_v49 = vld [vmem:[#allocation8_spill] sm:$0xff]  ;;  %v9531_v9 = vld [vmem:[#allocation114_spill] sm:$0xff] }
 0x158   : > { %v1771_v53 = vadd.f32 %v1770_v15, %v9507_v14  ;;  %v1840_v24 = vadd.f32 %v1839_v19, %v9508_v43  ;;  %v9511_v25 = vunpack.c.h.bf16 %v4020_v34  ;;  %v9512_v39 = vunpack.c.l.bf16 %v4340_v62  ;;  %v9519_v34 = vld [vmem:[#allocation113_spill] sm:$0xff]  ;;  %v9540_v42 = vld [vmem:[#allocation12_spill] sm:$0xff] }
 0x159   : > { %v1909_v45 = vadd.f32 %v1908_v58, %v9509_v63  ;;  %v1978_v5 = vadd.f32 %v1977_v51, %v9510_v29  ;;  %v9513_v6 = vunpack.c.h.bf16 %v4340_v62  ;;  %v9514_v48 = vunpack.c.l.bf16 %v3440_v54  ;;  %v9522_v62 = vld [vmem:[#allocation166_spill] sm:$0xff] }
 0x15a   : > { %v2047_v47 = vadd.f32 %v2046_v0, %v9511_v25  ;;  %v2116_v61 = vadd.f32 %v2115_v13, %v9512_v39  ;;  %v9515_v4 = vunpack.c.h.bf16 %v3440_v54  ;;  %v9517_v8 = vunpack.c.l.bf16 %v9516_v49  ;;  %v9525_v54 = vld [vmem:[#allocation9_spill] sm:$0xff]  ;;  %v9537_v0 = vld [vmem:[#allocation11_spill] sm:$0xff]  ;;  %v9546_v25 = vld [vmem:[#allocation168_spill] sm:$0xff] }
 0x15b   : > { %v2185_v11 = vadd.f32 %v2184_v21, %v9513_v6  ;;  %v1703_v2 = vadd.f32 %v1702_v59, %v9514_v48  ;;  %v9518_v46 = vunpack.c.h.bf16 %v9516_v49  ;;  %v9520_v30 = vunpack.c.l.bf16 %v9519_v34  ;;  %v9552_v49 = vld [vmem:[#allocation63_spill] sm:$0xff] }
 0x15c   : > { %v1772_v41 = vadd.f32 %v1771_v53, %v9515_v4  ;;  %v1841_v60 = vadd.f32 %v1840_v24, %v9517_v8  ;;  %v9521_v22 = vunpack.c.h.bf16 %v9519_v34  ;;  %v9523_v31 = vunpack.c.l.bf16 %v9522_v62  ;;  %v9543_v24 = vld [vmem:[#allocation115_spill] sm:$0xff]  ;;  %v9555_v34 = vld [vmem:[#allocation116_spill] sm:$0xff] }
 0x15d   : > { %v1910_v18 = vadd.f32 %v1909_v45, %v9518_v46  ;;  %v1979_v7 = vadd.f32 %v1978_v5, %v9520_v30  ;;  %v9524_v10 = vunpack.c.h.bf16 %v9522_v62  ;;  %v9526_v17 = vunpack.c.l.bf16 %v9525_v54  ;;  %v9558_v62 = vld [vmem:[#allocation169_spill] sm:$0xff] }
 0x15e   : > { %v2048_v32 = vadd.f32 %v2047_v47, %v9521_v22  ;;  %v2117_v26 = vadd.f32 %v2116_v61, %v9523_v31  ;;  %v9527_v28 = vunpack.c.h.bf16 %v9525_v54  ;;  %v9529_v55 = vunpack.c.l.bf16 %v9528_v23  ;;  %v9561_v54 = vld [vmem:[#allocation14_spill] sm:$0xff] }
 0x15f   : > { %v2186_v27 = vadd.f32 %v2185_v11, %v9524_v10  ;;  %v1704_v50 = vadd.f32 %v1703_v2, %v9526_v17  ;;  %v9530_v12 = vunpack.c.h.bf16 %v9528_v23  ;;  %v9532_v56 = vunpack.c.l.bf16 %v9531_v9  ;;  %v9549_v11 = vld [vmem:[#allocation13_spill] sm:$0xff]  ;;  %v9564_v23 = vld [vmem:[#allocation64_spill] sm:$0xff] }
 0x160   : > { %v1773_v44 = vadd.f32 %v1772_v41, %v9527_v28  ;;  %v1842_v33 = vadd.f32 %v1841_v60, %v9529_v55  ;;  %v9533_v37 = vunpack.c.h.bf16 %v9531_v9  ;;  %v9535_v58 = vunpack.c.l.bf16 %v9534_v3  ;;  %v9567_v9 = vld [vmem:[#allocation117_spill] sm:$0xff] }
 0x161   : > { %v1911_v36 = vadd.f32 %v1910_v18, %v9530_v12  ;;  %v1980_v15 = vadd.f32 %v1979_v7, %v9532_v56  ;;  %v9536_v51 = vunpack.c.h.bf16 %v9534_v3  ;;  %v9538_v40 = vunpack.c.l.bf16 %v9537_v0  ;;  %v9570_v3 = vld [vmem:[#allocation170_spill] sm:$0xff] }
 0x162   : > { %v2049_v19 = vadd.f32 %v2048_v32, %v9533_v37  ;;  %v2118_v16 = vadd.f32 %v2117_v26, %v9535_v58  ;;  %v9539_v1 = vunpack.c.h.bf16 %v9537_v0  ;;  %v9541_v59 = vunpack.c.l.bf16 %v9540_v42  ;;  %v9573_v0 = vld [vmem:[#allocation15_spill] sm:$0xff] }
 0x163   : > { %v2187_v35 = vadd.f32 %v2186_v27, %v9536_v51  ;;  %v1705_v13 = vadd.f32 %v1704_v50, %v9538_v40  ;;  %v9542_v53 = vunpack.c.h.bf16 %v9540_v42  ;;  %v9544_v63 = vunpack.c.l.bf16 %v9543_v24  ;;  %v9576_v42 = vld [vmem:[#allocation65_spill] sm:$0xff] }
 0x164   : > { %v1774_v21 = vadd.f32 %v1773_v44, %v9539_v1  ;;  %v1843_v14 = vadd.f32 %v1842_v33, %v9541_v59  ;;  %v9545_v29 = vunpack.c.h.bf16 %v9543_v24  ;;  %v9547_v47 = vunpack.c.l.bf16 %v9546_v25  ;;  %v9579_v24 = vld [vmem:[#allocation118_spill] sm:$0xff] }
 0x165   : > { %v1912_v43 = vadd.f32 %v1911_v36, %v9542_v53  ;;  %v1981_v45 = vadd.f32 %v1980_v15, %v9544_v63  ;;  %v9548_v61 = vunpack.c.h.bf16 %v9546_v25  ;;  %v9550_v48 = vunpack.c.l.bf16 %v9549_v11  ;;  %v9582_v25 = vld [vmem:[#allocation171_spill] sm:$0xff] }
 0x166   : > { %v2050_v5 = vadd.f32 %v2049_v19, %v9545_v29  ;;  %v2119_v39 = vadd.f32 %v2118_v16, %v9547_v47  ;;  %v9551_v4 = vunpack.c.h.bf16 %v9549_v11  ;;  %v9553_v8 = vunpack.c.l.bf16 %v9552_v49  ;;  %v9585_v11 = vld [vmem:[#allocation16_spill] sm:$0xff] }
 0x167   : > { %v2188_v6 = vadd.f32 %v2187_v35, %v9548_v61  ;;  %v1706_v2 = vadd.f32 %v1705_v13, %v9550_v48  ;;  %v9554_v46 = vunpack.c.h.bf16 %v9552_v49  ;;  %v9556_v30 = vunpack.c.l.bf16 %v9555_v34  ;;  %v9588_v49 = vld [vmem:[#allocation66_spill] sm:$0xff] }
 0x168   : > { %v1775_v41 = vadd.f32 %v1774_v21, %v9551_v4  ;;  %v1844_v60 = vadd.f32 %v1843_v14, %v9553_v8  ;;  %v9557_v22 = vunpack.c.h.bf16 %v9555_v34  ;;  %v9559_v31 = vunpack.c.l.bf16 %v9558_v62  ;;  %v9591_v34 = vld [vmem:[#allocation119_spill] sm:$0xff] }
 0x169   : > { %v1913_v18 = vadd.f32 %v1912_v43, %v9554_v46  ;;  %v1982_v7 = vadd.f32 %v1981_v45, %v9556_v30  ;;  %v9560_v10 = vunpack.c.h.bf16 %v9558_v62  ;;  %v9562_v17 = vunpack.c.l.bf16 %v9561_v54  ;;  %v9594_v62 = vld [vmem:[#allocation172_spill] sm:$0xff] }
 0x16a   : > { %v2051_v32 = vadd.f32 %v2050_v5, %v9557_v22  ;;  %v2120_v26 = vadd.f32 %v2119_v39, %v9559_v31  ;;  %v9563_v28 = vunpack.c.h.bf16 %v9561_v54  ;;  %v9565_v55 = vunpack.c.l.bf16 %v9564_v23  ;;  %v9597_v54 = vld [vmem:[#allocation17_spill] sm:$0xff] }
 0x16b   : > { %v2189_v27 = vadd.f32 %v2188_v6, %v9560_v10  ;;  %v1707_v50 = vadd.f32 %v1706_v2, %v9562_v17  ;;  %v9566_v12 = vunpack.c.h.bf16 %v9564_v23  ;;  %v9568_v56 = vunpack.c.l.bf16 %v9567_v9  ;;  %v9600_v23 = vld [vmem:[#allocation67_spill] sm:$0xff] }
 0x16c   : > { %v1776_v44 = vadd.f32 %v1775_v41, %v9563_v28  ;;  %v1845_v33 = vadd.f32 %v1844_v60, %v9565_v55  ;;  %v9569_v37 = vunpack.c.h.bf16 %v9567_v9  ;;  %v9571_v58 = vunpack.c.l.bf16 %v9570_v3  ;;  %v9603_v9 = vld [vmem:[#allocation120_spill] sm:$0xff] }
 0x16d   : > { %v1914_v36 = vadd.f32 %v1913_v18, %v9566_v12  ;;  %v1983_v15 = vadd.f32 %v1982_v7, %v9568_v56  ;;  %v9572_v51 = vunpack.c.h.bf16 %v9570_v3  ;;  %v9574_v40 = vunpack.c.l.bf16 %v9573_v0  ;;  %v9606_v3 = vld [vmem:[#allocation173_spill] sm:$0xff] }
 0x16e   : > { %v2052_v19 = vadd.f32 %v2051_v32, %v9569_v37  ;;  %v2121_v16 = vadd.f32 %v2120_v26, %v9571_v58  ;;  %v9575_v1 = vunpack.c.h.bf16 %v9573_v0  ;;  %v9577_v59 = vunpack.c.l.bf16 %v9576_v42  ;;  %v9609_v0 = vld [vmem:[#allocation18_spill] sm:$0xff] }
 0x16f   : > { %v2190_v35 = vadd.f32 %v2189_v27, %v9572_v51  ;;  %v1708_v13 = vadd.f32 %v1707_v50, %v9574_v40  ;;  %v9578_v53 = vunpack.c.h.bf16 %v9576_v42  ;;  %v9580_v63 = vunpack.c.l.bf16 %v9579_v24  ;;  %v9612_v42 = vld [vmem:[#allocation68_spill] sm:$0xff] }
 0x170   : > { %v1777_v21 = vadd.f32 %v1776_v44, %v9575_v1  ;;  %v1846_v14 = vadd.f32 %v1845_v33, %v9577_v59  ;;  %v9581_v29 = vunpack.c.h.bf16 %v9579_v24  ;;  %v9583_v47 = vunpack.c.l.bf16 %v9582_v25  ;;  %v9615_v24 = vld [vmem:[#allocation121_spill] sm:$0xff] }
 0x171   : > { %v1915_v43 = vadd.f32 %v1914_v36, %v9578_v53  ;;  %v1984_v45 = vadd.f32 %v1983_v15, %v9580_v63  ;;  %v9584_v61 = vunpack.c.h.bf16 %v9582_v25  ;;  %v9586_v48 = vunpack.c.l.bf16 %v9585_v11  ;;  %v9618_v25 = vld [vmem:[#allocation174_spill] sm:$0xff] }
 0x172   : > { %v2053_v5 = vadd.f32 %v2052_v19, %v9581_v29  ;;  %v2122_v39 = vadd.f32 %v2121_v16, %v9583_v47  ;;  %v9587_v4 = vunpack.c.h.bf16 %v9585_v11  ;;  %v9589_v8 = vunpack.c.l.bf16 %v9588_v49  ;;  %v9621_v11 = vld [vmem:[#allocation19_spill] sm:$0xff] }
 0x173   : > { %v2191_v6 = vadd.f32 %v2190_v35, %v9584_v61  ;;  %v1709_v2 = vadd.f32 %v1708_v13, %v9586_v48  ;;  %v9590_v46 = vunpack.c.h.bf16 %v9588_v49  ;;  %v9592_v30 = vunpack.c.l.bf16 %v9591_v34  ;;  %v9624_v49 = vld [vmem:[#allocation69_spill] sm:$0xff] }
 0x174   : > { %v1778_v41 = vadd.f32 %v1777_v21, %v9587_v4  ;;  %v1847_v60 = vadd.f32 %v1846_v14, %v9589_v8  ;;  %v9593_v22 = vunpack.c.h.bf16 %v9591_v34  ;;  %v9595_v31 = vunpack.c.l.bf16 %v9594_v62  ;;  %v9627_v34 = vld [vmem:[#allocation122_spill] sm:$0xff] }
 0x175   : > { %v1916_v18 = vadd.f32 %v1915_v43, %v9590_v46  ;;  %v1985_v7 = vadd.f32 %v1984_v45, %v9592_v30  ;;  %v9596_v10 = vunpack.c.h.bf16 %v9594_v62  ;;  %v9598_v17 = vunpack.c.l.bf16 %v9597_v54  ;;  %v9630_v62 = vld [vmem:[#allocation175_spill] sm:$0xff] }
 0x176   : > { %v2054_v32 = vadd.f32 %v2053_v5, %v9593_v22  ;;  %v2123_v26 = vadd.f32 %v2122_v39, %v9595_v31  ;;  %v9599_v28 = vunpack.c.h.bf16 %v9597_v54  ;;  %v9601_v55 = vunpack.c.l.bf16 %v9600_v23  ;;  %v9633_v54 = vld [vmem:[#allocation20_spill] sm:$0xff] }
 0x177   : > { %v2192_v27 = vadd.f32 %v2191_v6, %v9596_v10  ;;  %v1710_v50 = vadd.f32 %v1709_v2, %v9598_v17  ;;  %v9602_v12 = vunpack.c.h.bf16 %v9600_v23  ;;  %v9604_v56 = vunpack.c.l.bf16 %v9603_v9  ;;  %v9636_v23 = vld [vmem:[#allocation70_spill] sm:$0xff] }
 0x178   : > { %v1779_v44 = vadd.f32 %v1778_v41, %v9599_v28  ;;  %v1848_v33 = vadd.f32 %v1847_v60, %v9601_v55  ;;  %v9605_v37 = vunpack.c.h.bf16 %v9603_v9  ;;  %v9607_v58 = vunpack.c.l.bf16 %v9606_v3  ;;  %v9639_v9 = vld [vmem:[#allocation123_spill] sm:$0xff] }
 0x179   : > { %v1917_v36 = vadd.f32 %v1916_v18, %v9602_v12  ;;  %v1986_v15 = vadd.f32 %v1985_v7, %v9604_v56  ;;  %v9608_v51 = vunpack.c.h.bf16 %v9606_v3  ;;  %v9610_v40 = vunpack.c.l.bf16 %v9609_v0  ;;  %v9642_v3 = vld [vmem:[#allocation176_spill] sm:$0xff] }
 0x17a   : > { %v2055_v19 = vadd.f32 %v2054_v32, %v9605_v37  ;;  %v2124_v16 = vadd.f32 %v2123_v26, %v9607_v58  ;;  %v9611_v1 = vunpack.c.h.bf16 %v9609_v0  ;;  %v9613_v59 = vunpack.c.l.bf16 %v9612_v42  ;;  %v9645_v0 = vld [vmem:[#allocation21_spill] sm:$0xff] }
 0x17b   : > { %v2193_v35 = vadd.f32 %v2192_v27, %v9608_v51  ;;  %v1711_v13 = vadd.f32 %v1710_v50, %v9610_v40  ;;  %v9614_v53 = vunpack.c.h.bf16 %v9612_v42  ;;  %v9616_v63 = vunpack.c.l.bf16 %v9615_v24  ;;  %v9648_v42 = vld [vmem:[#allocation71_spill] sm:$0xff] }
 0x17c   : > { %v1780_v21 = vadd.f32 %v1779_v44, %v9611_v1  ;;  %v1849_v14 = vadd.f32 %v1848_v33, %v9613_v59  ;;  %v9617_v29 = vunpack.c.h.bf16 %v9615_v24  ;;  %v9619_v47 = vunpack.c.l.bf16 %v9618_v25  ;;  %v9651_v24 = vld [vmem:[#allocation124_spill] sm:$0xff] }
 0x17d   : > { %v1918_v43 = vadd.f32 %v1917_v36, %v9614_v53  ;;  %v1987_v45 = vadd.f32 %v1986_v15, %v9616_v63  ;;  %v9620_v61 = vunpack.c.h.bf16 %v9618_v25  ;;  %v9622_v48 = vunpack.c.l.bf16 %v9621_v11  ;;  %v9654_v25 = vld [vmem:[#allocation177_spill] sm:$0xff] }
 0x17e   : > { %v2056_v5 = vadd.f32 %v2055_v19, %v9617_v29  ;;  %v2125_v39 = vadd.f32 %v2124_v16, %v9619_v47  ;;  %v9623_v4 = vunpack.c.h.bf16 %v9621_v11  ;;  %v9625_v8 = vunpack.c.l.bf16 %v9624_v49  ;;  %v9657_v11 = vld [vmem:[#allocation22_spill] sm:$0xff] }
 0x17f   : > { %v2194_v6 = vadd.f32 %v2193_v35, %v9620_v61  ;;  %v1712_v2 = vadd.f32 %v1711_v13, %v9622_v48  ;;  %v9626_v46 = vunpack.c.h.bf16 %v9624_v49  ;;  %v9628_v30 = vunpack.c.l.bf16 %v9627_v34  ;;  %v9660_v49 = vld [vmem:[#allocation72_spill] sm:$0xff] }
 0x180   : > { %v1781_v41 = vadd.f32 %v1780_v21, %v9623_v4  ;;  %v1850_v60 = vadd.f32 %v1849_v14, %v9625_v8  ;;  %v9629_v22 = vunpack.c.h.bf16 %v9627_v34  ;;  %v9631_v31 = vunpack.c.l.bf16 %v9630_v62  ;;  %v9663_v34 = vld [vmem:[#allocation125_spill] sm:$0xff] }
 0x181   : > { %v1919_v18 = vadd.f32 %v1918_v43, %v9626_v46  ;;  %v1988_v7 = vadd.f32 %v1987_v45, %v9628_v30  ;;  %v9632_v10 = vunpack.c.h.bf16 %v9630_v62  ;;  %v9634_v17 = vunpack.c.l.bf16 %v9633_v54  ;;  %v9666_v62 = vld [vmem:[#allocation178_spill] sm:$0xff] }
 0x182   : > { %v2057_v32 = vadd.f32 %v2056_v5, %v9629_v22  ;;  %v2126_v26 = vadd.f32 %v2125_v39, %v9631_v31  ;;  %v9635_v28 = vunpack.c.h.bf16 %v9633_v54  ;;  %v9637_v55 = vunpack.c.l.bf16 %v9636_v23  ;;  %v9669_v54 = vld [vmem:[#allocation23_spill] sm:$0xff] }
 0x183   : > { %v2195_v27 = vadd.f32 %v2194_v6, %v9632_v10  ;;  %v1713_v50 = vadd.f32 %v1712_v2, %v9634_v17  ;;  %v9638_v12 = vunpack.c.h.bf16 %v9636_v23  ;;  %v9640_v56 = vunpack.c.l.bf16 %v9639_v9  ;;  %v9672_v23 = vld [vmem:[#allocation73_spill] sm:$0xff] }
 0x184   : > { %v1782_v44 = vadd.f32 %v1781_v41, %v9635_v28  ;;  %v1851_v33 = vadd.f32 %v1850_v60, %v9637_v55  ;;  %v9641_v37 = vunpack.c.h.bf16 %v9639_v9  ;;  %v9643_v58 = vunpack.c.l.bf16 %v9642_v3  ;;  %v9675_v9 = vld [vmem:[#allocation126_spill] sm:$0xff] }
 0x185   : > { %v1920_v36 = vadd.f32 %v1919_v18, %v9638_v12  ;;  %v1989_v15 = vadd.f32 %v1988_v7, %v9640_v56  ;;  %v9644_v51 = vunpack.c.h.bf16 %v9642_v3  ;;  %v9646_v40 = vunpack.c.l.bf16 %v9645_v0  ;;  %v9678_v3 = vld [vmem:[#allocation179_spill] sm:$0xff] }
 0x186   : > { %v2058_v19 = vadd.f32 %v2057_v32, %v9641_v37  ;;  %v2127_v16 = vadd.f32 %v2126_v26, %v9643_v58  ;;  %v9647_v1 = vunpack.c.h.bf16 %v9645_v0  ;;  %v9649_v59 = vunpack.c.l.bf16 %v9648_v42  ;;  %v9681_v0 = vld [vmem:[#allocation24_spill] sm:$0xff] }
 0x187   : > { %v2196_v35 = vadd.f32 %v2195_v27, %v9644_v51  ;;  %v1714_v13 = vadd.f32 %v1713_v50, %v9646_v40  ;;  %v9650_v53 = vunpack.c.h.bf16 %v9648_v42  ;;  %v9652_v63 = vunpack.c.l.bf16 %v9651_v24  ;;  %v9684_v42 = vld [vmem:[#allocation74_spill] sm:$0xff] }
 0x188   : > { %v1783_v21 = vadd.f32 %v1782_v44, %v9647_v1  ;;  %v1852_v14 = vadd.f32 %v1851_v33, %v9649_v59  ;;  %v9653_v29 = vunpack.c.h.bf16 %v9651_v24  ;;  %v9655_v47 = vunpack.c.l.bf16 %v9654_v25  ;;  %v9687_v24 = vld [vmem:[#allocation127_spill] sm:$0xff] }
 0x189   : > { %v1921_v43 = vadd.f32 %v1920_v36, %v9650_v53  ;;  %v1990_v45 = vadd.f32 %v1989_v15, %v9652_v63  ;;  %v9656_v61 = vunpack.c.h.bf16 %v9654_v25  ;;  %v9658_v48 = vunpack.c.l.bf16 %v9657_v11  ;;  %v9690_v25 = vld [vmem:[#allocation180_spill] sm:$0xff] }
 0x18a   : > { %v2059_v5 = vadd.f32 %v2058_v19, %v9653_v29  ;;  %v2128_v39 = vadd.f32 %v2127_v16, %v9655_v47  ;;  %v9659_v4 = vunpack.c.h.bf16 %v9657_v11  ;;  %v9661_v8 = vunpack.c.l.bf16 %v9660_v49  ;;  %v9693_v11 = vld [vmem:[#allocation25_spill] sm:$0xff] }
 0x18b   : > { %v2197_v6 = vadd.f32 %v2196_v35, %v9656_v61  ;;  %v1715_v2 = vadd.f32 %v1714_v13, %v9658_v48  ;;  %v9662_v46 = vunpack.c.h.bf16 %v9660_v49  ;;  %v9664_v30 = vunpack.c.l.bf16 %v9663_v34  ;;  %v9696_v49 = vld [vmem:[#allocation75_spill] sm:$0xff] }
 0x18c   : > { %v1784_v41 = vadd.f32 %v1783_v21, %v9659_v4  ;;  %v1853_v60 = vadd.f32 %v1852_v14, %v9661_v8  ;;  %v9665_v22 = vunpack.c.h.bf16 %v9663_v34  ;;  %v9667_v31 = vunpack.c.l.bf16 %v9666_v62  ;;  %v9699_v34 = vld [vmem:[#allocation128_spill] sm:$0xff] }
 0x18d   : > { %v1922_v18 = vadd.f32 %v1921_v43, %v9662_v46  ;;  %v1991_v7 = vadd.f32 %v1990_v45, %v9664_v30  ;;  %v9668_v10 = vunpack.c.h.bf16 %v9666_v62  ;;  %v9670_v17 = vunpack.c.l.bf16 %v9669_v54  ;;  %v9702_v62 = vld [vmem:[#allocation181_spill] sm:$0xff] }
 0x18e   : > { %v2060_v32 = vadd.f32 %v2059_v5, %v9665_v22  ;;  %v2129_v26 = vadd.f32 %v2128_v39, %v9667_v31  ;;  %v9671_v28 = vunpack.c.h.bf16 %v9669_v54  ;;  %v9673_v55 = vunpack.c.l.bf16 %v9672_v23  ;;  %v9705_v54 = vld [vmem:[#allocation26_spill] sm:$0xff] }
 0x18f   : > { %v2198_v27 = vadd.f32 %v2197_v6, %v9668_v10  ;;  %v1716_v50 = vadd.f32 %v1715_v2, %v9670_v17  ;;  %v9674_v12 = vunpack.c.h.bf16 %v9672_v23  ;;  %v9676_v56 = vunpack.c.l.bf16 %v9675_v9  ;;  %v9708_v23 = vld [vmem:[#allocation76_spill] sm:$0xff] }
 0x190   : > { %v1785_v44 = vadd.f32 %v1784_v41, %v9671_v28  ;;  %v1854_v33 = vadd.f32 %v1853_v60, %v9673_v55  ;;  %v9677_v37 = vunpack.c.h.bf16 %v9675_v9  ;;  %v9679_v58 = vunpack.c.l.bf16 %v9678_v3  ;;  %v9711_v9 = vld [vmem:[#allocation129_spill] sm:$0xff] }
 0x191   : > { %v1923_v36 = vadd.f32 %v1922_v18, %v9674_v12  ;;  %v1992_v15 = vadd.f32 %v1991_v7, %v9676_v56  ;;  %v9680_v51 = vunpack.c.h.bf16 %v9678_v3  ;;  %v9682_v40 = vunpack.c.l.bf16 %v9681_v0  ;;  %v9714_v3 = vld [vmem:[#allocation182_spill] sm:$0xff] }
 0x192   : > { %v2061_v19 = vadd.f32 %v2060_v32, %v9677_v37  ;;  %v2130_v16 = vadd.f32 %v2129_v26, %v9679_v58  ;;  %v9683_v1 = vunpack.c.h.bf16 %v9681_v0  ;;  %v9685_v59 = vunpack.c.l.bf16 %v9684_v42  ;;  %v9717_v0 = vld [vmem:[#allocation27_spill] sm:$0xff] }
 0x193   : > { %v2199_v35 = vadd.f32 %v2198_v27, %v9680_v51  ;;  %v1717_v13 = vadd.f32 %v1716_v50, %v9682_v40  ;;  %v9686_v53 = vunpack.c.h.bf16 %v9684_v42  ;;  %v9688_v63 = vunpack.c.l.bf16 %v9687_v24  ;;  %v9720_v42 = vld [vmem:[#allocation77_spill] sm:$0xff] }
 0x194   : > { %v1786_v21 = vadd.f32 %v1785_v44, %v9683_v1  ;;  %v1855_v14 = vadd.f32 %v1854_v33, %v9685_v59  ;;  %v9689_v29 = vunpack.c.h.bf16 %v9687_v24  ;;  %v9691_v47 = vunpack.c.l.bf16 %v9690_v25  ;;  %v9723_v24 = vld [vmem:[#allocation130_spill] sm:$0xff] }
 0x195   : > { %v1924_v43 = vadd.f32 %v1923_v36, %v9686_v53  ;;  %v1993_v45 = vadd.f32 %v1992_v15, %v9688_v63  ;;  %v9692_v61 = vunpack.c.h.bf16 %v9690_v25  ;;  %v9694_v48 = vunpack.c.l.bf16 %v9693_v11  ;;  %v9726_v25 = vld [vmem:[#allocation183_spill] sm:$0xff] }
 0x196   : > { %v2062_v5 = vadd.f32 %v2061_v19, %v9689_v29  ;;  %v2131_v39 = vadd.f32 %v2130_v16, %v9691_v47  ;;  %v9695_v4 = vunpack.c.h.bf16 %v9693_v11  ;;  %v9697_v8 = vunpack.c.l.bf16 %v9696_v49  ;;  %v9729_v11 = vld [vmem:[#allocation28_spill] sm:$0xff] }
 0x197   : > { %v2200_v6 = vadd.f32 %v2199_v35, %v9692_v61  ;;  %v1718_v2 = vadd.f32 %v1717_v13, %v9694_v48  ;;  %v9698_v46 = vunpack.c.h.bf16 %v9696_v49  ;;  %v9700_v30 = vunpack.c.l.bf16 %v9699_v34  ;;  %v9732_v49 = vld [vmem:[#allocation78_spill] sm:$0xff] }
 0x198   : > { %v1787_v41 = vadd.f32 %v1786_v21, %v9695_v4  ;;  %v1856_v60 = vadd.f32 %v1855_v14, %v9697_v8  ;;  %v9701_v22 = vunpack.c.h.bf16 %v9699_v34  ;;  %v9703_v31 = vunpack.c.l.bf16 %v9702_v62  ;;  %v9735_v34 = vld [vmem:[#allocation131_spill] sm:$0xff] }
 0x199   : > { %v1925_v18 = vadd.f32 %v1924_v43, %v9698_v46  ;;  %v1994_v7 = vadd.f32 %v1993_v45, %v9700_v30  ;;  %v9704_v10 = vunpack.c.h.bf16 %v9702_v62  ;;  %v9706_v17 = vunpack.c.l.bf16 %v9705_v54  ;;  %v9738_v62 = vld [vmem:[#allocation184_spill] sm:$0xff] }
 0x19a   : > { %v2063_v32 = vadd.f32 %v2062_v5, %v9701_v22  ;;  %v2132_v26 = vadd.f32 %v2131_v39, %v9703_v31  ;;  %v9707_v28 = vunpack.c.h.bf16 %v9705_v54  ;;  %v9709_v55 = vunpack.c.l.bf16 %v9708_v23  ;;  %v9741_v54 = vld [vmem:[#allocation29_spill] sm:$0xff] }
 0x19b   : > { %v2201_v27 = vadd.f32 %v2200_v6, %v9704_v10  ;;  %v1719_v50 = vadd.f32 %v1718_v2, %v9706_v17  ;;  %v9710_v12 = vunpack.c.h.bf16 %v9708_v23  ;;  %v9712_v56 = vunpack.c.l.bf16 %v9711_v9  ;;  %v9744_v23 = vld [vmem:[#allocation79_spill] sm:$0xff] }
 0x19c   : > { %v1788_v44 = vadd.f32 %v1787_v41, %v9707_v28  ;;  %v1857_v33 = vadd.f32 %v1856_v60, %v9709_v55  ;;  %v9713_v37 = vunpack.c.h.bf16 %v9711_v9  ;;  %v9715_v58 = vunpack.c.l.bf16 %v9714_v3  ;;  %v9747_v9 = vld [vmem:[#allocation132_spill] sm:$0xff] }
 0x19d   : > { %v1926_v36 = vadd.f32 %v1925_v18, %v9710_v12  ;;  %v1995_v15 = vadd.f32 %v1994_v7, %v9712_v56  ;;  %v9716_v51 = vunpack.c.h.bf16 %v9714_v3  ;;  %v9718_v40 = vunpack.c.l.bf16 %v9717_v0  ;;  %v9750_v3 = vld [vmem:[#allocation185_spill] sm:$0xff] }
 0x19e   : > { %v2064_v19 = vadd.f32 %v2063_v32, %v9713_v37  ;;  %v2133_v16 = vadd.f32 %v2132_v26, %v9715_v58  ;;  %v9719_v1 = vunpack.c.h.bf16 %v9717_v0  ;;  %v9721_v59 = vunpack.c.l.bf16 %v9720_v42  ;;  %v9753_v0 = vld [vmem:[#allocation30_spill] sm:$0xff] }
 0x19f   : > { %v2202_v35 = vadd.f32 %v2201_v27, %v9716_v51  ;;  %v1720_v13 = vadd.f32 %v1719_v50, %v9718_v40  ;;  %v9722_v53 = vunpack.c.h.bf16 %v9720_v42  ;;  %v9724_v63 = vunpack.c.l.bf16 %v9723_v24  ;;  %v9756_v42 = vld [vmem:[#allocation80_spill] sm:$0xff] }
 0x1a0   : > { %v1789_v21 = vadd.f32 %v1788_v44, %v9719_v1  ;;  %v1858_v14 = vadd.f32 %v1857_v33, %v9721_v59  ;;  %v9725_v29 = vunpack.c.h.bf16 %v9723_v24  ;;  %v9727_v47 = vunpack.c.l.bf16 %v9726_v25  ;;  %v9759_v24 = vld [vmem:[#allocation133_spill] sm:$0xff] }
 0x1a1   : > { %v1927_v43 = vadd.f32 %v1926_v36, %v9722_v53  ;;  %v1996_v45 = vadd.f32 %v1995_v15, %v9724_v63  ;;  %v9728_v61 = vunpack.c.h.bf16 %v9726_v25  ;;  %v9730_v48 = vunpack.c.l.bf16 %v9729_v11  ;;  %v9762_v25 = vld [vmem:[#allocation186_spill] sm:$0xff] }
 0x1a2   : > { %v2065_v5 = vadd.f32 %v2064_v19, %v9725_v29  ;;  %v2134_v39 = vadd.f32 %v2133_v16, %v9727_v47  ;;  %v9731_v4 = vunpack.c.h.bf16 %v9729_v11  ;;  %v9733_v8 = vunpack.c.l.bf16 %v9732_v49  ;;  %v9765_v11 = vld [vmem:[#allocation31_spill] sm:$0xff] }
 0x1a3   : > { %v2203_v6 = vadd.f32 %v2202_v35, %v9728_v61  ;;  %v1721_v2 = vadd.f32 %v1720_v13, %v9730_v48  ;;  %v9734_v46 = vunpack.c.h.bf16 %v9732_v49  ;;  %v9736_v30 = vunpack.c.l.bf16 %v9735_v34  ;;  %v9768_v49 = vld [vmem:[#allocation81_spill] sm:$0xff] }
 0x1a4   : > { %v1790_v41 = vadd.f32 %v1789_v21, %v9731_v4  ;;  %v1859_v60 = vadd.f32 %v1858_v14, %v9733_v8  ;;  %v9737_v22 = vunpack.c.h.bf16 %v9735_v34  ;;  %v9739_v31 = vunpack.c.l.bf16 %v9738_v62  ;;  %v9771_v34 = vld [vmem:[#allocation134_spill] sm:$0xff] }
 0x1a5   : > { %v1928_v18 = vadd.f32 %v1927_v43, %v9734_v46  ;;  %v1997_v7 = vadd.f32 %v1996_v45, %v9736_v30  ;;  %v9740_v10 = vunpack.c.h.bf16 %v9738_v62  ;;  %v9742_v17 = vunpack.c.l.bf16 %v9741_v54  ;;  %v9774_v62 = vld [vmem:[#allocation187_spill] sm:$0xff] }
 0x1a6   : > { %v2066_v32 = vadd.f32 %v2065_v5, %v9737_v22  ;;  %v2135_v26 = vadd.f32 %v2134_v39, %v9739_v31  ;;  %v9743_v28 = vunpack.c.h.bf16 %v9741_v54  ;;  %v9745_v55 = vunpack.c.l.bf16 %v9744_v23  ;;  %v9777_v54 = vld [vmem:[#allocation32_spill] sm:$0xff] }
 0x1a7   : > { %v2204_v27 = vadd.f32 %v2203_v6, %v9740_v10  ;;  %v1722_v50 = vadd.f32 %v1721_v2, %v9742_v17  ;;  %v9746_v12 = vunpack.c.h.bf16 %v9744_v23  ;;  %v9748_v56 = vunpack.c.l.bf16 %v9747_v9  ;;  %v9780_v23 = vld [vmem:[#allocation82_spill] sm:$0xff] }
 0x1a8   : > { %v1791_v44 = vadd.f32 %v1790_v41, %v9743_v28  ;;  %v1860_v33 = vadd.f32 %v1859_v60, %v9745_v55  ;;  %v9749_v37 = vunpack.c.h.bf16 %v9747_v9  ;;  %v9751_v58 = vunpack.c.l.bf16 %v9750_v3  ;;  %v9783_v9 = vld [vmem:[#allocation135_spill] sm:$0xff] }
 0x1a9   : > { %v1929_v36 = vadd.f32 %v1928_v18, %v9746_v12  ;;  %v1998_v15 = vadd.f32 %v1997_v7, %v9748_v56  ;;  %v9752_v51 = vunpack.c.h.bf16 %v9750_v3  ;;  %v9754_v40 = vunpack.c.l.bf16 %v9753_v0  ;;  %v9786_v3 = vld [vmem:[#allocation188_spill] sm:$0xff] }
 0x1aa   : > { %v2067_v19 = vadd.f32 %v2066_v32, %v9749_v37  ;;  %v2136_v16 = vadd.f32 %v2135_v26, %v9751_v58  ;;  %v9755_v1 = vunpack.c.h.bf16 %v9753_v0  ;;  %v9757_v59 = vunpack.c.l.bf16 %v9756_v42  ;;  %v9789_v0 = vld [vmem:[#allocation33_spill] sm:$0xff] }
 0x1ab   : > { %v2205_v35 = vadd.f32 %v2204_v27, %v9752_v51  ;;  %v1723_v13 = vadd.f32 %v1722_v50, %v9754_v40  ;;  %v9758_v53 = vunpack.c.h.bf16 %v9756_v42  ;;  %v9760_v63 = vunpack.c.l.bf16 %v9759_v24  ;;  %v9792_v42 = vld [vmem:[#allocation83_spill] sm:$0xff] }
 0x1ac   : > { %v1792_v21 = vadd.f32 %v1791_v44, %v9755_v1  ;;  %v1861_v14 = vadd.f32 %v1860_v33, %v9757_v59  ;;  %v9761_v29 = vunpack.c.h.bf16 %v9759_v24  ;;  %v9763_v47 = vunpack.c.l.bf16 %v9762_v25  ;;  %v9795_v24 = vld [vmem:[#allocation136_spill] sm:$0xff] }
 0x1ad   : > { %v1930_v43 = vadd.f32 %v1929_v36, %v9758_v53  ;;  %v1999_v45 = vadd.f32 %v1998_v15, %v9760_v63  ;;  %v9764_v61 = vunpack.c.h.bf16 %v9762_v25  ;;  %v9766_v48 = vunpack.c.l.bf16 %v9765_v11  ;;  %v9798_v25 = vld [vmem:[#allocation189_spill] sm:$0xff] }
 0x1ae   : > { %v2068_v5 = vadd.f32 %v2067_v19, %v9761_v29  ;;  %v2137_v39 = vadd.f32 %v2136_v16, %v9763_v47  ;;  %v9767_v4 = vunpack.c.h.bf16 %v9765_v11  ;;  %v9769_v8 = vunpack.c.l.bf16 %v9768_v49  ;;  %v9801_v11 = vld [vmem:[#allocation34_spill] sm:$0xff] }
 0x1af   : > { %v2206_v6 = vadd.f32 %v2205_v35, %v9764_v61  ;;  %v1724_v2 = vadd.f32 %v1723_v13, %v9766_v48  ;;  %v9770_v46 = vunpack.c.h.bf16 %v9768_v49  ;;  %v9772_v30 = vunpack.c.l.bf16 %v9771_v34  ;;  %v9804_v49 = vld [vmem:[#allocation84_spill] sm:$0xff] }
 0x1b0   : > { %v1793_v41 = vadd.f32 %v1792_v21, %v9767_v4  ;;  %v1862_v60 = vadd.f32 %v1861_v14, %v9769_v8  ;;  %v9773_v22 = vunpack.c.h.bf16 %v9771_v34  ;;  %v9775_v31 = vunpack.c.l.bf16 %v9774_v62  ;;  %v9807_v34 = vld [vmem:[#allocation137_spill] sm:$0xff] }
 0x1b1   : > { %v1931_v18 = vadd.f32 %v1930_v43, %v9770_v46  ;;  %v2000_v7 = vadd.f32 %v1999_v45, %v9772_v30  ;;  %v9776_v10 = vunpack.c.h.bf16 %v9774_v62  ;;  %v9778_v17 = vunpack.c.l.bf16 %v9777_v54  ;;  %v9810_v62 = vld [vmem:[#allocation190_spill] sm:$0xff] }
 0x1b2   : > { %v2069_v32 = vadd.f32 %v2068_v5, %v9773_v22  ;;  %v2138_v26 = vadd.f32 %v2137_v39, %v9775_v31  ;;  %v9779_v28 = vunpack.c.h.bf16 %v9777_v54  ;;  %v9781_v55 = vunpack.c.l.bf16 %v9780_v23  ;;  %v9813_v54 = vld [vmem:[#allocation35_spill] sm:$0xff] }
 0x1b3   : > { %v2207_v27 = vadd.f32 %v2206_v6, %v9776_v10  ;;  %v1725_v50 = vadd.f32 %v1724_v2, %v9778_v17  ;;  %v9782_v12 = vunpack.c.h.bf16 %v9780_v23  ;;  %v9784_v56 = vunpack.c.l.bf16 %v9783_v9  ;;  %v9816_v23 = vld [vmem:[#allocation85_spill] sm:$0xff] }
 0x1b4   : > { %v1794_v44 = vadd.f32 %v1793_v41, %v9779_v28  ;;  %v1863_v33 = vadd.f32 %v1862_v60, %v9781_v55  ;;  %v9785_v37 = vunpack.c.h.bf16 %v9783_v9  ;;  %v9787_v58 = vunpack.c.l.bf16 %v9786_v3  ;;  %v9819_v9 = vld [vmem:[#allocation138_spill] sm:$0xff] }
 0x1b5   : > { %v1932_v36 = vadd.f32 %v1931_v18, %v9782_v12  ;;  %v2001_v15 = vadd.f32 %v2000_v7, %v9784_v56  ;;  %v9788_v51 = vunpack.c.h.bf16 %v9786_v3  ;;  %v9790_v40 = vunpack.c.l.bf16 %v9789_v0  ;;  %v9822_v3 = vld [vmem:[#allocation191_spill] sm:$0xff] }
 0x1b6   : > { %v2070_v19 = vadd.f32 %v2069_v32, %v9785_v37  ;;  %v2139_v16 = vadd.f32 %v2138_v26, %v9787_v58  ;;  %v9791_v1 = vunpack.c.h.bf16 %v9789_v0  ;;  %v9793_v59 = vunpack.c.l.bf16 %v9792_v42  ;;  %v9825_v0 = vld [vmem:[#allocation36_spill] sm:$0xff] }
 0x1b7   : > { %v2208_v35 = vadd.f32 %v2207_v27, %v9788_v51  ;;  %v1726_v13 = vadd.f32 %v1725_v50, %v9790_v40  ;;  %v9794_v53 = vunpack.c.h.bf16 %v9792_v42  ;;  %v9796_v63 = vunpack.c.l.bf16 %v9795_v24  ;;  %v9828_v42 = vld [vmem:[#allocation86_spill] sm:$0xff] }
 0x1b8   : > { %v1795_v21 = vadd.f32 %v1794_v44, %v9791_v1  ;;  %v1864_v14 = vadd.f32 %v1863_v33, %v9793_v59  ;;  %v9797_v29 = vunpack.c.h.bf16 %v9795_v24  ;;  %v9799_v47 = vunpack.c.l.bf16 %v9798_v25  ;;  %v9831_v24 = vld [vmem:[#allocation139_spill] sm:$0xff] }
 0x1b9   : > { %v1933_v43 = vadd.f32 %v1932_v36, %v9794_v53  ;;  %v2002_v45 = vadd.f32 %v2001_v15, %v9796_v63  ;;  %v9800_v61 = vunpack.c.h.bf16 %v9798_v25  ;;  %v9802_v48 = vunpack.c.l.bf16 %v9801_v11  ;;  %v9834_v25 = vld [vmem:[#allocation192_spill] sm:$0xff] }
 0x1ba   : > { %v2071_v5 = vadd.f32 %v2070_v19, %v9797_v29  ;;  %v2140_v39 = vadd.f32 %v2139_v16, %v9799_v47  ;;  %v9803_v4 = vunpack.c.h.bf16 %v9801_v11  ;;  %v9805_v8 = vunpack.c.l.bf16 %v9804_v49  ;;  %v9837_v11 = vld [vmem:[#allocation37_spill] sm:$0xff] }
 0x1bb   : > { %v2209_v6 = vadd.f32 %v2208_v35, %v9800_v61  ;;  %v1727_v2 = vadd.f32 %v1726_v13, %v9802_v48  ;;  %v9806_v46 = vunpack.c.h.bf16 %v9804_v49  ;;  %v9808_v30 = vunpack.c.l.bf16 %v9807_v34  ;;  %v9840_v49 = vld [vmem:[#allocation87_spill] sm:$0xff] }
 0x1bc   : > { %v1796_v41 = vadd.f32 %v1795_v21, %v9803_v4  ;;  %v1865_v60 = vadd.f32 %v1864_v14, %v9805_v8  ;;  %v9809_v22 = vunpack.c.h.bf16 %v9807_v34  ;;  %v9811_v31 = vunpack.c.l.bf16 %v9810_v62  ;;  %v9843_v34 = vld [vmem:[#allocation140_spill] sm:$0xff] }
 0x1bd   : > { %v1934_v18 = vadd.f32 %v1933_v43, %v9806_v46  ;;  %v2003_v7 = vadd.f32 %v2002_v45, %v9808_v30  ;;  %v9812_v10 = vunpack.c.h.bf16 %v9810_v62  ;;  %v9814_v17 = vunpack.c.l.bf16 %v9813_v54  ;;  %v9846_v62 = vld [vmem:[#allocation193_spill] sm:$0xff] }
 0x1be   : > { %v2072_v32 = vadd.f32 %v2071_v5, %v9809_v22  ;;  %v2141_v26 = vadd.f32 %v2140_v39, %v9811_v31  ;;  %v9815_v28 = vunpack.c.h.bf16 %v9813_v54  ;;  %v9817_v55 = vunpack.c.l.bf16 %v9816_v23  ;;  %v9849_v54 = vld [vmem:[#allocation38_spill] sm:$0xff] }
 0x1bf   : > { %v2210_v27 = vadd.f32 %v2209_v6, %v9812_v10  ;;  %v1728_v50 = vadd.f32 %v1727_v2, %v9814_v17  ;;  %v9818_v12 = vunpack.c.h.bf16 %v9816_v23  ;;  %v9820_v56 = vunpack.c.l.bf16 %v9819_v9  ;;  %v9852_v23 = vld [vmem:[#allocation88_spill] sm:$0xff] }
 0x1c0   : > { %v1797_v44 = vadd.f32 %v1796_v41, %v9815_v28  ;;  %v1866_v33 = vadd.f32 %v1865_v60, %v9817_v55  ;;  %v9821_v37 = vunpack.c.h.bf16 %v9819_v9  ;;  %v9823_v58 = vunpack.c.l.bf16 %v9822_v3  ;;  %v9855_v9 = vld [vmem:[#allocation141_spill] sm:$0xff] }
 0x1c1   : > { %v1935_v36 = vadd.f32 %v1934_v18, %v9818_v12  ;;  %v2004_v15 = vadd.f32 %v2003_v7, %v9820_v56  ;;  %v9824_v51 = vunpack.c.h.bf16 %v9822_v3  ;;  %v9826_v40 = vunpack.c.l.bf16 %v9825_v0  ;;  %v9858_v3 = vld [vmem:[#allocation194_spill] sm:$0xff] }
 0x1c2   : > { %v2073_v19 = vadd.f32 %v2072_v32, %v9821_v37  ;;  %v2142_v16 = vadd.f32 %v2141_v26, %v9823_v58  ;;  %v9827_v1 = vunpack.c.h.bf16 %v9825_v0  ;;  %v9829_v59 = vunpack.c.l.bf16 %v9828_v42  ;;  %v9861_v0 = vld [vmem:[#allocation39_spill] sm:$0xff] }
 0x1c3   : > { %v2211_v35 = vadd.f32 %v2210_v27, %v9824_v51  ;;  %v1729_v13 = vadd.f32 %v1728_v50, %v9826_v40  ;;  %v9830_v53 = vunpack.c.h.bf16 %v9828_v42  ;;  %v9832_v63 = vunpack.c.l.bf16 %v9831_v24  ;;  %v9864_v42 = vld [vmem:[#allocation89_spill] sm:$0xff] }
 0x1c4   : > { %v1798_v21 = vadd.f32 %v1797_v44, %v9827_v1  ;;  %v1867_v14 = vadd.f32 %v1866_v33, %v9829_v59  ;;  %v9833_v29 = vunpack.c.h.bf16 %v9831_v24  ;;  %v9835_v47 = vunpack.c.l.bf16 %v9834_v25  ;;  %v9867_v24 = vld [vmem:[#allocation142_spill] sm:$0xff] }
 0x1c5   : > { %v1936_v43 = vadd.f32 %v1935_v36, %v9830_v53  ;;  %v2005_v45 = vadd.f32 %v2004_v15, %v9832_v63  ;;  %v9836_v61 = vunpack.c.h.bf16 %v9834_v25  ;;  %v9838_v48 = vunpack.c.l.bf16 %v9837_v11  ;;  %v9870_v25 = vld [vmem:[#allocation195_spill] sm:$0xff] }
 0x1c6   : > { %v2074_v5 = vadd.f32 %v2073_v19, %v9833_v29  ;;  %v2143_v39 = vadd.f32 %v2142_v16, %v9835_v47  ;;  %v9839_v4 = vunpack.c.h.bf16 %v9837_v11  ;;  %v9841_v8 = vunpack.c.l.bf16 %v9840_v49  ;;  %v9873_v11 = vld [vmem:[#allocation40_spill] sm:$0xff] }
 0x1c7   : > { %v2212_v6 = vadd.f32 %v2211_v35, %v9836_v61  ;;  %v1730_v2 = vadd.f32 %v1729_v13, %v9838_v48  ;;  %v9842_v46 = vunpack.c.h.bf16 %v9840_v49  ;;  %v9844_v30 = vunpack.c.l.bf16 %v9843_v34  ;;  %v9876_v49 = vld [vmem:[#allocation90_spill] sm:$0xff] }
 0x1c8   : > { %v1799_v41 = vadd.f32 %v1798_v21, %v9839_v4  ;;  %v1868_v60 = vadd.f32 %v1867_v14, %v9841_v8  ;;  %v9845_v22 = vunpack.c.h.bf16 %v9843_v34  ;;  %v9847_v31 = vunpack.c.l.bf16 %v9846_v62  ;;  %v9879_v34 = vld [vmem:[#allocation143_spill] sm:$0xff] }
 0x1c9   : > { %v1937_v18 = vadd.f32 %v1936_v43, %v9842_v46  ;;  %v2006_v7 = vadd.f32 %v2005_v45, %v9844_v30  ;;  %v9848_v10 = vunpack.c.h.bf16 %v9846_v62  ;;  %v9850_v17 = vunpack.c.l.bf16 %v9849_v54  ;;  %v9882_v62 = vld [vmem:[#allocation196_spill] sm:$0xff] }
 0x1ca   : > { %v2075_v32 = vadd.f32 %v2074_v5, %v9845_v22  ;;  %v2144_v26 = vadd.f32 %v2143_v39, %v9847_v31  ;;  %v9851_v28 = vunpack.c.h.bf16 %v9849_v54  ;;  %v9853_v55 = vunpack.c.l.bf16 %v9852_v23  ;;  %v9885_v54 = vld [vmem:[#allocation41_spill] sm:$0xff] }
 0x1cb   : > { %v2213_v27 = vadd.f32 %v2212_v6, %v9848_v10  ;;  %v1731_v50 = vadd.f32 %v1730_v2, %v9850_v17  ;;  %v9854_v12 = vunpack.c.h.bf16 %v9852_v23  ;;  %v9856_v56 = vunpack.c.l.bf16 %v9855_v9  ;;  %v9888_v23 = vld [vmem:[#allocation91_spill] sm:$0xff] }
 0x1cc   : > { %v1800_v44 = vadd.f32 %v1799_v41, %v9851_v28  ;;  %v1869_v33 = vadd.f32 %v1868_v60, %v9853_v55  ;;  %v9857_v37 = vunpack.c.h.bf16 %v9855_v9  ;;  %v9859_v58 = vunpack.c.l.bf16 %v9858_v3  ;;  %v9891_v9 = vld [vmem:[#allocation144_spill] sm:$0xff] }
 0x1cd   : > { %v1938_v36 = vadd.f32 %v1937_v18, %v9854_v12  ;;  %v2007_v15 = vadd.f32 %v2006_v7, %v9856_v56  ;;  %v9860_v51 = vunpack.c.h.bf16 %v9858_v3  ;;  %v9862_v40 = vunpack.c.l.bf16 %v9861_v0  ;;  %v9894_v3 = vld [vmem:[#allocation197_spill] sm:$0xff] }
 0x1ce   : > { %v2076_v19 = vadd.f32 %v2075_v32, %v9857_v37  ;;  %v2145_v16 = vadd.f32 %v2144_v26, %v9859_v58  ;;  %v9863_v1 = vunpack.c.h.bf16 %v9861_v0  ;;  %v9865_v59 = vunpack.c.l.bf16 %v9864_v42  ;;  %v9897_v0 = vld [vmem:[#allocation42_spill] sm:$0xff] }
 0x1cf   : > { %v2214_v35 = vadd.f32 %v2213_v27, %v9860_v51  ;;  %v1732_v13 = vadd.f32 %v1731_v50, %v9862_v40  ;;  %v9866_v53 = vunpack.c.h.bf16 %v9864_v42  ;;  %v9868_v63 = vunpack.c.l.bf16 %v9867_v24  ;;  %v9900_v42 = vld [vmem:[#allocation92_spill] sm:$0xff] }
 0x1d0   : > { %v1801_v21 = vadd.f32 %v1800_v44, %v9863_v1  ;;  %v1870_v14 = vadd.f32 %v1869_v33, %v9865_v59  ;;  %v9869_v29 = vunpack.c.h.bf16 %v9867_v24  ;;  %v9871_v47 = vunpack.c.l.bf16 %v9870_v25  ;;  %v9903_v24 = vld [vmem:[#allocation145_spill] sm:$0xff] }
 0x1d1   : > { %v1939_v43 = vadd.f32 %v1938_v36, %v9866_v53  ;;  %v2008_v45 = vadd.f32 %v2007_v15, %v9868_v63  ;;  %v9872_v61 = vunpack.c.h.bf16 %v9870_v25  ;;  %v9874_v48 = vunpack.c.l.bf16 %v9873_v11  ;;  %v9906_v25 = vld [vmem:[#allocation198_spill] sm:$0xff] }
 0x1d2   : > { %v2077_v5 = vadd.f32 %v2076_v19, %v9869_v29  ;;  %v2146_v39 = vadd.f32 %v2145_v16, %v9871_v47  ;;  %v9875_v4 = vunpack.c.h.bf16 %v9873_v11  ;;  %v9877_v8 = vunpack.c.l.bf16 %v9876_v49  ;;  %v9909_v11 = vld [vmem:[#allocation43_spill] sm:$0xff] }
 0x1d3   : > { %v2215_v6 = vadd.f32 %v2214_v35, %v9872_v61  ;;  %v1733_v2 = vadd.f32 %v1732_v13, %v9874_v48  ;;  %v9878_v46 = vunpack.c.h.bf16 %v9876_v49  ;;  %v9880_v30 = vunpack.c.l.bf16 %v9879_v34  ;;  %v9912_v49 = vld [vmem:[#allocation93_spill] sm:$0xff] }
 0x1d4   : > { %v1802_v41 = vadd.f32 %v1801_v21, %v9875_v4  ;;  %v1871_v60 = vadd.f32 %v1870_v14, %v9877_v8  ;;  %v9881_v22 = vunpack.c.h.bf16 %v9879_v34  ;;  %v9883_v31 = vunpack.c.l.bf16 %v9882_v62  ;;  %v9915_v34 = vld [vmem:[#allocation146_spill] sm:$0xff] }
 0x1d5   : > { %v1940_v18 = vadd.f32 %v1939_v43, %v9878_v46  ;;  %v2009_v7 = vadd.f32 %v2008_v45, %v9880_v30  ;;  %v9884_v10 = vunpack.c.h.bf16 %v9882_v62  ;;  %v9886_v17 = vunpack.c.l.bf16 %v9885_v54  ;;  %v9918_v62 = vld [vmem:[#allocation199_spill] sm:$0xff] }
 0x1d6   : > { %v2078_v32 = vadd.f32 %v2077_v5, %v9881_v22  ;;  %v2147_v26 = vadd.f32 %v2146_v39, %v9883_v31  ;;  %v9887_v28 = vunpack.c.h.bf16 %v9885_v54  ;;  %v9889_v55 = vunpack.c.l.bf16 %v9888_v23  ;;  %v9921_v54 = vld [vmem:[#allocation44_spill] sm:$0xff] }
 0x1d7   : > { %v2216_v27 = vadd.f32 %v2215_v6, %v9884_v10  ;;  %v1734_v50 = vadd.f32 %v1733_v2, %v9886_v17  ;;  %v9890_v12 = vunpack.c.h.bf16 %v9888_v23  ;;  %v9892_v56 = vunpack.c.l.bf16 %v9891_v9  ;;  %v9924_v23 = vld [vmem:[#allocation94_spill] sm:$0xff] }
 0x1d8   : > { %v1803_v44 = vadd.f32 %v1802_v41, %v9887_v28  ;;  %v1872_v33 = vadd.f32 %v1871_v60, %v9889_v55  ;;  %v9893_v37 = vunpack.c.h.bf16 %v9891_v9  ;;  %v9895_v58 = vunpack.c.l.bf16 %v9894_v3  ;;  %v9927_v9 = vld [vmem:[#allocation147_spill] sm:$0xff] }
 0x1d9   : > { %v1941_v36 = vadd.f32 %v1940_v18, %v9890_v12  ;;  %v2010_v15 = vadd.f32 %v2009_v7, %v9892_v56  ;;  %v9896_v51 = vunpack.c.h.bf16 %v9894_v3  ;;  %v9898_v40 = vunpack.c.l.bf16 %v9897_v0  ;;  %v9930_v3 = vld [vmem:[#allocation200_spill] sm:$0xff] }
 0x1da   : > { %v2079_v19 = vadd.f32 %v2078_v32, %v9893_v37  ;;  %v2148_v16 = vadd.f32 %v2147_v26, %v9895_v58  ;;  %v9899_v1 = vunpack.c.h.bf16 %v9897_v0  ;;  %v9901_v59 = vunpack.c.l.bf16 %v9900_v42  ;;  %v9933_v0 = vld [vmem:[#allocation45_spill] sm:$0xff] }
 0x1db   : > { %v2217_v35 = vadd.f32 %v2216_v27, %v9896_v51  ;;  %v1735_v13 = vadd.f32 %v1734_v50, %v9898_v40  ;;  %v9902_v53 = vunpack.c.h.bf16 %v9900_v42  ;;  %v9904_v63 = vunpack.c.l.bf16 %v9903_v24  ;;  %v9936_v42 = vld [vmem:[#allocation95_spill] sm:$0xff] }
 0x1dc   : > { %v1804_v21 = vadd.f32 %v1803_v44, %v9899_v1  ;;  %v1873_v14 = vadd.f32 %v1872_v33, %v9901_v59  ;;  %v9905_v29 = vunpack.c.h.bf16 %v9903_v24  ;;  %v9907_v47 = vunpack.c.l.bf16 %v9906_v25  ;;  %v9939_v24 = vld [vmem:[#allocation148_spill] sm:$0xff] }
 0x1dd   : > { %v1942_v43 = vadd.f32 %v1941_v36, %v9902_v53  ;;  %v2011_v45 = vadd.f32 %v2010_v15, %v9904_v63  ;;  %v9908_v61 = vunpack.c.h.bf16 %v9906_v25  ;;  %v9910_v48 = vunpack.c.l.bf16 %v9909_v11  ;;  %v9942_v25 = vld [vmem:[#allocation201_spill] sm:$0xff] }
 0x1de   : > { %v2080_v5 = vadd.f32 %v2079_v19, %v9905_v29  ;;  %v2149_v39 = vadd.f32 %v2148_v16, %v9907_v47  ;;  %v9911_v4 = vunpack.c.h.bf16 %v9909_v11  ;;  %v9913_v8 = vunpack.c.l.bf16 %v9912_v49  ;;  %v9945_v11 = vld [vmem:[#allocation46_spill] sm:$0xff] }
 0x1df   : > { %v2218_v6 = vadd.f32 %v2217_v35, %v9908_v61  ;;  %v1736_v2 = vadd.f32 %v1735_v13, %v9910_v48  ;;  %v9914_v46 = vunpack.c.h.bf16 %v9912_v49  ;;  %v9916_v30 = vunpack.c.l.bf16 %v9915_v34  ;;  %v9948_v49 = vld [vmem:[#allocation96_spill] sm:$0xff] }
 0x1e0   : > { %v1805_v41 = vadd.f32 %v1804_v21, %v9911_v4  ;;  %v1874_v60 = vadd.f32 %v1873_v14, %v9913_v8  ;;  %v9917_v22 = vunpack.c.h.bf16 %v9915_v34  ;;  %v9919_v31 = vunpack.c.l.bf16 %v9918_v62  ;;  %v9951_v34 = vld [vmem:[#allocation149_spill] sm:$0xff] }
 0x1e1   : > { %v1943_v18 = vadd.f32 %v1942_v43, %v9914_v46  ;;  %v2012_v7 = vadd.f32 %v2011_v45, %v9916_v30  ;;  %v9920_v10 = vunpack.c.h.bf16 %v9918_v62  ;;  %v9922_v17 = vunpack.c.l.bf16 %v9921_v54  ;;  %v9954_v62 = vld [vmem:[#allocation202_spill] sm:$0xff] }
 0x1e2   : > { %v2081_v32 = vadd.f32 %v2080_v5, %v9917_v22  ;;  %v2150_v26 = vadd.f32 %v2149_v39, %v9919_v31  ;;  %v9923_v28 = vunpack.c.h.bf16 %v9921_v54  ;;  %v9925_v55 = vunpack.c.l.bf16 %v9924_v23  ;;  %v9957_v54 = vld [vmem:[#allocation47_spill] sm:$0xff] }
 0x1e3   : > { %v2219_v27 = vadd.f32 %v2218_v6, %v9920_v10  ;;  %v1737_v50 = vadd.f32 %v1736_v2, %v9922_v17  ;;  %v9926_v12 = vunpack.c.h.bf16 %v9924_v23  ;;  %v9928_v56 = vunpack.c.l.bf16 %v9927_v9  ;;  %v9960_v23 = vld [vmem:[#allocation97_spill] sm:$0xff] }
 0x1e4   : > { %v1806_v44 = vadd.f32 %v1805_v41, %v9923_v28  ;;  %v1875_v33 = vadd.f32 %v1874_v60, %v9925_v55  ;;  %v9929_v37 = vunpack.c.h.bf16 %v9927_v9  ;;  %v9931_v58 = vunpack.c.l.bf16 %v9930_v3  ;;  %v9963_v9 = vld [vmem:[#allocation150_spill] sm:$0xff] }
 0x1e5   : > { %v1944_v36 = vadd.f32 %v1943_v18, %v9926_v12  ;;  %v2013_v15 = vadd.f32 %v2012_v7, %v9928_v56  ;;  %v9932_v51 = vunpack.c.h.bf16 %v9930_v3  ;;  %v9934_v40 = vunpack.c.l.bf16 %v9933_v0  ;;  %v9966_v3 = vld [vmem:[#allocation203_spill] sm:$0xff] }
 0x1e6   : > { %v2082_v19 = vadd.f32 %v2081_v32, %v9929_v37  ;;  %v2151_v16 = vadd.f32 %v2150_v26, %v9931_v58  ;;  %v9935_v1 = vunpack.c.h.bf16 %v9933_v0  ;;  %v9937_v59 = vunpack.c.l.bf16 %v9936_v42  ;;  %v9969_v0 = vld [vmem:[#allocation48_spill] sm:$0xff] }
 0x1e7   : > { %v2220_v35 = vadd.f32 %v2219_v27, %v9932_v51  ;;  %v1738_v13 = vadd.f32 %v1737_v50, %v9934_v40  ;;  %v9938_v53 = vunpack.c.h.bf16 %v9936_v42  ;;  %v9940_v63 = vunpack.c.l.bf16 %v9939_v24  ;;  %v9972_v42 = vld [vmem:[#allocation98_spill] sm:$0xff] }
 0x1e8   : > { %v1807_v21 = vadd.f32 %v1806_v44, %v9935_v1  ;;  %v1876_v14 = vadd.f32 %v1875_v33, %v9937_v59  ;;  %v9941_v29 = vunpack.c.h.bf16 %v9939_v24  ;;  %v9943_v47 = vunpack.c.l.bf16 %v9942_v25  ;;  %v9975_v24 = vld [vmem:[#allocation151_spill] sm:$0xff] }
 0x1e9   : > { %v1945_v43 = vadd.f32 %v1944_v36, %v9938_v53  ;;  %v2014_v45 = vadd.f32 %v2013_v15, %v9940_v63  ;;  %v9944_v61 = vunpack.c.h.bf16 %v9942_v25  ;;  %v9946_v48 = vunpack.c.l.bf16 %v9945_v11  ;;  %v9978_v25 = vld [vmem:[#allocation204_spill] sm:$0xff] }
 0x1ea   : > { %v2083_v5 = vadd.f32 %v2082_v19, %v9941_v29  ;;  %v2152_v39 = vadd.f32 %v2151_v16, %v9943_v47  ;;  %v9947_v4 = vunpack.c.h.bf16 %v9945_v11  ;;  %v9949_v8 = vunpack.c.l.bf16 %v9948_v49  ;;  %v9981_v11 = vld [vmem:[#allocation49_spill] sm:$0xff] }
 0x1eb   : > { %v2221_v6 = vadd.f32 %v2220_v35, %v9944_v61  ;;  %v1739_v2 = vadd.f32 %v1738_v13, %v9946_v48  ;;  %v9950_v46 = vunpack.c.h.bf16 %v9948_v49  ;;  %v9952_v30 = vunpack.c.l.bf16 %v9951_v34  ;;  %v9984_v49 = vld [vmem:[#allocation99_spill] sm:$0xff] }
 0x1ec   : > { %v1808_v41 = vadd.f32 %v1807_v21, %v9947_v4  ;;  %v1877_v60 = vadd.f32 %v1876_v14, %v9949_v8  ;;  %v9953_v22 = vunpack.c.h.bf16 %v9951_v34  ;;  %v9955_v31 = vunpack.c.l.bf16 %v9954_v62  ;;  %v9987_v34 = vld [vmem:[#allocation152_spill] sm:$0xff] }
 0x1ed   : > { %v1946_v18 = vadd.f32 %v1945_v43, %v9950_v46  ;;  %v2015_v7 = vadd.f32 %v2014_v45, %v9952_v30  ;;  %v9956_v10 = vunpack.c.h.bf16 %v9954_v62  ;;  %v9958_v17 = vunpack.c.l.bf16 %v9957_v54  ;;  %v9990_v62 = vld [vmem:[#allocation205_spill] sm:$0xff] }
 0x1ee   : > { %v2084_v32 = vadd.f32 %v2083_v5, %v9953_v22  ;;  %v2153_v26 = vadd.f32 %v2152_v39, %v9955_v31  ;;  %v9959_v28 = vunpack.c.h.bf16 %v9957_v54  ;;  %v9961_v55 = vunpack.c.l.bf16 %v9960_v23  ;;  %v9993_v54 = vld [vmem:[#allocation50_spill] sm:$0xff] }
 0x1ef   : > { %v2222_v27 = vadd.f32 %v2221_v6, %v9956_v10  ;;  %v1740_v50 = vadd.f32 %v1739_v2, %v9958_v17  ;;  %v9962_v12 = vunpack.c.h.bf16 %v9960_v23  ;;  %v9964_v56 = vunpack.c.l.bf16 %v9963_v9  ;;  %v9996_v23 = vld [vmem:[#allocation100_spill] sm:$0xff] }
 0x1f0   : > { %v1809_v44 = vadd.f32 %v1808_v41, %v9959_v28  ;;  %v1878_v33 = vadd.f32 %v1877_v60, %v9961_v55  ;;  %v9965_v37 = vunpack.c.h.bf16 %v9963_v9  ;;  %v9967_v58 = vunpack.c.l.bf16 %v9966_v3  ;;  %v9999_v9 = vld [vmem:[#allocation153_spill] sm:$0xff] }
 0x1f1   : > { %v1947_v36 = vadd.f32 %v1946_v18, %v9962_v12  ;;  %v2016_v15 = vadd.f32 %v2015_v7, %v9964_v56  ;;  %v9968_v51 = vunpack.c.h.bf16 %v9966_v3  ;;  %v9970_v40 = vunpack.c.l.bf16 %v9969_v0  ;;  %v10002_v3 = vld [vmem:[#allocation206_spill] sm:$0xff] }
 0x1f2   : > { %v2085_v19 = vadd.f32 %v2084_v32, %v9965_v37  ;;  %v2154_v16 = vadd.f32 %v2153_v26, %v9967_v58  ;;  %v9971_v1 = vunpack.c.h.bf16 %v9969_v0  ;;  %v9973_v59 = vunpack.c.l.bf16 %v9972_v42  ;;  %v10005_v0 = vld [vmem:[#allocation51_spill] sm:$0xff] }
 0x1f3   : > { %v2223_v35 = vadd.f32 %v2222_v27, %v9968_v51  ;;  %v1741_v13 = vadd.f32 %v1740_v50, %v9970_v40  ;;  %v9974_v53 = vunpack.c.h.bf16 %v9972_v42  ;;  %v9976_v63 = vunpack.c.l.bf16 %v9975_v24  ;;  %v10008_v42 = vld [vmem:[#allocation101_spill] sm:$0xff] }
 0x1f4   : > { %v1810_v21 = vadd.f32 %v1809_v44, %v9971_v1  ;;  %v1879_v14 = vadd.f32 %v1878_v33, %v9973_v59  ;;  %v9977_v29 = vunpack.c.h.bf16 %v9975_v24  ;;  %v9979_v47 = vunpack.c.l.bf16 %v9978_v25  ;;  %v10011_v24 = vld [vmem:[#allocation154_spill] sm:$0xff] }
 0x1f5   : > { %v1948_v43 = vadd.f32 %v1947_v36, %v9974_v53  ;;  %v2017_v45 = vadd.f32 %v2016_v15, %v9976_v63  ;;  %v9980_v61 = vunpack.c.h.bf16 %v9978_v25  ;;  %v9982_v48 = vunpack.c.l.bf16 %v9981_v11  ;;  %v10014_v25 = vld [vmem:[#allocation207_spill] sm:$0xff] }
 0x1f6   : > { %v2086_v5 = vadd.f32 %v2085_v19, %v9977_v29  ;;  %v2155_v39 = vadd.f32 %v2154_v16, %v9979_v47  ;;  %v9983_v4 = vunpack.c.h.bf16 %v9981_v11  ;;  %v9985_v8 = vunpack.c.l.bf16 %v9984_v49  ;;  %v10017_v11 = vld [vmem:[#allocation52_spill] sm:$0xff] }
 0x1f7   : > { %v2224_v6 = vadd.f32 %v2223_v35, %v9980_v61  ;;  %v1742_v2 = vadd.f32 %v1741_v13, %v9982_v48  ;;  %v9986_v46 = vunpack.c.h.bf16 %v9984_v49  ;;  %v9988_v30 = vunpack.c.l.bf16 %v9987_v34  ;;  %v10020_v49 = vld [vmem:[#allocation102_spill] sm:$0xff] }
 0x1f8   : > { %v1811_v41 = vadd.f32 %v1810_v21, %v9983_v4  ;;  %v1880_v60 = vadd.f32 %v1879_v14, %v9985_v8  ;;  %v9989_v22 = vunpack.c.h.bf16 %v9987_v34  ;;  %v9991_v31 = vunpack.c.l.bf16 %v9990_v62  ;;  %v10023_v34 = vld [vmem:[#allocation155_spill] sm:$0xff] }
 0x1f9   : > { %v1949_v18 = vadd.f32 %v1948_v43, %v9986_v46  ;;  %v2018_v7 = vadd.f32 %v2017_v45, %v9988_v30  ;;  %v9992_v10 = vunpack.c.h.bf16 %v9990_v62  ;;  %v9994_v17 = vunpack.c.l.bf16 %v9993_v54  ;;  %v10026_v62 = vld [vmem:[#allocation208_spill] sm:$0xff] }
 0x1fa   : > { %v2087_v32 = vadd.f32 %v2086_v5, %v9989_v22  ;;  %v2156_v26 = vadd.f32 %v2155_v39, %v9991_v31  ;;  %v9995_v28 = vunpack.c.h.bf16 %v9993_v54  ;;  %v9997_v55 = vunpack.c.l.bf16 %v9996_v23  ;;  %v10029_v54 = vld [vmem:[#allocation53_spill] sm:$0xff] }
 0x1fb   : > { %v2225_v27 = vadd.f32 %v2224_v6, %v9992_v10  ;;  %v1743_v50 = vadd.f32 %v1742_v2, %v9994_v17  ;;  %v9998_v12 = vunpack.c.h.bf16 %v9996_v23  ;;  %v10000_v56 = vunpack.c.l.bf16 %v9999_v9  ;;  %v10032_v23 = vld [vmem:[#allocation103_spill] sm:$0xff] }
 0x1fc   : > { %v1812_v44 = vadd.f32 %v1811_v41, %v9995_v28  ;;  %v1881_v33 = vadd.f32 %v1880_v60, %v9997_v55  ;;  %v10001_v37 = vunpack.c.h.bf16 %v9999_v9  ;;  %v10003_v58 = vunpack.c.l.bf16 %v10002_v3  ;;  %v10035_v9 = vld [vmem:[#allocation156_spill] sm:$0xff] }
 0x1fd   : > { %v1950_v36 = vadd.f32 %v1949_v18, %v9998_v12  ;;  %v2019_v15 = vadd.f32 %v2018_v7, %v10000_v56  ;;  %v10004_v51 = vunpack.c.h.bf16 %v10002_v3  ;;  %v10006_v40 = vunpack.c.l.bf16 %v10005_v0  ;;  %v10038_v3 = vld [vmem:[#allocation209_spill] sm:$0xff] }
 0x1fe   : > { %v2088_v19 = vadd.f32 %v2087_v32, %v10001_v37  ;;  %v2157_v16 = vadd.f32 %v2156_v26, %v10003_v58  ;;  %v10007_v1 = vunpack.c.h.bf16 %v10005_v0  ;;  %v10009_v59 = vunpack.c.l.bf16 %v10008_v42  ;;  %v10041_v0 = vld [vmem:[#allocation54_spill] sm:$0xff] }
 0x1ff   : > { %v2226_v35 = vadd.f32 %v2225_v27, %v10004_v51  ;;  %v1744_v13 = vadd.f32 %v1743_v50, %v10006_v40  ;;  %v10010_v53 = vunpack.c.h.bf16 %v10008_v42  ;;  %v10012_v63 = vunpack.c.l.bf16 %v10011_v24  ;;  %v10044_v42 = vld [vmem:[#allocation104_spill] sm:$0xff] }
 0x200   : > { %v1813_v21 = vadd.f32 %v1812_v44, %v10007_v1  ;;  %v1882_v14 = vadd.f32 %v1881_v33, %v10009_v59  ;;  %v10013_v29 = vunpack.c.h.bf16 %v10011_v24  ;;  %v10015_v47 = vunpack.c.l.bf16 %v10014_v25  ;;  %v10047_v24 = vld [vmem:[#allocation157_spill] sm:$0xff] }
 0x201   : > { %v1951_v43 = vadd.f32 %v1950_v36, %v10010_v53  ;;  %v2020_v45 = vadd.f32 %v2019_v15, %v10012_v63  ;;  %v10016_v61 = vunpack.c.h.bf16 %v10014_v25  ;;  %v10018_v48 = vunpack.c.l.bf16 %v10017_v11  ;;  %v10050_v25 = vld [vmem:[#allocation210_spill] sm:$0xff] }
 0x202   : > { %v2089_v5 = vadd.f32 %v2088_v19, %v10013_v29  ;;  %v2158_v39 = vadd.f32 %v2157_v16, %v10015_v47  ;;  %v10019_v4 = vunpack.c.h.bf16 %v10017_v11  ;;  %v10021_v8 = vunpack.c.l.bf16 %v10020_v49  ;;  %v10053_v11 = vld [vmem:[#allocation55_spill] sm:$0xff] }
 0x203   : > { %v2227_v6 = vadd.f32 %v2226_v35, %v10016_v61  ;;  %v1745_v2 = vadd.f32 %v1744_v13, %v10018_v48  ;;  %v10022_v46 = vunpack.c.h.bf16 %v10020_v49  ;;  %v10024_v30 = vunpack.c.l.bf16 %v10023_v34  ;;  %v10056_v49 = vld [vmem:[#allocation105_spill] sm:$0xff] }
 0x204   : > { %v1814_v41 = vadd.f32 %v1813_v21, %v10019_v4  ;;  %v1883_v60 = vadd.f32 %v1882_v14, %v10021_v8  ;;  %v10025_v22 = vunpack.c.h.bf16 %v10023_v34  ;;  %v10027_v31 = vunpack.c.l.bf16 %v10026_v62  ;;  %v10059_v34 = vld [vmem:[#allocation158_spill] sm:$0xff] }
 0x205   : > { %v1952_v18 = vadd.f32 %v1951_v43, %v10022_v46  ;;  %v2021_v7 = vadd.f32 %v2020_v45, %v10024_v30  ;;  %v10028_v10 = vunpack.c.h.bf16 %v10026_v62  ;;  %v10030_v17 = vunpack.c.l.bf16 %v10029_v54  ;;  %v10062_v62 = vld [vmem:[#allocation211_spill] sm:$0xff] }
 0x206   : > { %v2090_v32 = vadd.f32 %v2089_v5, %v10025_v22  ;;  %v2159_v26 = vadd.f32 %v2158_v39, %v10027_v31  ;;  %v10031_v28 = vunpack.c.h.bf16 %v10029_v54  ;;  %v10033_v55 = vunpack.c.l.bf16 %v10032_v23  ;;  %v10065_v54 = vld [vmem:[#allocation56_spill] sm:$0xff] }
 0x207   : > { %v2228_v27 = vadd.f32 %v2227_v6, %v10028_v10  ;;  %v1746_v50 = vadd.f32 %v1745_v2, %v10030_v17  ;;  %v10034_v12 = vunpack.c.h.bf16 %v10032_v23  ;;  %v10036_v56 = vunpack.c.l.bf16 %v10035_v9  ;;  %v10068_v23 = vld [vmem:[#allocation106_spill] sm:$0xff] }
 0x208   : > { %v1815_v44 = vadd.f32 %v1814_v41, %v10031_v28  ;;  %v1884_v33 = vadd.f32 %v1883_v60, %v10033_v55  ;;  %v10037_v37 = vunpack.c.h.bf16 %v10035_v9  ;;  %v10039_v58 = vunpack.c.l.bf16 %v10038_v3  ;;  %v10071_v9 = vld [vmem:[#allocation159_spill] sm:$0xff] }
 0x209   : > { %v1953_v36 = vadd.f32 %v1952_v18, %v10034_v12  ;;  %v2022_v15 = vadd.f32 %v2021_v7, %v10036_v56  ;;  %v10040_v51 = vunpack.c.h.bf16 %v10038_v3  ;;  %v10042_v40 = vunpack.c.l.bf16 %v10041_v0  ;;  %v10074_v3 = vld [vmem:[#allocation212_spill] sm:$0xff] }
 0x20a   : > { %v2091_v19 = vadd.f32 %v2090_v32, %v10037_v37  ;;  %v2160_v16 = vadd.f32 %v2159_v26, %v10039_v58  ;;  %v10043_v1 = vunpack.c.h.bf16 %v10041_v0  ;;  %v10045_v59 = vunpack.c.l.bf16 %v10044_v42  ;;  %v10077_v0 = vld [vmem:[#allocation57_spill] sm:$0xff] }
 0x20b   : > { %v2229_v35 = vadd.f32 %v2228_v27, %v10040_v51  ;;  %v1747_v13 = vadd.f32 %v1746_v50, %v10042_v40  ;;  %v10046_v53 = vunpack.c.h.bf16 %v10044_v42  ;;  %v10048_v63 = vunpack.c.l.bf16 %v10047_v24  ;;  %v10080_v42 = vld [vmem:[#allocation107_spill] sm:$0xff] }
 0x20c   : > { %v1816_v21 = vadd.f32 %v1815_v44, %v10043_v1  ;;  %v1885_v14 = vadd.f32 %v1884_v33, %v10045_v59  ;;  %v10049_v29 = vunpack.c.h.bf16 %v10047_v24  ;;  %v10051_v47 = vunpack.c.l.bf16 %v10050_v25  ;;  %v10083_v24 = vld [vmem:[#allocation160_spill] sm:$0xff] }
 0x20d   : > { %v1954_v43 = vadd.f32 %v1953_v36, %v10046_v53  ;;  %v2023_v45 = vadd.f32 %v2022_v15, %v10048_v63  ;;  %v10052_v61 = vunpack.c.h.bf16 %v10050_v25  ;;  %v10054_v48 = vunpack.c.l.bf16 %v10053_v11  ;;  %v10086_v25 = vld [vmem:[#allocation213_spill] sm:$0xff] }
 0x20e   : > { %v2092_v5 = vadd.f32 %v2091_v19, %v10049_v29  ;;  %v2161_v39 = vadd.f32 %v2160_v16, %v10051_v47  ;;  %v10055_v4 = vunpack.c.h.bf16 %v10053_v11  ;;  %v10057_v8 = vunpack.c.l.bf16 %v10056_v49  ;;  %v10089_v11 = vld [vmem:[#allocation58_spill] sm:$0xff] }
 0x20f   : > { %v2230_v6 = vadd.f32 %v2229_v35, %v10052_v61  ;;  %v1748_v2 = vadd.f32 %v1747_v13, %v10054_v48  ;;  %v10058_v46 = vunpack.c.h.bf16 %v10056_v49  ;;  %v10060_v30 = vunpack.c.l.bf16 %v10059_v34  ;;  %v10092_v49 = vld [vmem:[#allocation108_spill] sm:$0xff] }
 0x210   : > { %v1817_v41 = vadd.f32 %v1816_v21, %v10055_v4  ;;  %v1886_v60 = vadd.f32 %v1885_v14, %v10057_v8  ;;  %v10061_v22 = vunpack.c.h.bf16 %v10059_v34  ;;  %v10063_v31 = vunpack.c.l.bf16 %v10062_v62  ;;  %v10095_v34 = vld [vmem:[#allocation161_spill] sm:$0xff] }
 0x211   : > { %v1955_v18 = vadd.f32 %v1954_v43, %v10058_v46  ;;  %v2024_v7 = vadd.f32 %v2023_v45, %v10060_v30  ;;  %v10064_v10 = vunpack.c.h.bf16 %v10062_v62  ;;  %v10066_v17 = vunpack.c.l.bf16 %v10065_v54  ;;  %v10098_v62 = vld [vmem:[#allocation214_spill] sm:$0xff] }
 0x212   : > { %v2093_v32 = vadd.f32 %v2092_v5, %v10061_v22  ;;  %v2162_v26 = vadd.f32 %v2161_v39, %v10063_v31  ;;  %v10067_v28 = vunpack.c.h.bf16 %v10065_v54  ;;  %v10069_v55 = vunpack.c.l.bf16 %v10068_v23  ;;  %v10101_v54 = vld [vmem:[#allocation59_spill] sm:$0xff] }
 0x213   : > { %v2231_v27 = vadd.f32 %v2230_v6, %v10064_v10  ;;  %v1749_v50 = vadd.f32 %v1748_v2, %v10066_v17  ;;  %v10070_v12 = vunpack.c.h.bf16 %v10068_v23  ;;  %v10072_v56 = vunpack.c.l.bf16 %v10071_v9  ;;  %v10104_v23 = vld [vmem:[#allocation109_spill] sm:$0xff] }
 0x214   : > { %v1818_v44 = vadd.f32 %v1817_v41, %v10067_v28  ;;  %v1887_v33 = vadd.f32 %v1886_v60, %v10069_v55  ;;  %v10073_v37 = vunpack.c.h.bf16 %v10071_v9  ;;  %v10075_v58 = vunpack.c.l.bf16 %v10074_v3  ;;  %v10107_v9 = vld [vmem:[#allocation162_spill] sm:$0xff] }
 0x215   : > { %v1956_v36 = vadd.f32 %v1955_v18, %v10070_v12  ;;  %v2025_v15 = vadd.f32 %v2024_v7, %v10072_v56  ;;  %v10076_v51 = vunpack.c.h.bf16 %v10074_v3  ;;  %v10078_v40 = vunpack.c.l.bf16 %v10077_v0  ;;  %v10110_v3 = vld [vmem:[#allocation215_spill] sm:$0xff] }
 0x216   : > { %v2094_v19 = vadd.f32 %v2093_v32, %v10073_v37  ;;  %v2163_v16 = vadd.f32 %v2162_v26, %v10075_v58  ;;  %v10079_v1 = vunpack.c.h.bf16 %v10077_v0  ;;  %v10081_v59 = vunpack.c.l.bf16 %v10080_v42  ;;  %v10113_v0 = vld [vmem:[#allocation60_spill] sm:$0xff] }
 0x217   : > { %v2232_v35 = vadd.f32 %v2231_v27, %v10076_v51  ;;  %v1750_v13 = vadd.f32 %v1749_v50, %v10078_v40  ;;  %v10082_v53 = vunpack.c.h.bf16 %v10080_v42  ;;  %v10084_v63 = vunpack.c.l.bf16 %v10083_v24  ;;  %v10116_v42 = vld [vmem:[#allocation110_spill] sm:$0xff] }
 0x218   : > { %v1819_v21 = vadd.f32 %v1818_v44, %v10079_v1  ;;  %v1888_v14 = vadd.f32 %v1887_v33, %v10081_v59  ;;  %v10085_v29 = vunpack.c.h.bf16 %v10083_v24  ;;  %v10087_v47 = vunpack.c.l.bf16 %v10086_v25  ;;  %v10119_v24 = vld [vmem:[#allocation163_spill] sm:$0xff] }
 0x219   : > { %v1957_v43 = vadd.f32 %v1956_v36, %v10082_v53  ;;  %v2026_v45 = vadd.f32 %v2025_v15, %v10084_v63  ;;  %v10088_v61 = vunpack.c.h.bf16 %v10086_v25  ;;  %v10090_v48 = vunpack.c.l.bf16 %v10089_v11  ;;  %v10122_v25 = vld [vmem:[#allocation216_spill] sm:$0xff] }
 0x21a   : > { %v2095_v5 = vadd.f32 %v2094_v19, %v10085_v29  ;;  %v2164_v39 = vadd.f32 %v2163_v16, %v10087_v47  ;;  %v10091_v4 = vunpack.c.h.bf16 %v10089_v11  ;;  %v10093_v8 = vunpack.c.l.bf16 %v10092_v49  ;;  %v10125_v11 = vld [vmem:[#allocation61_spill] sm:$0xff] }
 0x21b   : > { %v2233_v6 = vadd.f32 %v2232_v35, %v10088_v61  ;;  %v1751_v2 = vadd.f32 %v1750_v13, %v10090_v48  ;;  %v10094_v46 = vunpack.c.h.bf16 %v10092_v49  ;;  %v10096_v30 = vunpack.c.l.bf16 %v10095_v34  ;;  %v10128_v49 = vld [vmem:[#allocation111_spill] sm:$0xff] }
 0x21c   : > { %v1820_v41 = vadd.f32 %v1819_v21, %v10091_v4  ;;  %v1889_v60 = vadd.f32 %v1888_v14, %v10093_v8  ;;  %v10097_v22 = vunpack.c.h.bf16 %v10095_v34  ;;  %v10099_v31 = vunpack.c.l.bf16 %v10098_v62  ;;  %v10131_v34 = vld [vmem:[#allocation164_spill] sm:$0xff] }
 0x21d   : > { %v1958_v18 = vadd.f32 %v1957_v43, %v10094_v46  ;;  %v2027_v7 = vadd.f32 %v2026_v45, %v10096_v30  ;;  %v10100_v10 = vunpack.c.h.bf16 %v10098_v62  ;;  %v10102_v17 = vunpack.c.l.bf16 %v10101_v54  ;;  %v10134_v62 = vld [vmem:[#allocation217_spill] sm:$0xff] }
 0x21e   : > { %v2096_v32 = vadd.f32 %v2095_v5, %v10097_v22  ;;  %v2165_v26 = vadd.f32 %v2164_v39, %v10099_v31  ;;  %v10103_v28 = vunpack.c.h.bf16 %v10101_v54  ;;  %v10105_v55 = vunpack.c.l.bf16 %v10104_v23  ;;  %v10137_v54 = vld [vmem:[#allocation62_spill] sm:$0xff] }
 0x21f   : > { %v2234_v27 = vadd.f32 %v2233_v6, %v10100_v10  ;;  %v1752_v50 = vadd.f32 %v1751_v2, %v10102_v17  ;;  %v10106_v12 = vunpack.c.h.bf16 %v10104_v23  ;;  %v10108_v56 = vunpack.c.l.bf16 %v10107_v9  ;;  %v10140_v23 = vld [vmem:[#allocation112_spill] sm:$0xff] }
 0x220   : > { %v1821_v44 = vadd.f32 %v1820_v41, %v10103_v28  ;;  %v1890_v33 = vadd.f32 %v1889_v60, %v10105_v55  ;;  %v10109_v37 = vunpack.c.h.bf16 %v10107_v9  ;;  %v10111_v58 = vunpack.c.l.bf16 %v10110_v3  ;;  %v10143_v9 = vld [vmem:[#allocation165_spill] sm:$0xff] }
 0x221   : > { %v1959_v36 = vadd.f32 %v1958_v18, %v10106_v12  ;;  %v2028_v15 = vadd.f32 %v2027_v7, %v10108_v56  ;;  %v10112_v51 = vunpack.c.h.bf16 %v10110_v3  ;;  %v10114_v40 = vunpack.c.l.bf16 %v10113_v0  ;;  %v10146_v3 = vld [vmem:[#allocation218_spill] sm:$0xff] }
 0x222   : > { %v2097_v19 = vadd.f32 %v2096_v32, %v10109_v37  ;;  %v2166_v16 = vadd.f32 %v2165_v26, %v10111_v58  ;;  %v10115_v1 = vunpack.c.h.bf16 %v10113_v0  ;;  %v10117_v59 = vunpack.c.l.bf16 %v10116_v42 }
 0x223   : > { %v2235_v35 = vadd.f32 %v2234_v27, %v10112_v51  ;;  %v1753_v13 = vadd.f32 %v1752_v50, %v10114_v40  ;;  %v10118_v53 = vunpack.c.h.bf16 %v10116_v42  ;;  %v10120_v63 = vunpack.c.l.bf16 %v10119_v24 }
 0x224   : > { %v1822_v21 = vadd.f32 %v1821_v44, %v10115_v1  ;;  %v1891_v14 = vadd.f32 %v1890_v33, %v10117_v59  ;;  %v10121_v29 = vunpack.c.h.bf16 %v10119_v24  ;;  %v10123_v47 = vunpack.c.l.bf16 %v10122_v25 }
 0x225   : > { %v1960_v43 = vadd.f32 %v1959_v36, %v10118_v53  ;;  %v2029_v45 = vadd.f32 %v2028_v15, %v10120_v63  ;;  %v10124_v61 = vunpack.c.h.bf16 %v10122_v25  ;;  %v10126_v48 = vunpack.c.l.bf16 %v10125_v11 }
 0x226   : > { %v2098_v5 = vadd.f32 %v2097_v19, %v10121_v29  ;;  %v2167_v39 = vadd.f32 %v2166_v16, %v10123_v47  ;;  %v10127_v4 = vunpack.c.h.bf16 %v10125_v11  ;;  %v10129_v8 = vunpack.c.l.bf16 %v10128_v49 }
 0x227   : > { %v2236_v6 = vadd.f32 %v2235_v35, %v10124_v61  ;;  %v1754_v2 = vadd.f32 %v1753_v13, %v10126_v48  ;;  %v10130_v46 = vunpack.c.h.bf16 %v10128_v49  ;;  %v10132_v30 = vunpack.c.l.bf16 %v10131_v34 }
 0x228   : > { %v1823_v41 = vadd.f32 %v1822_v21, %v10127_v4  ;;  %v1892_v60 = vadd.f32 %v1891_v14, %v10129_v8  ;;  %v10133_v22 = vunpack.c.h.bf16 %v10131_v34  ;;  %v10135_v31 = vunpack.c.l.bf16 %v10134_v62 }
 0x229   : > { %v1961_v18 = vadd.f32 %v1960_v43, %v10130_v46  ;;  %v2030_v7 = vadd.f32 %v2029_v45, %v10132_v30  ;;  %v10136_v10 = vunpack.c.h.bf16 %v10134_v62  ;;  %v10138_v17 = vunpack.c.l.bf16 %v10137_v54 }
 0x22a   : > { %v2099_v32 = vadd.f32 %v2098_v5, %v10133_v22  ;;  %v2168_v26 = vadd.f32 %v2167_v39, %v10135_v31  ;;  %v10139_v28 = vunpack.c.h.bf16 %v10137_v54  ;;  %v10141_v55 = vunpack.c.l.bf16 %v10140_v23 }
 0x22b   : > { %v2237_v27 = vadd.f32 %v2236_v6, %v10136_v10  ;;  %v1755_v50 = vadd.f32 %v1754_v2, %v10138_v17  ;;  %v10142_v12 = vunpack.c.h.bf16 %v10140_v23  ;;  %v10144_v56 = vunpack.c.l.bf16 %v10143_v9 }
 0x22c   : > { %v1824_v44 = vadd.f32 %v1823_v41, %v10139_v28  ;;  %v1893_v33 = vadd.f32 %v1892_v60, %v10141_v55  ;;  %v10145_v37 = vunpack.c.h.bf16 %v10143_v9  ;;  %v10147_v58 = vunpack.c.l.bf16 %v10146_v3  ;;  %v10151_v9 = vld [vmem:[#allocation220_spill] sm:$0xff] }
 0x22d   : > { %v1962_v36 = vadd.f32 %v1961_v18, %v10142_v12  ;;  %v2031_v15 = vadd.f32 %v2030_v7, %v10144_v56  ;;  %v10148_v51 = vunpack.c.h.bf16 %v10146_v3  ;;  %v1756_v0 = vrot.slane %v1755_v50, 4  ;;  %v10149_v12 = vld [vmem:[#allocation219_spill] sm:$0xff] }
 0x22e   : > { %v2100_v19 = vadd.f32 %v2099_v32, %v10145_v37  ;;  %v2169_v16 = vadd.f32 %v2168_v26, %v10147_v58  ;;  %v1825_v40 = vrot.slane %v1824_v44, 4  ;;  %v1894_v13 = vrot.slane %v1893_v33, 4  ;;  %v10155_v58 = vld [vmem:[#allocation283_spill] sm:$0xff] }
 0x22f   : > { %v2238_v35 = vadd.f32 %v2237_v27, %v10148_v51  ;;  %v1963_v1 = vrot.slane %v1962_v36, 4  ;;  %v2032_v21 = vrot.slane %v2031_v15, 4  ;;  %v1757_v53 = vadd.f32 %v1756_v0, %v1755_v50  ;;  %v10157_v51 = vld [vmem:[#allocation284_spill] sm:$0xff] }
 0x230   : > { %v2101_v42 = vrot.slane %v2100_v19, 4  ;;  %v2170_v59 = vrot.slane %v2169_v16, 4  ;;  %v1826_v43 = vadd.f32 %v1825_v40, %v1824_v44  ;;  %v1895_v24 = vadd.f32 %v1894_v13, %v1893_v33 }
 0x231   : > { %v2239_v14 = vrot.slane %v2238_v35, 4  ;;  %v1964_v63 = vadd.f32 %v1963_v1, %v1962_v36  ;;  %v2033_v45 = vadd.f32 %v2032_v21, %v2031_v15  ;;  %v1758_v47 = vrot.slane %v1757_v53, 2  ;;  %v10161_v21 = vld [vmem:[#allocation347_spill] sm:$0xff] }
 0x232   : > { %v2102_v29 = vadd.f32 %v2101_v42, %v2100_v19  ;;  %v2171_v5 = vadd.f32 %v2170_v59, %v2169_v16  ;;  %v1827_v39 = vrot.slane %v1826_v43, 2  ;;  %v1896_v61 = vrot.slane %v1895_v24, 2  ;;  %v10163_v59 = vld [vmem:[#allocation348_spill] sm:$0xff] }
 0x233   : > { %v2240_v25 = vadd.f32 %v2239_v14, %v2238_v35  ;;  %v1965_v6 = vrot.slane %v1964_v63, 2  ;;  %v2034_v11 = vrot.slane %v2033_v45, 2  ;;  %v1759_v41 = vadd.f32 %v1758_v47, %v1757_v53 }
 0x234   : > { %v2103_v48 = vrot.slane %v2102_v29, 2  ;;  %v2172_v2 = vrot.slane %v2171_v5, 2  ;;  %v1828_v49 = vadd.f32 %v1827_v39, %v1826_v43  ;;  %v1897_v8 = vadd.f32 %v1896_v61, %v1895_v24 }
 0x235   : > { %v2241_v4 = vrot.slane %v2240_v25, 2  ;;  %v1966_v60 = vadd.f32 %v1965_v6, %v1964_v63  ;;  %v2035_v46 = vadd.f32 %v2034_v11, %v2033_v45  ;;  %v1760_v7 = vrot.slane %v1759_v41, 1  ;;  %v10167_v45 = vld [vmem:[#allocation411_spill] sm:$0xff]  ;;  %v10173_v11 = vld [vmem:[#allocation221_spill] sm:$0xff] }
 0x236   : > { %v2104_v18 = vadd.f32 %v2103_v48, %v2102_v29  ;;  %v2173_v34 = vadd.f32 %v2172_v2, %v2171_v5  ;;  %v1829_v22 = vrot.slane %v1828_v49, 1  ;;  %v1898_v32 = vrot.slane %v1897_v8, 1  ;;  %v10169_v5 = vld [vmem:[#allocation412_spill] sm:$0xff] }
 0x237   : > { %v2242_v30 = vadd.f32 %v2241_v4, %v2240_v25  ;;  %v1967_v62 = vrot.slane %v1966_v60, 1  ;;  %v2036_v31 = vrot.slane %v2035_v46, 1  ;;  %v6925_v54 = vadd.f32 %v1760_v7, %v1759_v41 }
 0x238   : > { %v2105_v26 = vrot.slane %v2104_v18, 1  ;;  %v2174_v10 = vrot.slane %v2173_v34, 1  ;;  %v6927_v17 = vadd.f32 %v1829_v22, %v1828_v49  ;;  %v6929_v50 = vadd.f32 %v1898_v32, %v1897_v8  ;;  %v10176_v49 = vld [vmem:[#allocation285_spill] sm:$0xff] }
 0x239   : > { %v2243_v27 = vrot.slane %v2242_v30, 1  ;;  %v6931_v28 = vadd.f32 %v1967_v62, %v1966_v60  ;;  %v6933_v44 = vadd.f32 %v2036_v31, %v2035_v46  ;;  %v10150_v36 = vunpack.c.l.bf16 %v10149_v12  ;;  %v10182_v62 = vld [vmem:[#allocation413_spill] sm:$0xff] }
 0x23a   : > { %v6935_v23 = vadd.f32 %v2105_v26, %v2104_v18  ;;  %v6937_v55 = vadd.f32 %v2174_v10, %v2173_v34  ;;  %v10152_v56 = vunpack.c.l.bf16 %v10151_v9  ;;  %v10153_v37 = vunpack.c.h.bf16 %v10149_v12  ;;  %v10179_v34 = vld [vmem:[#allocation349_spill] sm:$0xff]  ;;  %v10185_v12 = vld [vmem:[#allocation222_spill] sm:$0xff] }
 0x23b   : > { %v6939_v33 = vadd.f32 %v2243_v27, %v2242_v30  ;;  %v10154_v19 = vunpack.c.h.bf16 %v10151_v9  ;;  %v10156_v16 = vunpack.c.l.bf16 %v10155_v58  ;;  %v10158_v35 = vunpack.c.l.bf16 %v10157_v51 }
 0x23c   : > { %v2245_v15 = vadd.f32 %v10152_v56, %v10150_v36  ;;  %v10159_v40 = vunpack.c.h.bf16 %v10155_v58  ;;  %v10160_v13 = vunpack.c.h.bf16 %v10157_v51  ;;  %v10162_v42 = vunpack.c.l.bf16 %v10161_v21  ;;  %v10191_v51 = vld [vmem:[#allocation350_spill] sm:$0xff] }
 0x23d   : > { %v2314_v3 = vadd.f32 %v10154_v19, %v10153_v37  ;;  %v2383_v0 = vadd.f32 %v10158_v35, %v10156_v16  ;;  %v10164_v14 = vunpack.c.l.bf16 %v10163_v59  ;;  %v10165_v43 = vunpack.c.h.bf16 %v10161_v21  ;;  %v10188_v37 = vld [vmem:[#allocation286_spill] sm:$0xff] }
 0x23e   : > { %v2452_v1 = vadd.f32 %v10160_v13, %v10159_v40  ;;  %v10166_v24 = vunpack.c.h.bf16 %v10163_v59  ;;  %v10168_v29 = vunpack.c.l.bf16 %v10167_v45  ;;  %v10170_v25 = vunpack.c.l.bf16 %v10169_v5 }
 0x23f   : > { %v2521_v53 = vadd.f32 %v10164_v14, %v10162_v42  ;;  %v10171_v39 = vunpack.c.h.bf16 %v10167_v45  ;;  %v10172_v61 = vunpack.c.h.bf16 %v10169_v5  ;;  %v10174_v48 = vunpack.c.l.bf16 %v10173_v11 }
 0x240   : > { %v2590_v63 = vadd.f32 %v10166_v24, %v10165_v43  ;;  %v2659_v47 = vadd.f32 %v10170_v25, %v10168_v29  ;;  %v10175_v4 = vunpack.c.h.bf16 %v10173_v11  ;;  %v10177_v8 = vunpack.c.l.bf16 %v10176_v49  ;;  %v10200_v29 = vld [vmem:[#allocation287_spill] sm:$0xff] }
 0x241   : > { %v2728_v6 = vadd.f32 %v10172_v61, %v10171_v39  ;;  %v2246_v2 = vadd.f32 %v2245_v15, %v10174_v48  ;;  %v10178_v46 = vunpack.c.h.bf16 %v10176_v49  ;;  %v10180_v30 = vunpack.c.l.bf16 %v10179_v34  ;;  %v10203_v61 = vld [vmem:[#allocation351_spill] sm:$0xff] }
 0x242   : > { %v2315_v41 = vadd.f32 %v2314_v3, %v10175_v4  ;;  %v2384_v60 = vadd.f32 %v2383_v0, %v10177_v8  ;;  %v10181_v22 = vunpack.c.h.bf16 %v10179_v34  ;;  %v10183_v31 = vunpack.c.l.bf16 %v10182_v62  ;;  %v10206_v4 = vld [vmem:[#allocation415_spill] sm:$0xff] }
 0x243   : > { %v2453_v18 = vadd.f32 %v2452_v1, %v10178_v46  ;;  %v2522_v7 = vadd.f32 %v2521_v53, %v10180_v30  ;;  %v10184_v10 = vunpack.c.h.bf16 %v10182_v62  ;;  %v10186_v36 = vunpack.c.l.bf16 %v10185_v12  ;;  %v10194_v1 = vld [vmem:[#allocation414_spill] sm:$0xff]  ;;  %v10197_v53 = vld [vmem:[#allocation223_spill] sm:$0xff]  ;;  %v10209_v46 = vld [vmem:[#allocation224_spill] sm:$0xff] }
 0x244   : > { %v2591_v32 = vadd.f32 %v2590_v63, %v10181_v22  ;;  %v2660_v26 = vadd.f32 %v2659_v47, %v10183_v31  ;;  %v10187_v56 = vunpack.c.h.bf16 %v10185_v12  ;;  %v10189_v19 = vunpack.c.l.bf16 %v10188_v37  ;;  %v10212_v22 = vld [vmem:[#allocation288_spill] sm:$0xff] }
 0x245   : > { %v2729_v27 = vadd.f32 %v2728_v6, %v10184_v10  ;;  %v2247_v9 = vadd.f32 %v2246_v2, %v10186_v36  ;;  %v10190_v58 = vunpack.c.h.bf16 %v10188_v37  ;;  %v10192_v35 = vunpack.c.l.bf16 %v10191_v51  ;;  %v10215_v10 = vld [vmem:[#allocation352_spill] sm:$0xff] }
 0x246   : > { %v2316_v15 = vadd.f32 %v2315_v41, %v10187_v56  ;;  %v2385_v3 = vadd.f32 %v2384_v60, %v10189_v19  ;;  %v10193_v40 = vunpack.c.h.bf16 %v10191_v51  ;;  %v10195_v21 = vunpack.c.l.bf16 %v10194_v1  ;;  %v10218_v56 = vld [vmem:[#allocation416_spill] sm:$0xff] }
 0x247   : > { %v2454_v16 = vadd.f32 %v2453_v18, %v10190_v58  ;;  %v2523_v0 = vadd.f32 %v2522_v7, %v10192_v35  ;;  %v10196_v59 = vunpack.c.h.bf16 %v10194_v1  ;;  %v10198_v43 = vunpack.c.l.bf16 %v10197_v53  ;;  %v10221_v58 = vld [vmem:[#allocation225_spill] sm:$0xff] }
 0x248   : > { %v2592_v13 = vadd.f32 %v2591_v32, %v10193_v40  ;;  %v2661_v42 = vadd.f32 %v2660_v26, %v10195_v21  ;;  %v10199_v63 = vunpack.c.h.bf16 %v10197_v53  ;;  %v10201_v5 = vunpack.c.l.bf16 %v10200_v29  ;;  %v10224_v40 = vld [vmem:[#allocation289_spill] sm:$0xff] }
 0x249   : > { %v2730_v14 = vadd.f32 %v2729_v27, %v10196_v59  ;;  %v2248_v24 = vadd.f32 %v2247_v9, %v10198_v43  ;;  %v10202_v47 = vunpack.c.h.bf16 %v10200_v29  ;;  %v10204_v6 = vunpack.c.l.bf16 %v10203_v61  ;;  %v10227_v59 = vld [vmem:[#allocation353_spill] sm:$0xff] }
 0x24a   : > { %v2317_v45 = vadd.f32 %v2316_v15, %v10199_v63  ;;  %v2386_v25 = vadd.f32 %v2385_v3, %v10201_v5  ;;  %v10205_v48 = vunpack.c.h.bf16 %v10203_v61  ;;  %v10207_v41 = vunpack.c.l.bf16 %v10206_v4  ;;  %v10230_v63 = vld [vmem:[#allocation417_spill] sm:$0xff] }
 0x24b   : > { %v2455_v39 = vadd.f32 %v2454_v16, %v10202_v47  ;;  %v2524_v11 = vadd.f32 %v2523_v0, %v10204_v6  ;;  %v10208_v8 = vunpack.c.h.bf16 %v10206_v4  ;;  %v10210_v18 = vunpack.c.l.bf16 %v10209_v46  ;;  %v10233_v47 = vld [vmem:[#allocation226_spill] sm:$0xff] }
 0x24c   : > { %v2593_v2 = vadd.f32 %v2592_v13, %v10205_v48  ;;  %v2662_v49 = vadd.f32 %v2661_v42, %v10207_v41  ;;  %v10211_v30 = vunpack.c.h.bf16 %v10209_v46  ;;  %v10213_v32 = vunpack.c.l.bf16 %v10212_v22  ;;  %v10236_v48 = vld [vmem:[#allocation290_spill] sm:$0xff] }
 0x24d   : > { %v2731_v60 = vadd.f32 %v2730_v14, %v10208_v8  ;;  %v2249_v34 = vadd.f32 %v2248_v24, %v10210_v18  ;;  %v10214_v31 = vunpack.c.h.bf16 %v10212_v22  ;;  %v10216_v27 = vunpack.c.l.bf16 %v10215_v10  ;;  %v10239_v8 = vld [vmem:[#allocation354_spill] sm:$0xff] }
 0x24e   : > { %v2318_v7 = vadd.f32 %v2317_v45, %v10211_v30  ;;  %v2387_v62 = vadd.f32 %v2386_v25, %v10213_v32  ;;  %v10217_v36 = vunpack.c.h.bf16 %v10215_v10  ;;  %v10219_v15 = vunpack.c.l.bf16 %v10218_v56  ;;  %v10242_v30 = vld [vmem:[#allocation418_spill] sm:$0xff] }
 0x24f   : > { %v2456_v26 = vadd.f32 %v2455_v39, %v10214_v31  ;;  %v2525_v12 = vadd.f32 %v2524_v11, %v10216_v27  ;;  %v10220_v19 = vunpack.c.h.bf16 %v10218_v56  ;;  %v10222_v16 = vunpack.c.l.bf16 %v10221_v58  ;;  %v10245_v31 = vld [vmem:[#allocation227_spill] sm:$0xff] }
 0x250   : > { %v2594_v9 = vadd.f32 %v2593_v2, %v10217_v36  ;;  %v2663_v37 = vadd.f32 %v2662_v49, %v10219_v15  ;;  %v10223_v35 = vunpack.c.h.bf16 %v10221_v58  ;;  %v10225_v13 = vunpack.c.l.bf16 %v10224_v40  ;;  %v10248_v36 = vld [vmem:[#allocation291_spill] sm:$0xff] }
 0x251   : > { %v2732_v3 = vadd.f32 %v2731_v60, %v10220_v19  ;;  %v2250_v51 = vadd.f32 %v2249_v34, %v10222_v16  ;;  %v10226_v21 = vunpack.c.h.bf16 %v10224_v40  ;;  %v10228_v14 = vunpack.c.l.bf16 %v10227_v59  ;;  %v10251_v19 = vld [vmem:[#allocation355_spill] sm:$0xff] }
 0x252   : > { %v2319_v0 = vadd.f32 %v2318_v7, %v10223_v35  ;;  %v2388_v1 = vadd.f32 %v2387_v62, %v10225_v13  ;;  %v10229_v43 = vunpack.c.h.bf16 %v10227_v59  ;;  %v10231_v45 = vunpack.c.l.bf16 %v10230_v63  ;;  %v10254_v35 = vld [vmem:[#allocation419_spill] sm:$0xff] }
 0x253   : > { %v2457_v42 = vadd.f32 %v2456_v26, %v10226_v21  ;;  %v2526_v53 = vadd.f32 %v2525_v12, %v10228_v14  ;;  %v10232_v5 = vunpack.c.h.bf16 %v10230_v63  ;;  %v10234_v39 = vunpack.c.l.bf16 %v10233_v47  ;;  %v10257_v21 = vld [vmem:[#allocation228_spill] sm:$0xff] }
 0x254   : > { %v2595_v24 = vadd.f32 %v2594_v9, %v10229_v43  ;;  %v2664_v29 = vadd.f32 %v2663_v37, %v10231_v45  ;;  %v10235_v6 = vunpack.c.h.bf16 %v10233_v47  ;;  %v10237_v2 = vunpack.c.l.bf16 %v10236_v48  ;;  %v10260_v43 = vld [vmem:[#allocation292_spill] sm:$0xff] }
 0x255   : > { %v2733_v25 = vadd.f32 %v2732_v3, %v10232_v5  ;;  %v2251_v61 = vadd.f32 %v2250_v51, %v10234_v39  ;;  %v10238_v41 = vunpack.c.h.bf16 %v10236_v48  ;;  %v10240_v60 = vunpack.c.l.bf16 %v10239_v8  ;;  %v10263_v5 = vld [vmem:[#allocation356_spill] sm:$0xff] }
 0x256   : > { %v2320_v11 = vadd.f32 %v2319_v0, %v10235_v6  ;;  %v2389_v4 = vadd.f32 %v2388_v1, %v10237_v2  ;;  %v10241_v18 = vunpack.c.h.bf16 %v10239_v8  ;;  %v10243_v7 = vunpack.c.l.bf16 %v10242_v30  ;;  %v10266_v6 = vld [vmem:[#allocation420_spill] sm:$0xff] }
 0x257   : > { %v2458_v49 = vadd.f32 %v2457_v42, %v10238_v41  ;;  %v2527_v46 = vadd.f32 %v2526_v53, %v10240_v60  ;;  %v10244_v32 = vunpack.c.h.bf16 %v10242_v30  ;;  %v10246_v26 = vunpack.c.l.bf16 %v10245_v31  ;;  %v10269_v41 = vld [vmem:[#allocation229_spill] sm:$0xff] }
 0x258   : > { %v2596_v34 = vadd.f32 %v2595_v24, %v10241_v18  ;;  %v2665_v22 = vadd.f32 %v2664_v29, %v10243_v7  ;;  %v10247_v27 = vunpack.c.h.bf16 %v10245_v31  ;;  %v10249_v9 = vunpack.c.l.bf16 %v10248_v36  ;;  %v10272_v18 = vld [vmem:[#allocation293_spill] sm:$0xff] }
 0x259   : > { %v2734_v62 = vadd.f32 %v2733_v25, %v10244_v32  ;;  %v2252_v10 = vadd.f32 %v2251_v61, %v10246_v26  ;;  %v10250_v15 = vunpack.c.h.bf16 %v10248_v36  ;;  %v10252_v3 = vunpack.c.l.bf16 %v10251_v19  ;;  %v10275_v32 = vld [vmem:[#allocation357_spill] sm:$0xff] }
 0x25a   : > { %v2321_v12 = vadd.f32 %v2320_v11, %v10247_v27  ;;  %v2390_v56 = vadd.f32 %v2389_v4, %v10249_v9  ;;  %v10253_v16 = vunpack.c.h.bf16 %v10251_v19  ;;  %v10255_v0 = vunpack.c.l.bf16 %v10254_v35  ;;  %v10278_v27 = vld [vmem:[#allocation421_spill] sm:$0xff] }
 0x25b   : > { %v2459_v37 = vadd.f32 %v2458_v49, %v10250_v15  ;;  %v2528_v58 = vadd.f32 %v2527_v46, %v10252_v3  ;;  %v10256_v13 = vunpack.c.h.bf16 %v10254_v35  ;;  %v10258_v42 = vunpack.c.l.bf16 %v10257_v21  ;;  %v10281_v15 = vld [vmem:[#allocation230_spill] sm:$0xff] }
 0x25c   : > { %v2597_v51 = vadd.f32 %v2596_v34, %v10253_v16  ;;  %v2666_v40 = vadd.f32 %v2665_v22, %v10255_v0  ;;  %v10259_v14 = vunpack.c.h.bf16 %v10257_v21  ;;  %v10261_v24 = vunpack.c.l.bf16 %v10260_v43  ;;  %v10284_v16 = vld [vmem:[#allocation294_spill] sm:$0xff] }
 0x25d   : > { %v2735_v1 = vadd.f32 %v2734_v62, %v10256_v13  ;;  %v2253_v59 = vadd.f32 %v2252_v10, %v10258_v42  ;;  %v10262_v45 = vunpack.c.h.bf16 %v10260_v43  ;;  %v10264_v25 = vunpack.c.l.bf16 %v10263_v5  ;;  %v10287_v13 = vld [vmem:[#allocation358_spill] sm:$0xff] }
 0x25e   : > { %v2322_v53 = vadd.f32 %v2321_v12, %v10259_v14  ;;  %v2391_v63 = vadd.f32 %v2390_v56, %v10261_v24  ;;  %v10265_v39 = vunpack.c.h.bf16 %v10263_v5  ;;  %v10267_v11 = vunpack.c.l.bf16 %v10266_v6  ;;  %v10290_v14 = vld [vmem:[#allocation422_spill] sm:$0xff] }
 0x25f   : > { %v2460_v29 = vadd.f32 %v2459_v37, %v10262_v45  ;;  %v2529_v47 = vadd.f32 %v2528_v58, %v10264_v25  ;;  %v10268_v2 = vunpack.c.h.bf16 %v10266_v6  ;;  %v10270_v49 = vunpack.c.l.bf16 %v10269_v41  ;;  %v10293_v45 = vld [vmem:[#allocation231_spill] sm:$0xff] }
 0x260   : > { %v2598_v61 = vadd.f32 %v2597_v51, %v10265_v39  ;;  %v2667_v48 = vadd.f32 %v2666_v40, %v10267_v11  ;;  %v10271_v60 = vunpack.c.h.bf16 %v10269_v41  ;;  %v10273_v34 = vunpack.c.l.bf16 %v10272_v18  ;;  %v10296_v39 = vld [vmem:[#allocation295_spill] sm:$0xff] }
 0x261   : > { %v2736_v4 = vadd.f32 %v2735_v1, %v10268_v2  ;;  %v2254_v8 = vadd.f32 %v2253_v59, %v10270_v49  ;;  %v10274_v7 = vunpack.c.h.bf16 %v10272_v18  ;;  %v10276_v62 = vunpack.c.l.bf16 %v10275_v32  ;;  %v10299_v2 = vld [vmem:[#allocation359_spill] sm:$0xff] }
 0x262   : > { %v2323_v46 = vadd.f32 %v2322_v53, %v10271_v60  ;;  %v2392_v30 = vadd.f32 %v2391_v63, %v10273_v34  ;;  %v10277_v26 = vunpack.c.h.bf16 %v10275_v32  ;;  %v10279_v12 = vunpack.c.l.bf16 %v10278_v27  ;;  %v10302_v60 = vld [vmem:[#allocation423_spill] sm:$0xff] }
 0x263   : > { %v2461_v22 = vadd.f32 %v2460_v29, %v10274_v7  ;;  %v2530_v31 = vadd.f32 %v2529_v47, %v10276_v62  ;;  %v10280_v9 = vunpack.c.h.bf16 %v10278_v27  ;;  %v10282_v37 = vunpack.c.l.bf16 %v10281_v15  ;;  %v10305_v7 = vld [vmem:[#allocation232_spill] sm:$0xff] }
 0x264   : > { %v2599_v10 = vadd.f32 %v2598_v61, %v10277_v26  ;;  %v2668_v36 = vadd.f32 %v2667_v48, %v10279_v12  ;;  %v10283_v3 = vunpack.c.h.bf16 %v10281_v15  ;;  %v10285_v51 = vunpack.c.l.bf16 %v10284_v16  ;;  %v10308_v26 = vld [vmem:[#allocation296_spill] sm:$0xff] }
 0x265   : > { %v2737_v56 = vadd.f32 %v2736_v4, %v10280_v9  ;;  %v2255_v19 = vadd.f32 %v2254_v8, %v10282_v37  ;;  %v10286_v0 = vunpack.c.h.bf16 %v10284_v16  ;;  %v10288_v1 = vunpack.c.l.bf16 %v10287_v13  ;;  %v10311_v9 = vld [vmem:[#allocation360_spill] sm:$0xff] }
 0x266   : > { %v2324_v58 = vadd.f32 %v2323_v46, %v10283_v3  ;;  %v2393_v35 = vadd.f32 %v2392_v30, %v10285_v51  ;;  %v10289_v42 = vunpack.c.h.bf16 %v10287_v13  ;;  %v10291_v53 = vunpack.c.l.bf16 %v10290_v14  ;;  %v10314_v3 = vld [vmem:[#allocation424_spill] sm:$0xff] }
 0x267   : > { %v2462_v40 = vadd.f32 %v2461_v22, %v10286_v0  ;;  %v2531_v21 = vadd.f32 %v2530_v31, %v10288_v1  ;;  %v10292_v24 = vunpack.c.h.bf16 %v10290_v14  ;;  %v10294_v29 = vunpack.c.l.bf16 %v10293_v45  ;;  %v10317_v0 = vld [vmem:[#allocation233_spill] sm:$0xff] }
 0x268   : > { %v2600_v59 = vadd.f32 %v2599_v10, %v10289_v42  ;;  %v2669_v43 = vadd.f32 %v2668_v36, %v10291_v53  ;;  %v10295_v25 = vunpack.c.h.bf16 %v10293_v45  ;;  %v10297_v61 = vunpack.c.l.bf16 %v10296_v39  ;;  %v10320_v42 = vld [vmem:[#allocation297_spill] sm:$0xff] }
 0x269   : > { %v2738_v63 = vadd.f32 %v2737_v56, %v10292_v24  ;;  %v2256_v5 = vadd.f32 %v2255_v19, %v10294_v29  ;;  %v10298_v11 = vunpack.c.h.bf16 %v10296_v39  ;;  %v10300_v4 = vunpack.c.l.bf16 %v10299_v2  ;;  %v10323_v24 = vld [vmem:[#allocation361_spill] sm:$0xff] }
 0x26a   : > { %v2325_v47 = vadd.f32 %v2324_v58, %v10295_v25  ;;  %v2394_v6 = vadd.f32 %v2393_v35, %v10297_v61  ;;  %v10301_v49 = vunpack.c.h.bf16 %v10299_v2  ;;  %v10303_v46 = vunpack.c.l.bf16 %v10302_v60  ;;  %v10326_v25 = vld [vmem:[#allocation425_spill] sm:$0xff] }
 0x26b   : > { %v2463_v48 = vadd.f32 %v2462_v40, %v10298_v11  ;;  %v2532_v41 = vadd.f32 %v2531_v21, %v10300_v4  ;;  %v10304_v34 = vunpack.c.h.bf16 %v10302_v60  ;;  %v10306_v22 = vunpack.c.l.bf16 %v10305_v7  ;;  %v10329_v11 = vld [vmem:[#allocation234_spill] sm:$0xff] }
 0x26c   : > { %v2601_v8 = vadd.f32 %v2600_v59, %v10301_v49  ;;  %v2670_v18 = vadd.f32 %v2669_v43, %v10303_v46  ;;  %v10307_v62 = vunpack.c.h.bf16 %v10305_v7  ;;  %v10309_v10 = vunpack.c.l.bf16 %v10308_v26  ;;  %v10332_v49 = vld [vmem:[#allocation298_spill] sm:$0xff] }
 0x26d   : > { %v2739_v30 = vadd.f32 %v2738_v63, %v10304_v34  ;;  %v2257_v32 = vadd.f32 %v2256_v5, %v10306_v22  ;;  %v10310_v12 = vunpack.c.h.bf16 %v10308_v26  ;;  %v10312_v56 = vunpack.c.l.bf16 %v10311_v9  ;;  %v10335_v34 = vld [vmem:[#allocation362_spill] sm:$0xff] }
 0x26e   : > { %v2326_v31 = vadd.f32 %v2325_v47, %v10307_v62  ;;  %v2395_v27 = vadd.f32 %v2394_v6, %v10309_v10  ;;  %v10313_v37 = vunpack.c.h.bf16 %v10311_v9  ;;  %v10315_v58 = vunpack.c.l.bf16 %v10314_v3  ;;  %v10338_v62 = vld [vmem:[#allocation426_spill] sm:$0xff] }
 0x26f   : > { %v2464_v36 = vadd.f32 %v2463_v48, %v10310_v12  ;;  %v2533_v15 = vadd.f32 %v2532_v41, %v10312_v56  ;;  %v10316_v51 = vunpack.c.h.bf16 %v10314_v3  ;;  %v10318_v40 = vunpack.c.l.bf16 %v10317_v0  ;;  %v10341_v12 = vld [vmem:[#allocation235_spill] sm:$0xff] }
 0x270   : > { %v2602_v19 = vadd.f32 %v2601_v8, %v10313_v37  ;;  %v2671_v16 = vadd.f32 %v2670_v18, %v10315_v58  ;;  %v10319_v1 = vunpack.c.h.bf16 %v10317_v0  ;;  %v10321_v59 = vunpack.c.l.bf16 %v10320_v42  ;;  %v10344_v37 = vld [vmem:[#allocation299_spill] sm:$0xff] }
 0x271   : > { %v2740_v35 = vadd.f32 %v2739_v30, %v10316_v51  ;;  %v2258_v13 = vadd.f32 %v2257_v32, %v10318_v40  ;;  %v10322_v53 = vunpack.c.h.bf16 %v10320_v42  ;;  %v10324_v63 = vunpack.c.l.bf16 %v10323_v24  ;;  %v10347_v51 = vld [vmem:[#allocation363_spill] sm:$0xff] }
 0x272   : > { %v2327_v21 = vadd.f32 %v2326_v31, %v10319_v1  ;;  %v2396_v14 = vadd.f32 %v2395_v27, %v10321_v59  ;;  %v10325_v29 = vunpack.c.h.bf16 %v10323_v24  ;;  %v10327_v47 = vunpack.c.l.bf16 %v10326_v25  ;;  %v10350_v1 = vld [vmem:[#allocation427_spill] sm:$0xff] }
 0x273   : > { %v2465_v43 = vadd.f32 %v2464_v36, %v10322_v53  ;;  %v2534_v45 = vadd.f32 %v2533_v15, %v10324_v63  ;;  %v10328_v61 = vunpack.c.h.bf16 %v10326_v25  ;;  %v10330_v48 = vunpack.c.l.bf16 %v10329_v11  ;;  %v10353_v53 = vld [vmem:[#allocation236_spill] sm:$0xff] }
 0x274   : > { %v2603_v5 = vadd.f32 %v2602_v19, %v10325_v29  ;;  %v2672_v39 = vadd.f32 %v2671_v16, %v10327_v47  ;;  %v10331_v4 = vunpack.c.h.bf16 %v10329_v11  ;;  %v10333_v8 = vunpack.c.l.bf16 %v10332_v49  ;;  %v10356_v29 = vld [vmem:[#allocation300_spill] sm:$0xff] }
 0x275   : > { %v2741_v6 = vadd.f32 %v2740_v35, %v10328_v61  ;;  %v2259_v2 = vadd.f32 %v2258_v13, %v10330_v48  ;;  %v10334_v46 = vunpack.c.h.bf16 %v10332_v49  ;;  %v10336_v30 = vunpack.c.l.bf16 %v10335_v34  ;;  %v10359_v61 = vld [vmem:[#allocation364_spill] sm:$0xff] }
 0x276   : > { %v2328_v41 = vadd.f32 %v2327_v21, %v10331_v4  ;;  %v2397_v60 = vadd.f32 %v2396_v14, %v10333_v8  ;;  %v10337_v22 = vunpack.c.h.bf16 %v10335_v34  ;;  %v10339_v31 = vunpack.c.l.bf16 %v10338_v62  ;;  %v10362_v4 = vld [vmem:[#allocation428_spill] sm:$0xff] }
 0x277   : > { %v2466_v18 = vadd.f32 %v2465_v43, %v10334_v46  ;;  %v2535_v7 = vadd.f32 %v2534_v45, %v10336_v30  ;;  %v10340_v10 = vunpack.c.h.bf16 %v10338_v62  ;;  %v10342_v36 = vunpack.c.l.bf16 %v10341_v12  ;;  %v10365_v46 = vld [vmem:[#allocation237_spill] sm:$0xff] }
 0x278   : > { %v2604_v32 = vadd.f32 %v2603_v5, %v10337_v22  ;;  %v2673_v26 = vadd.f32 %v2672_v39, %v10339_v31  ;;  %v10343_v56 = vunpack.c.h.bf16 %v10341_v12  ;;  %v10345_v19 = vunpack.c.l.bf16 %v10344_v37  ;;  %v10368_v22 = vld [vmem:[#allocation301_spill] sm:$0xff] }
 0x279   : > { %v2742_v27 = vadd.f32 %v2741_v6, %v10340_v10  ;;  %v2260_v9 = vadd.f32 %v2259_v2, %v10342_v36  ;;  %v10346_v58 = vunpack.c.h.bf16 %v10344_v37  ;;  %v10348_v35 = vunpack.c.l.bf16 %v10347_v51  ;;  %v10371_v10 = vld [vmem:[#allocation365_spill] sm:$0xff] }
 0x27a   : > { %v2329_v15 = vadd.f32 %v2328_v41, %v10343_v56  ;;  %v2398_v3 = vadd.f32 %v2397_v60, %v10345_v19  ;;  %v10349_v40 = vunpack.c.h.bf16 %v10347_v51  ;;  %v10351_v21 = vunpack.c.l.bf16 %v10350_v1  ;;  %v10374_v56 = vld [vmem:[#allocation429_spill] sm:$0xff] }
 0x27b   : > { %v2467_v16 = vadd.f32 %v2466_v18, %v10346_v58  ;;  %v2536_v0 = vadd.f32 %v2535_v7, %v10348_v35  ;;  %v10352_v59 = vunpack.c.h.bf16 %v10350_v1  ;;  %v10354_v43 = vunpack.c.l.bf16 %v10353_v53  ;;  %v10377_v58 = vld [vmem:[#allocation238_spill] sm:$0xff] }
 0x27c   : > { %v2605_v13 = vadd.f32 %v2604_v32, %v10349_v40  ;;  %v2674_v42 = vadd.f32 %v2673_v26, %v10351_v21  ;;  %v10355_v63 = vunpack.c.h.bf16 %v10353_v53  ;;  %v10357_v5 = vunpack.c.l.bf16 %v10356_v29  ;;  %v10380_v40 = vld [vmem:[#allocation302_spill] sm:$0xff] }
 0x27d   : > { %v2743_v14 = vadd.f32 %v2742_v27, %v10352_v59  ;;  %v2261_v24 = vadd.f32 %v2260_v9, %v10354_v43  ;;  %v10358_v47 = vunpack.c.h.bf16 %v10356_v29  ;;  %v10360_v6 = vunpack.c.l.bf16 %v10359_v61  ;;  %v10383_v59 = vld [vmem:[#allocation366_spill] sm:$0xff] }
 0x27e   : > { %v2330_v45 = vadd.f32 %v2329_v15, %v10355_v63  ;;  %v2399_v25 = vadd.f32 %v2398_v3, %v10357_v5  ;;  %v10361_v48 = vunpack.c.h.bf16 %v10359_v61  ;;  %v10363_v41 = vunpack.c.l.bf16 %v10362_v4  ;;  %v10386_v63 = vld [vmem:[#allocation430_spill] sm:$0xff] }
 0x27f   : > { %v2468_v39 = vadd.f32 %v2467_v16, %v10358_v47  ;;  %v2537_v11 = vadd.f32 %v2536_v0, %v10360_v6  ;;  %v10364_v8 = vunpack.c.h.bf16 %v10362_v4  ;;  %v10366_v18 = vunpack.c.l.bf16 %v10365_v46  ;;  %v10389_v47 = vld [vmem:[#allocation239_spill] sm:$0xff] }
 0x280   : > { %v2606_v2 = vadd.f32 %v2605_v13, %v10361_v48  ;;  %v2675_v49 = vadd.f32 %v2674_v42, %v10363_v41  ;;  %v10367_v30 = vunpack.c.h.bf16 %v10365_v46  ;;  %v10369_v32 = vunpack.c.l.bf16 %v10368_v22  ;;  %v10392_v48 = vld [vmem:[#allocation303_spill] sm:$0xff] }
 0x281   : > { %v2744_v60 = vadd.f32 %v2743_v14, %v10364_v8  ;;  %v2262_v34 = vadd.f32 %v2261_v24, %v10366_v18  ;;  %v10370_v31 = vunpack.c.h.bf16 %v10368_v22  ;;  %v10372_v27 = vunpack.c.l.bf16 %v10371_v10  ;;  %v10395_v8 = vld [vmem:[#allocation367_spill] sm:$0xff] }
 0x282   : > { %v2331_v7 = vadd.f32 %v2330_v45, %v10367_v30  ;;  %v2400_v62 = vadd.f32 %v2399_v25, %v10369_v32  ;;  %v10373_v36 = vunpack.c.h.bf16 %v10371_v10  ;;  %v10375_v15 = vunpack.c.l.bf16 %v10374_v56  ;;  %v10398_v30 = vld [vmem:[#allocation431_spill] sm:$0xff] }
 0x283   : > { %v2469_v26 = vadd.f32 %v2468_v39, %v10370_v31  ;;  %v2538_v12 = vadd.f32 %v2537_v11, %v10372_v27  ;;  %v10376_v19 = vunpack.c.h.bf16 %v10374_v56  ;;  %v10378_v16 = vunpack.c.l.bf16 %v10377_v58  ;;  %v10401_v31 = vld [vmem:[#allocation240_spill] sm:$0xff] }
 0x284   : > { %v2607_v9 = vadd.f32 %v2606_v2, %v10373_v36  ;;  %v2676_v37 = vadd.f32 %v2675_v49, %v10375_v15  ;;  %v10379_v35 = vunpack.c.h.bf16 %v10377_v58  ;;  %v10381_v13 = vunpack.c.l.bf16 %v10380_v40  ;;  %v10404_v36 = vld [vmem:[#allocation304_spill] sm:$0xff] }
 0x285   : > { %v2745_v3 = vadd.f32 %v2744_v60, %v10376_v19  ;;  %v2263_v51 = vadd.f32 %v2262_v34, %v10378_v16  ;;  %v10382_v21 = vunpack.c.h.bf16 %v10380_v40  ;;  %v10384_v14 = vunpack.c.l.bf16 %v10383_v59  ;;  %v10407_v19 = vld [vmem:[#allocation368_spill] sm:$0xff] }
 0x286   : > { %v2332_v0 = vadd.f32 %v2331_v7, %v10379_v35  ;;  %v2401_v1 = vadd.f32 %v2400_v62, %v10381_v13  ;;  %v10385_v43 = vunpack.c.h.bf16 %v10383_v59  ;;  %v10387_v45 = vunpack.c.l.bf16 %v10386_v63  ;;  %v10410_v35 = vld [vmem:[#allocation432_spill] sm:$0xff] }
 0x287   : > { %v2470_v42 = vadd.f32 %v2469_v26, %v10382_v21  ;;  %v2539_v53 = vadd.f32 %v2538_v12, %v10384_v14  ;;  %v10388_v5 = vunpack.c.h.bf16 %v10386_v63  ;;  %v10390_v39 = vunpack.c.l.bf16 %v10389_v47  ;;  %v10413_v21 = vld [vmem:[#allocation241_spill] sm:$0xff] }
 0x288   : > { %v2608_v24 = vadd.f32 %v2607_v9, %v10385_v43  ;;  %v2677_v29 = vadd.f32 %v2676_v37, %v10387_v45  ;;  %v10391_v6 = vunpack.c.h.bf16 %v10389_v47  ;;  %v10393_v2 = vunpack.c.l.bf16 %v10392_v48  ;;  %v10416_v43 = vld [vmem:[#allocation305_spill] sm:$0xff] }
 0x289   : > { %v2746_v25 = vadd.f32 %v2745_v3, %v10388_v5  ;;  %v2264_v61 = vadd.f32 %v2263_v51, %v10390_v39  ;;  %v10394_v41 = vunpack.c.h.bf16 %v10392_v48  ;;  %v10396_v60 = vunpack.c.l.bf16 %v10395_v8  ;;  %v10419_v5 = vld [vmem:[#allocation369_spill] sm:$0xff] }
 0x28a   : > { %v2333_v11 = vadd.f32 %v2332_v0, %v10391_v6  ;;  %v2402_v4 = vadd.f32 %v2401_v1, %v10393_v2  ;;  %v10397_v18 = vunpack.c.h.bf16 %v10395_v8  ;;  %v10399_v7 = vunpack.c.l.bf16 %v10398_v30  ;;  %v10422_v6 = vld [vmem:[#allocation433_spill] sm:$0xff] }
 0x28b   : > { %v2471_v49 = vadd.f32 %v2470_v42, %v10394_v41  ;;  %v2540_v46 = vadd.f32 %v2539_v53, %v10396_v60  ;;  %v10400_v32 = vunpack.c.h.bf16 %v10398_v30  ;;  %v10402_v26 = vunpack.c.l.bf16 %v10401_v31  ;;  %v10425_v41 = vld [vmem:[#allocation242_spill] sm:$0xff] }
 0x28c   : > { %v2609_v34 = vadd.f32 %v2608_v24, %v10397_v18  ;;  %v2678_v22 = vadd.f32 %v2677_v29, %v10399_v7  ;;  %v10403_v27 = vunpack.c.h.bf16 %v10401_v31  ;;  %v10405_v9 = vunpack.c.l.bf16 %v10404_v36  ;;  %v10428_v18 = vld [vmem:[#allocation306_spill] sm:$0xff] }
 0x28d   : > { %v2747_v62 = vadd.f32 %v2746_v25, %v10400_v32  ;;  %v2265_v10 = vadd.f32 %v2264_v61, %v10402_v26  ;;  %v10406_v15 = vunpack.c.h.bf16 %v10404_v36  ;;  %v10408_v3 = vunpack.c.l.bf16 %v10407_v19  ;;  %v10431_v32 = vld [vmem:[#allocation370_spill] sm:$0xff] }
 0x28e   : > { %v2334_v12 = vadd.f32 %v2333_v11, %v10403_v27  ;;  %v2403_v56 = vadd.f32 %v2402_v4, %v10405_v9  ;;  %v10409_v16 = vunpack.c.h.bf16 %v10407_v19  ;;  %v10411_v0 = vunpack.c.l.bf16 %v10410_v35  ;;  %v10434_v27 = vld [vmem:[#allocation434_spill] sm:$0xff] }
 0x28f   : > { %v2472_v37 = vadd.f32 %v2471_v49, %v10406_v15  ;;  %v2541_v58 = vadd.f32 %v2540_v46, %v10408_v3  ;;  %v10412_v13 = vunpack.c.h.bf16 %v10410_v35  ;;  %v10414_v42 = vunpack.c.l.bf16 %v10413_v21  ;;  %v10437_v15 = vld [vmem:[#allocation243_spill] sm:$0xff] }
 0x290   : > { %v2610_v51 = vadd.f32 %v2609_v34, %v10409_v16  ;;  %v2679_v40 = vadd.f32 %v2678_v22, %v10411_v0  ;;  %v10415_v14 = vunpack.c.h.bf16 %v10413_v21  ;;  %v10417_v24 = vunpack.c.l.bf16 %v10416_v43  ;;  %v10440_v16 = vld [vmem:[#allocation307_spill] sm:$0xff] }
 0x291   : > { %v2748_v1 = vadd.f32 %v2747_v62, %v10412_v13  ;;  %v2266_v59 = vadd.f32 %v2265_v10, %v10414_v42  ;;  %v10418_v45 = vunpack.c.h.bf16 %v10416_v43  ;;  %v10420_v25 = vunpack.c.l.bf16 %v10419_v5  ;;  %v10443_v13 = vld [vmem:[#allocation371_spill] sm:$0xff] }
 0x292   : > { %v2335_v53 = vadd.f32 %v2334_v12, %v10415_v14  ;;  %v2404_v63 = vadd.f32 %v2403_v56, %v10417_v24  ;;  %v10421_v39 = vunpack.c.h.bf16 %v10419_v5  ;;  %v10423_v11 = vunpack.c.l.bf16 %v10422_v6  ;;  %v10446_v14 = vld [vmem:[#allocation435_spill] sm:$0xff] }
 0x293   : > { %v2473_v29 = vadd.f32 %v2472_v37, %v10418_v45  ;;  %v2542_v47 = vadd.f32 %v2541_v58, %v10420_v25  ;;  %v10424_v2 = vunpack.c.h.bf16 %v10422_v6  ;;  %v10426_v49 = vunpack.c.l.bf16 %v10425_v41  ;;  %v10449_v45 = vld [vmem:[#allocation244_spill] sm:$0xff] }
 0x294   : > { %v2611_v61 = vadd.f32 %v2610_v51, %v10421_v39  ;;  %v2680_v48 = vadd.f32 %v2679_v40, %v10423_v11  ;;  %v10427_v60 = vunpack.c.h.bf16 %v10425_v41  ;;  %v10429_v34 = vunpack.c.l.bf16 %v10428_v18  ;;  %v10452_v39 = vld [vmem:[#allocation308_spill] sm:$0xff] }
 0x295   : > { %v2749_v4 = vadd.f32 %v2748_v1, %v10424_v2  ;;  %v2267_v8 = vadd.f32 %v2266_v59, %v10426_v49  ;;  %v10430_v7 = vunpack.c.h.bf16 %v10428_v18  ;;  %v10432_v62 = vunpack.c.l.bf16 %v10431_v32  ;;  %v10455_v2 = vld [vmem:[#allocation372_spill] sm:$0xff] }
 0x296   : > { %v2336_v46 = vadd.f32 %v2335_v53, %v10427_v60  ;;  %v2405_v30 = vadd.f32 %v2404_v63, %v10429_v34  ;;  %v10433_v26 = vunpack.c.h.bf16 %v10431_v32  ;;  %v10435_v12 = vunpack.c.l.bf16 %v10434_v27  ;;  %v10458_v60 = vld [vmem:[#allocation436_spill] sm:$0xff] }
 0x297   : > { %v2474_v22 = vadd.f32 %v2473_v29, %v10430_v7  ;;  %v2543_v31 = vadd.f32 %v2542_v47, %v10432_v62  ;;  %v10436_v9 = vunpack.c.h.bf16 %v10434_v27  ;;  %v10438_v37 = vunpack.c.l.bf16 %v10437_v15  ;;  %v10461_v7 = vld [vmem:[#allocation245_spill] sm:$0xff] }
 0x298   : > { %v2612_v10 = vadd.f32 %v2611_v61, %v10433_v26  ;;  %v2681_v36 = vadd.f32 %v2680_v48, %v10435_v12  ;;  %v10439_v3 = vunpack.c.h.bf16 %v10437_v15  ;;  %v10441_v51 = vunpack.c.l.bf16 %v10440_v16  ;;  %v10464_v26 = vld [vmem:[#allocation309_spill] sm:$0xff] }
 0x299   : > { %v2750_v56 = vadd.f32 %v2749_v4, %v10436_v9  ;;  %v2268_v19 = vadd.f32 %v2267_v8, %v10438_v37  ;;  %v10442_v0 = vunpack.c.h.bf16 %v10440_v16  ;;  %v10444_v1 = vunpack.c.l.bf16 %v10443_v13  ;;  %v10467_v9 = vld [vmem:[#allocation373_spill] sm:$0xff] }
 0x29a   : > { %v2337_v58 = vadd.f32 %v2336_v46, %v10439_v3  ;;  %v2406_v35 = vadd.f32 %v2405_v30, %v10441_v51  ;;  %v10445_v42 = vunpack.c.h.bf16 %v10443_v13  ;;  %v10447_v53 = vunpack.c.l.bf16 %v10446_v14  ;;  %v10470_v3 = vld [vmem:[#allocation437_spill] sm:$0xff] }
 0x29b   : > { %v2475_v40 = vadd.f32 %v2474_v22, %v10442_v0  ;;  %v2544_v21 = vadd.f32 %v2543_v31, %v10444_v1  ;;  %v10448_v24 = vunpack.c.h.bf16 %v10446_v14  ;;  %v10450_v29 = vunpack.c.l.bf16 %v10449_v45  ;;  %v10473_v0 = vld [vmem:[#allocation246_spill] sm:$0xff] }
 0x29c   : > { %v2613_v59 = vadd.f32 %v2612_v10, %v10445_v42  ;;  %v2682_v43 = vadd.f32 %v2681_v36, %v10447_v53  ;;  %v10451_v25 = vunpack.c.h.bf16 %v10449_v45  ;;  %v10453_v61 = vunpack.c.l.bf16 %v10452_v39  ;;  %v10476_v42 = vld [vmem:[#allocation310_spill] sm:$0xff] }
 0x29d   : > { %v2751_v63 = vadd.f32 %v2750_v56, %v10448_v24  ;;  %v2269_v5 = vadd.f32 %v2268_v19, %v10450_v29  ;;  %v10454_v11 = vunpack.c.h.bf16 %v10452_v39  ;;  %v10456_v4 = vunpack.c.l.bf16 %v10455_v2  ;;  %v10479_v24 = vld [vmem:[#allocation374_spill] sm:$0xff] }
 0x29e   : > { %v2338_v47 = vadd.f32 %v2337_v58, %v10451_v25  ;;  %v2407_v6 = vadd.f32 %v2406_v35, %v10453_v61  ;;  %v10457_v49 = vunpack.c.h.bf16 %v10455_v2  ;;  %v10459_v46 = vunpack.c.l.bf16 %v10458_v60  ;;  %v10482_v25 = vld [vmem:[#allocation438_spill] sm:$0xff] }
 0x29f   : > { %v2476_v48 = vadd.f32 %v2475_v40, %v10454_v11  ;;  %v2545_v41 = vadd.f32 %v2544_v21, %v10456_v4  ;;  %v10460_v34 = vunpack.c.h.bf16 %v10458_v60  ;;  %v10462_v22 = vunpack.c.l.bf16 %v10461_v7  ;;  %v10485_v11 = vld [vmem:[#allocation247_spill] sm:$0xff] }
 0x2a0   : > { %v2614_v8 = vadd.f32 %v2613_v59, %v10457_v49  ;;  %v2683_v18 = vadd.f32 %v2682_v43, %v10459_v46  ;;  %v10463_v62 = vunpack.c.h.bf16 %v10461_v7  ;;  %v10465_v10 = vunpack.c.l.bf16 %v10464_v26  ;;  %v10488_v49 = vld [vmem:[#allocation311_spill] sm:$0xff] }
 0x2a1   : > { %v2752_v30 = vadd.f32 %v2751_v63, %v10460_v34  ;;  %v2270_v32 = vadd.f32 %v2269_v5, %v10462_v22  ;;  %v10466_v12 = vunpack.c.h.bf16 %v10464_v26  ;;  %v10468_v56 = vunpack.c.l.bf16 %v10467_v9  ;;  %v10491_v34 = vld [vmem:[#allocation375_spill] sm:$0xff] }
 0x2a2   : > { %v2339_v31 = vadd.f32 %v2338_v47, %v10463_v62  ;;  %v2408_v27 = vadd.f32 %v2407_v6, %v10465_v10  ;;  %v10469_v37 = vunpack.c.h.bf16 %v10467_v9  ;;  %v10471_v58 = vunpack.c.l.bf16 %v10470_v3  ;;  %v10494_v62 = vld [vmem:[#allocation439_spill] sm:$0xff] }
 0x2a3   : > { %v2477_v36 = vadd.f32 %v2476_v48, %v10466_v12  ;;  %v2546_v15 = vadd.f32 %v2545_v41, %v10468_v56  ;;  %v10472_v51 = vunpack.c.h.bf16 %v10470_v3  ;;  %v10474_v40 = vunpack.c.l.bf16 %v10473_v0  ;;  %v10497_v12 = vld [vmem:[#allocation248_spill] sm:$0xff] }
 0x2a4   : > { %v2615_v19 = vadd.f32 %v2614_v8, %v10469_v37  ;;  %v2684_v16 = vadd.f32 %v2683_v18, %v10471_v58  ;;  %v10475_v1 = vunpack.c.h.bf16 %v10473_v0  ;;  %v10477_v59 = vunpack.c.l.bf16 %v10476_v42  ;;  %v10500_v37 = vld [vmem:[#allocation312_spill] sm:$0xff] }
 0x2a5   : > { %v2753_v35 = vadd.f32 %v2752_v30, %v10472_v51  ;;  %v2271_v13 = vadd.f32 %v2270_v32, %v10474_v40  ;;  %v10478_v53 = vunpack.c.h.bf16 %v10476_v42  ;;  %v10480_v63 = vunpack.c.l.bf16 %v10479_v24  ;;  %v10503_v51 = vld [vmem:[#allocation376_spill] sm:$0xff] }
 0x2a6   : > { %v2340_v21 = vadd.f32 %v2339_v31, %v10475_v1  ;;  %v2409_v14 = vadd.f32 %v2408_v27, %v10477_v59  ;;  %v10481_v29 = vunpack.c.h.bf16 %v10479_v24  ;;  %v10483_v47 = vunpack.c.l.bf16 %v10482_v25  ;;  %v10506_v1 = vld [vmem:[#allocation440_spill] sm:$0xff] }
 0x2a7   : > { %v2478_v43 = vadd.f32 %v2477_v36, %v10478_v53  ;;  %v2547_v45 = vadd.f32 %v2546_v15, %v10480_v63  ;;  %v10484_v61 = vunpack.c.h.bf16 %v10482_v25  ;;  %v10486_v48 = vunpack.c.l.bf16 %v10485_v11  ;;  %v10509_v53 = vld [vmem:[#allocation249_spill] sm:$0xff] }
 0x2a8   : > { %v2616_v5 = vadd.f32 %v2615_v19, %v10481_v29  ;;  %v2685_v39 = vadd.f32 %v2684_v16, %v10483_v47  ;;  %v10487_v4 = vunpack.c.h.bf16 %v10485_v11  ;;  %v10489_v8 = vunpack.c.l.bf16 %v10488_v49  ;;  %v10512_v29 = vld [vmem:[#allocation313_spill] sm:$0xff] }
 0x2a9   : > { %v2754_v6 = vadd.f32 %v2753_v35, %v10484_v61  ;;  %v2272_v2 = vadd.f32 %v2271_v13, %v10486_v48  ;;  %v10490_v46 = vunpack.c.h.bf16 %v10488_v49  ;;  %v10492_v30 = vunpack.c.l.bf16 %v10491_v34  ;;  %v10515_v61 = vld [vmem:[#allocation377_spill] sm:$0xff] }
 0x2aa   : > { %v2341_v41 = vadd.f32 %v2340_v21, %v10487_v4  ;;  %v2410_v60 = vadd.f32 %v2409_v14, %v10489_v8  ;;  %v10493_v22 = vunpack.c.h.bf16 %v10491_v34  ;;  %v10495_v31 = vunpack.c.l.bf16 %v10494_v62  ;;  %v10518_v4 = vld [vmem:[#allocation441_spill] sm:$0xff] }
 0x2ab   : > { %v2479_v18 = vadd.f32 %v2478_v43, %v10490_v46  ;;  %v2548_v7 = vadd.f32 %v2547_v45, %v10492_v30  ;;  %v10496_v10 = vunpack.c.h.bf16 %v10494_v62  ;;  %v10498_v36 = vunpack.c.l.bf16 %v10497_v12  ;;  %v10521_v46 = vld [vmem:[#allocation250_spill] sm:$0xff] }
 0x2ac   : > { %v2617_v32 = vadd.f32 %v2616_v5, %v10493_v22  ;;  %v2686_v26 = vadd.f32 %v2685_v39, %v10495_v31  ;;  %v10499_v56 = vunpack.c.h.bf16 %v10497_v12  ;;  %v10501_v19 = vunpack.c.l.bf16 %v10500_v37  ;;  %v10524_v22 = vld [vmem:[#allocation314_spill] sm:$0xff] }
 0x2ad   : > { %v2755_v27 = vadd.f32 %v2754_v6, %v10496_v10  ;;  %v2273_v9 = vadd.f32 %v2272_v2, %v10498_v36  ;;  %v10502_v58 = vunpack.c.h.bf16 %v10500_v37  ;;  %v10504_v35 = vunpack.c.l.bf16 %v10503_v51  ;;  %v10527_v10 = vld [vmem:[#allocation378_spill] sm:$0xff] }
 0x2ae   : > { %v2342_v15 = vadd.f32 %v2341_v41, %v10499_v56  ;;  %v2411_v3 = vadd.f32 %v2410_v60, %v10501_v19  ;;  %v10505_v40 = vunpack.c.h.bf16 %v10503_v51  ;;  %v10507_v21 = vunpack.c.l.bf16 %v10506_v1  ;;  %v10530_v56 = vld [vmem:[#allocation442_spill] sm:$0xff] }
 0x2af   : > { %v2480_v16 = vadd.f32 %v2479_v18, %v10502_v58  ;;  %v2549_v0 = vadd.f32 %v2548_v7, %v10504_v35  ;;  %v10508_v59 = vunpack.c.h.bf16 %v10506_v1  ;;  %v10510_v43 = vunpack.c.l.bf16 %v10509_v53  ;;  %v10533_v58 = vld [vmem:[#allocation251_spill] sm:$0xff] }
 0x2b0   : > { %v2618_v13 = vadd.f32 %v2617_v32, %v10505_v40  ;;  %v2687_v42 = vadd.f32 %v2686_v26, %v10507_v21  ;;  %v10511_v63 = vunpack.c.h.bf16 %v10509_v53  ;;  %v10513_v5 = vunpack.c.l.bf16 %v10512_v29  ;;  %v10536_v40 = vld [vmem:[#allocation315_spill] sm:$0xff] }
 0x2b1   : > { %v2756_v14 = vadd.f32 %v2755_v27, %v10508_v59  ;;  %v2274_v24 = vadd.f32 %v2273_v9, %v10510_v43  ;;  %v10514_v47 = vunpack.c.h.bf16 %v10512_v29  ;;  %v10516_v6 = vunpack.c.l.bf16 %v10515_v61  ;;  %v10539_v59 = vld [vmem:[#allocation379_spill] sm:$0xff] }
 0x2b2   : > { %v2343_v45 = vadd.f32 %v2342_v15, %v10511_v63  ;;  %v2412_v25 = vadd.f32 %v2411_v3, %v10513_v5  ;;  %v10517_v48 = vunpack.c.h.bf16 %v10515_v61  ;;  %v10519_v41 = vunpack.c.l.bf16 %v10518_v4  ;;  %v10542_v63 = vld [vmem:[#allocation443_spill] sm:$0xff] }
 0x2b3   : > { %v2481_v39 = vadd.f32 %v2480_v16, %v10514_v47  ;;  %v2550_v11 = vadd.f32 %v2549_v0, %v10516_v6  ;;  %v10520_v8 = vunpack.c.h.bf16 %v10518_v4  ;;  %v10522_v18 = vunpack.c.l.bf16 %v10521_v46  ;;  %v10545_v47 = vld [vmem:[#allocation252_spill] sm:$0xff] }
 0x2b4   : > { %v2619_v2 = vadd.f32 %v2618_v13, %v10517_v48  ;;  %v2688_v49 = vadd.f32 %v2687_v42, %v10519_v41  ;;  %v10523_v30 = vunpack.c.h.bf16 %v10521_v46  ;;  %v10525_v32 = vunpack.c.l.bf16 %v10524_v22  ;;  %v10548_v48 = vld [vmem:[#allocation316_spill] sm:$0xff] }
 0x2b5   : > { %v2757_v60 = vadd.f32 %v2756_v14, %v10520_v8  ;;  %v2275_v34 = vadd.f32 %v2274_v24, %v10522_v18  ;;  %v10526_v31 = vunpack.c.h.bf16 %v10524_v22  ;;  %v10528_v27 = vunpack.c.l.bf16 %v10527_v10  ;;  %v10551_v8 = vld [vmem:[#allocation380_spill] sm:$0xff] }
 0x2b6   : > { %v2344_v7 = vadd.f32 %v2343_v45, %v10523_v30  ;;  %v2413_v62 = vadd.f32 %v2412_v25, %v10525_v32  ;;  %v10529_v36 = vunpack.c.h.bf16 %v10527_v10  ;;  %v10531_v15 = vunpack.c.l.bf16 %v10530_v56  ;;  %v10554_v30 = vld [vmem:[#allocation444_spill] sm:$0xff] }
 0x2b7   : > { %v2482_v26 = vadd.f32 %v2481_v39, %v10526_v31  ;;  %v2551_v12 = vadd.f32 %v2550_v11, %v10528_v27  ;;  %v10532_v19 = vunpack.c.h.bf16 %v10530_v56  ;;  %v10534_v16 = vunpack.c.l.bf16 %v10533_v58  ;;  %v10557_v31 = vld [vmem:[#allocation253_spill] sm:$0xff] }
 0x2b8   : > { %v2620_v9 = vadd.f32 %v2619_v2, %v10529_v36  ;;  %v2689_v37 = vadd.f32 %v2688_v49, %v10531_v15  ;;  %v10535_v35 = vunpack.c.h.bf16 %v10533_v58  ;;  %v10537_v13 = vunpack.c.l.bf16 %v10536_v40  ;;  %v10560_v36 = vld [vmem:[#allocation317_spill] sm:$0xff] }
 0x2b9   : > { %v2758_v3 = vadd.f32 %v2757_v60, %v10532_v19  ;;  %v2276_v51 = vadd.f32 %v2275_v34, %v10534_v16  ;;  %v10538_v21 = vunpack.c.h.bf16 %v10536_v40  ;;  %v10540_v14 = vunpack.c.l.bf16 %v10539_v59  ;;  %v10563_v19 = vld [vmem:[#allocation381_spill] sm:$0xff] }
 0x2ba   : > { %v2345_v0 = vadd.f32 %v2344_v7, %v10535_v35  ;;  %v2414_v1 = vadd.f32 %v2413_v62, %v10537_v13  ;;  %v10541_v43 = vunpack.c.h.bf16 %v10539_v59  ;;  %v10543_v45 = vunpack.c.l.bf16 %v10542_v63  ;;  %v10566_v35 = vld [vmem:[#allocation445_spill] sm:$0xff] }
 0x2bb   : > { %v2483_v42 = vadd.f32 %v2482_v26, %v10538_v21  ;;  %v2552_v53 = vadd.f32 %v2551_v12, %v10540_v14  ;;  %v10544_v5 = vunpack.c.h.bf16 %v10542_v63  ;;  %v10546_v39 = vunpack.c.l.bf16 %v10545_v47  ;;  %v10569_v21 = vld [vmem:[#allocation254_spill] sm:$0xff] }
 0x2bc   : > { %v2621_v24 = vadd.f32 %v2620_v9, %v10541_v43  ;;  %v2690_v29 = vadd.f32 %v2689_v37, %v10543_v45  ;;  %v10547_v6 = vunpack.c.h.bf16 %v10545_v47  ;;  %v10549_v2 = vunpack.c.l.bf16 %v10548_v48  ;;  %v10572_v43 = vld [vmem:[#allocation318_spill] sm:$0xff] }
 0x2bd   : > { %v2759_v25 = vadd.f32 %v2758_v3, %v10544_v5  ;;  %v2277_v61 = vadd.f32 %v2276_v51, %v10546_v39  ;;  %v10550_v41 = vunpack.c.h.bf16 %v10548_v48  ;;  %v10552_v60 = vunpack.c.l.bf16 %v10551_v8  ;;  %v10575_v5 = vld [vmem:[#allocation382_spill] sm:$0xff] }
 0x2be   : > { %v2346_v11 = vadd.f32 %v2345_v0, %v10547_v6  ;;  %v2415_v4 = vadd.f32 %v2414_v1, %v10549_v2  ;;  %v10553_v18 = vunpack.c.h.bf16 %v10551_v8  ;;  %v10555_v7 = vunpack.c.l.bf16 %v10554_v30  ;;  %v10578_v6 = vld [vmem:[#allocation446_spill] sm:$0xff] }
 0x2bf   : > { %v2484_v49 = vadd.f32 %v2483_v42, %v10550_v41  ;;  %v2553_v46 = vadd.f32 %v2552_v53, %v10552_v60  ;;  %v10556_v32 = vunpack.c.h.bf16 %v10554_v30  ;;  %v10558_v26 = vunpack.c.l.bf16 %v10557_v31  ;;  %v10581_v41 = vld [vmem:[#allocation255_spill] sm:$0xff] }
 0x2c0   : > { %v2622_v34 = vadd.f32 %v2621_v24, %v10553_v18  ;;  %v2691_v22 = vadd.f32 %v2690_v29, %v10555_v7  ;;  %v10559_v27 = vunpack.c.h.bf16 %v10557_v31  ;;  %v10561_v9 = vunpack.c.l.bf16 %v10560_v36  ;;  %v10584_v18 = vld [vmem:[#allocation319_spill] sm:$0xff] }
 0x2c1   : > { %v2760_v62 = vadd.f32 %v2759_v25, %v10556_v32  ;;  %v2278_v10 = vadd.f32 %v2277_v61, %v10558_v26  ;;  %v10562_v15 = vunpack.c.h.bf16 %v10560_v36  ;;  %v10564_v3 = vunpack.c.l.bf16 %v10563_v19  ;;  %v10587_v32 = vld [vmem:[#allocation383_spill] sm:$0xff] }
 0x2c2   : > { %v2347_v12 = vadd.f32 %v2346_v11, %v10559_v27  ;;  %v2416_v56 = vadd.f32 %v2415_v4, %v10561_v9  ;;  %v10565_v16 = vunpack.c.h.bf16 %v10563_v19  ;;  %v10567_v0 = vunpack.c.l.bf16 %v10566_v35  ;;  %v10590_v27 = vld [vmem:[#allocation447_spill] sm:$0xff] }
 0x2c3   : > { %v2485_v37 = vadd.f32 %v2484_v49, %v10562_v15  ;;  %v2554_v58 = vadd.f32 %v2553_v46, %v10564_v3  ;;  %v10568_v13 = vunpack.c.h.bf16 %v10566_v35  ;;  %v10570_v42 = vunpack.c.l.bf16 %v10569_v21  ;;  %v10593_v15 = vld [vmem:[#allocation256_spill] sm:$0xff] }
 0x2c4   : > { %v2623_v51 = vadd.f32 %v2622_v34, %v10565_v16  ;;  %v2692_v40 = vadd.f32 %v2691_v22, %v10567_v0  ;;  %v10571_v14 = vunpack.c.h.bf16 %v10569_v21  ;;  %v10573_v24 = vunpack.c.l.bf16 %v10572_v43  ;;  %v10596_v16 = vld [vmem:[#allocation320_spill] sm:$0xff] }
 0x2c5   : > { %v2761_v1 = vadd.f32 %v2760_v62, %v10568_v13  ;;  %v2279_v59 = vadd.f32 %v2278_v10, %v10570_v42  ;;  %v10574_v45 = vunpack.c.h.bf16 %v10572_v43  ;;  %v10576_v25 = vunpack.c.l.bf16 %v10575_v5  ;;  %v10599_v13 = vld [vmem:[#allocation384_spill] sm:$0xff] }
 0x2c6   : > { %v2348_v53 = vadd.f32 %v2347_v12, %v10571_v14  ;;  %v2417_v63 = vadd.f32 %v2416_v56, %v10573_v24  ;;  %v10577_v39 = vunpack.c.h.bf16 %v10575_v5  ;;  %v10579_v11 = vunpack.c.l.bf16 %v10578_v6  ;;  %v10602_v14 = vld [vmem:[#allocation448_spill] sm:$0xff] }
 0x2c7   : > { %v2486_v29 = vadd.f32 %v2485_v37, %v10574_v45  ;;  %v2555_v47 = vadd.f32 %v2554_v58, %v10576_v25  ;;  %v10580_v2 = vunpack.c.h.bf16 %v10578_v6  ;;  %v10582_v49 = vunpack.c.l.bf16 %v10581_v41  ;;  %v10605_v45 = vld [vmem:[#allocation257_spill] sm:$0xff] }
 0x2c8   : > { %v2624_v61 = vadd.f32 %v2623_v51, %v10577_v39  ;;  %v2693_v48 = vadd.f32 %v2692_v40, %v10579_v11  ;;  %v10583_v60 = vunpack.c.h.bf16 %v10581_v41  ;;  %v10585_v34 = vunpack.c.l.bf16 %v10584_v18  ;;  %v10608_v39 = vld [vmem:[#allocation321_spill] sm:$0xff] }
 0x2c9   : > { %v2762_v4 = vadd.f32 %v2761_v1, %v10580_v2  ;;  %v2280_v8 = vadd.f32 %v2279_v59, %v10582_v49  ;;  %v10586_v7 = vunpack.c.h.bf16 %v10584_v18  ;;  %v10588_v62 = vunpack.c.l.bf16 %v10587_v32  ;;  %v10611_v2 = vld [vmem:[#allocation385_spill] sm:$0xff] }
 0x2ca   : > { %v2349_v46 = vadd.f32 %v2348_v53, %v10583_v60  ;;  %v2418_v30 = vadd.f32 %v2417_v63, %v10585_v34  ;;  %v10589_v26 = vunpack.c.h.bf16 %v10587_v32  ;;  %v10591_v12 = vunpack.c.l.bf16 %v10590_v27  ;;  %v10614_v60 = vld [vmem:[#allocation449_spill] sm:$0xff] }
 0x2cb   : > { %v2487_v22 = vadd.f32 %v2486_v29, %v10586_v7  ;;  %v2556_v31 = vadd.f32 %v2555_v47, %v10588_v62  ;;  %v10592_v9 = vunpack.c.h.bf16 %v10590_v27  ;;  %v10594_v37 = vunpack.c.l.bf16 %v10593_v15  ;;  %v10617_v7 = vld [vmem:[#allocation258_spill] sm:$0xff] }
 0x2cc   : > { %v2625_v10 = vadd.f32 %v2624_v61, %v10589_v26  ;;  %v2694_v36 = vadd.f32 %v2693_v48, %v10591_v12  ;;  %v10595_v3 = vunpack.c.h.bf16 %v10593_v15  ;;  %v10597_v51 = vunpack.c.l.bf16 %v10596_v16  ;;  %v10620_v26 = vld [vmem:[#allocation322_spill] sm:$0xff] }
 0x2cd   : > { %v2763_v56 = vadd.f32 %v2762_v4, %v10592_v9  ;;  %v2281_v19 = vadd.f32 %v2280_v8, %v10594_v37  ;;  %v10598_v0 = vunpack.c.h.bf16 %v10596_v16  ;;  %v10600_v1 = vunpack.c.l.bf16 %v10599_v13  ;;  %v10623_v9 = vld [vmem:[#allocation386_spill] sm:$0xff] }
 0x2ce   : > { %v2350_v58 = vadd.f32 %v2349_v46, %v10595_v3  ;;  %v2419_v35 = vadd.f32 %v2418_v30, %v10597_v51  ;;  %v10601_v42 = vunpack.c.h.bf16 %v10599_v13  ;;  %v10603_v53 = vunpack.c.l.bf16 %v10602_v14  ;;  %v10626_v3 = vld [vmem:[#allocation450_spill] sm:$0xff] }
 0x2cf   : > { %v2488_v40 = vadd.f32 %v2487_v22, %v10598_v0  ;;  %v2557_v21 = vadd.f32 %v2556_v31, %v10600_v1  ;;  %v10604_v24 = vunpack.c.h.bf16 %v10602_v14  ;;  %v10606_v29 = vunpack.c.l.bf16 %v10605_v45  ;;  %v10629_v0 = vld [vmem:[#allocation259_spill] sm:$0xff] }
 0x2d0   : > { %v2626_v59 = vadd.f32 %v2625_v10, %v10601_v42  ;;  %v2695_v43 = vadd.f32 %v2694_v36, %v10603_v53  ;;  %v10607_v25 = vunpack.c.h.bf16 %v10605_v45  ;;  %v10609_v61 = vunpack.c.l.bf16 %v10608_v39  ;;  %v10632_v42 = vld [vmem:[#allocation323_spill] sm:$0xff] }
 0x2d1   : > { %v2764_v63 = vadd.f32 %v2763_v56, %v10604_v24  ;;  %v2282_v5 = vadd.f32 %v2281_v19, %v10606_v29  ;;  %v10610_v11 = vunpack.c.h.bf16 %v10608_v39  ;;  %v10612_v4 = vunpack.c.l.bf16 %v10611_v2  ;;  %v10635_v24 = vld [vmem:[#allocation387_spill] sm:$0xff] }
 0x2d2   : > { %v2351_v47 = vadd.f32 %v2350_v58, %v10607_v25  ;;  %v2420_v6 = vadd.f32 %v2419_v35, %v10609_v61  ;;  %v10613_v49 = vunpack.c.h.bf16 %v10611_v2  ;;  %v10615_v46 = vunpack.c.l.bf16 %v10614_v60  ;;  %v10638_v25 = vld [vmem:[#allocation451_spill] sm:$0xff] }
 0x2d3   : > { %v2489_v48 = vadd.f32 %v2488_v40, %v10610_v11  ;;  %v2558_v41 = vadd.f32 %v2557_v21, %v10612_v4  ;;  %v10616_v34 = vunpack.c.h.bf16 %v10614_v60  ;;  %v10618_v22 = vunpack.c.l.bf16 %v10617_v7  ;;  %v10641_v11 = vld [vmem:[#allocation260_spill] sm:$0xff] }
 0x2d4   : > { %v2627_v8 = vadd.f32 %v2626_v59, %v10613_v49  ;;  %v2696_v18 = vadd.f32 %v2695_v43, %v10615_v46  ;;  %v10619_v62 = vunpack.c.h.bf16 %v10617_v7  ;;  %v10621_v10 = vunpack.c.l.bf16 %v10620_v26  ;;  %v10644_v49 = vld [vmem:[#allocation324_spill] sm:$0xff] }
 0x2d5   : > { %v2765_v30 = vadd.f32 %v2764_v63, %v10616_v34  ;;  %v2283_v32 = vadd.f32 %v2282_v5, %v10618_v22  ;;  %v10622_v12 = vunpack.c.h.bf16 %v10620_v26  ;;  %v10624_v56 = vunpack.c.l.bf16 %v10623_v9  ;;  %v10647_v34 = vld [vmem:[#allocation388_spill] sm:$0xff] }
 0x2d6   : > { %v2352_v31 = vadd.f32 %v2351_v47, %v10619_v62  ;;  %v2421_v27 = vadd.f32 %v2420_v6, %v10621_v10  ;;  %v10625_v37 = vunpack.c.h.bf16 %v10623_v9  ;;  %v10627_v58 = vunpack.c.l.bf16 %v10626_v3  ;;  %v10650_v62 = vld [vmem:[#allocation452_spill] sm:$0xff] }
 0x2d7   : > { %v2490_v36 = vadd.f32 %v2489_v48, %v10622_v12  ;;  %v2559_v15 = vadd.f32 %v2558_v41, %v10624_v56  ;;  %v10628_v51 = vunpack.c.h.bf16 %v10626_v3  ;;  %v10630_v40 = vunpack.c.l.bf16 %v10629_v0  ;;  %v10653_v12 = vld [vmem:[#allocation261_spill] sm:$0xff] }
 0x2d8   : > { %v2628_v19 = vadd.f32 %v2627_v8, %v10625_v37  ;;  %v2697_v16 = vadd.f32 %v2696_v18, %v10627_v58  ;;  %v10631_v1 = vunpack.c.h.bf16 %v10629_v0  ;;  %v10633_v59 = vunpack.c.l.bf16 %v10632_v42  ;;  %v10656_v37 = vld [vmem:[#allocation325_spill] sm:$0xff] }
 0x2d9   : > { %v2766_v35 = vadd.f32 %v2765_v30, %v10628_v51  ;;  %v2284_v13 = vadd.f32 %v2283_v32, %v10630_v40  ;;  %v10634_v53 = vunpack.c.h.bf16 %v10632_v42  ;;  %v10636_v63 = vunpack.c.l.bf16 %v10635_v24  ;;  %v10659_v51 = vld [vmem:[#allocation389_spill] sm:$0xff] }
 0x2da   : > { %v2353_v21 = vadd.f32 %v2352_v31, %v10631_v1  ;;  %v2422_v14 = vadd.f32 %v2421_v27, %v10633_v59  ;;  %v10637_v29 = vunpack.c.h.bf16 %v10635_v24  ;;  %v10639_v47 = vunpack.c.l.bf16 %v10638_v25  ;;  %v10662_v1 = vld [vmem:[#allocation453_spill] sm:$0xff] }
 0x2db   : > { %v2491_v43 = vadd.f32 %v2490_v36, %v10634_v53  ;;  %v2560_v45 = vadd.f32 %v2559_v15, %v10636_v63  ;;  %v10640_v61 = vunpack.c.h.bf16 %v10638_v25  ;;  %v10642_v48 = vunpack.c.l.bf16 %v10641_v11  ;;  %v10665_v53 = vld [vmem:[#allocation262_spill] sm:$0xff] }
 0x2dc   : > { %v2629_v5 = vadd.f32 %v2628_v19, %v10637_v29  ;;  %v2698_v39 = vadd.f32 %v2697_v16, %v10639_v47  ;;  %v10643_v4 = vunpack.c.h.bf16 %v10641_v11  ;;  %v10645_v8 = vunpack.c.l.bf16 %v10644_v49  ;;  %v10668_v29 = vld [vmem:[#allocation326_spill] sm:$0xff] }
 0x2dd   : > { %v2767_v6 = vadd.f32 %v2766_v35, %v10640_v61  ;;  %v2285_v2 = vadd.f32 %v2284_v13, %v10642_v48  ;;  %v10646_v46 = vunpack.c.h.bf16 %v10644_v49  ;;  %v10648_v30 = vunpack.c.l.bf16 %v10647_v34  ;;  %v10671_v61 = vld [vmem:[#allocation390_spill] sm:$0xff] }
 0x2de   : > { %v2354_v41 = vadd.f32 %v2353_v21, %v10643_v4  ;;  %v2423_v60 = vadd.f32 %v2422_v14, %v10645_v8  ;;  %v10649_v22 = vunpack.c.h.bf16 %v10647_v34  ;;  %v10651_v31 = vunpack.c.l.bf16 %v10650_v62  ;;  %v10674_v4 = vld [vmem:[#allocation454_spill] sm:$0xff] }
 0x2df   : > { %v2492_v18 = vadd.f32 %v2491_v43, %v10646_v46  ;;  %v2561_v7 = vadd.f32 %v2560_v45, %v10648_v30  ;;  %v10652_v10 = vunpack.c.h.bf16 %v10650_v62  ;;  %v10654_v36 = vunpack.c.l.bf16 %v10653_v12  ;;  %v10677_v46 = vld [vmem:[#allocation263_spill] sm:$0xff] }
 0x2e0   : > { %v2630_v32 = vadd.f32 %v2629_v5, %v10649_v22  ;;  %v2699_v26 = vadd.f32 %v2698_v39, %v10651_v31  ;;  %v10655_v56 = vunpack.c.h.bf16 %v10653_v12  ;;  %v10657_v19 = vunpack.c.l.bf16 %v10656_v37  ;;  %v10680_v22 = vld [vmem:[#allocation327_spill] sm:$0xff] }
 0x2e1   : > { %v2768_v27 = vadd.f32 %v2767_v6, %v10652_v10  ;;  %v2286_v9 = vadd.f32 %v2285_v2, %v10654_v36  ;;  %v10658_v58 = vunpack.c.h.bf16 %v10656_v37  ;;  %v10660_v35 = vunpack.c.l.bf16 %v10659_v51  ;;  %v10683_v10 = vld [vmem:[#allocation391_spill] sm:$0xff] }
 0x2e2   : > { %v2355_v15 = vadd.f32 %v2354_v41, %v10655_v56  ;;  %v2424_v3 = vadd.f32 %v2423_v60, %v10657_v19  ;;  %v10661_v40 = vunpack.c.h.bf16 %v10659_v51  ;;  %v10663_v21 = vunpack.c.l.bf16 %v10662_v1  ;;  %v10686_v56 = vld [vmem:[#allocation455_spill] sm:$0xff] }
 0x2e3   : > { %v2493_v16 = vadd.f32 %v2492_v18, %v10658_v58  ;;  %v2562_v0 = vadd.f32 %v2561_v7, %v10660_v35  ;;  %v10664_v59 = vunpack.c.h.bf16 %v10662_v1  ;;  %v10666_v43 = vunpack.c.l.bf16 %v10665_v53  ;;  %v10689_v58 = vld [vmem:[#allocation264_spill] sm:$0xff] }
 0x2e4   : > { %v2631_v13 = vadd.f32 %v2630_v32, %v10661_v40  ;;  %v2700_v42 = vadd.f32 %v2699_v26, %v10663_v21  ;;  %v10667_v63 = vunpack.c.h.bf16 %v10665_v53  ;;  %v10669_v5 = vunpack.c.l.bf16 %v10668_v29  ;;  %v10692_v40 = vld [vmem:[#allocation328_spill] sm:$0xff] }
 0x2e5   : > { %v2769_v14 = vadd.f32 %v2768_v27, %v10664_v59  ;;  %v2287_v24 = vadd.f32 %v2286_v9, %v10666_v43  ;;  %v10670_v47 = vunpack.c.h.bf16 %v10668_v29  ;;  %v10672_v6 = vunpack.c.l.bf16 %v10671_v61  ;;  %v10695_v59 = vld [vmem:[#allocation392_spill] sm:$0xff] }
 0x2e6   : > { %v2356_v45 = vadd.f32 %v2355_v15, %v10667_v63  ;;  %v2425_v25 = vadd.f32 %v2424_v3, %v10669_v5  ;;  %v10673_v48 = vunpack.c.h.bf16 %v10671_v61  ;;  %v10675_v41 = vunpack.c.l.bf16 %v10674_v4  ;;  %v10698_v63 = vld [vmem:[#allocation456_spill] sm:$0xff] }
 0x2e7   : > { %v2494_v39 = vadd.f32 %v2493_v16, %v10670_v47  ;;  %v2563_v11 = vadd.f32 %v2562_v0, %v10672_v6  ;;  %v10676_v8 = vunpack.c.h.bf16 %v10674_v4  ;;  %v10678_v18 = vunpack.c.l.bf16 %v10677_v46  ;;  %v10701_v47 = vld [vmem:[#allocation265_spill] sm:$0xff] }
 0x2e8   : > { %v2632_v2 = vadd.f32 %v2631_v13, %v10673_v48  ;;  %v2701_v49 = vadd.f32 %v2700_v42, %v10675_v41  ;;  %v10679_v30 = vunpack.c.h.bf16 %v10677_v46  ;;  %v10681_v32 = vunpack.c.l.bf16 %v10680_v22  ;;  %v10704_v48 = vld [vmem:[#allocation329_spill] sm:$0xff] }
 0x2e9   : > { %v2770_v60 = vadd.f32 %v2769_v14, %v10676_v8  ;;  %v2288_v34 = vadd.f32 %v2287_v24, %v10678_v18  ;;  %v10682_v31 = vunpack.c.h.bf16 %v10680_v22  ;;  %v10684_v27 = vunpack.c.l.bf16 %v10683_v10  ;;  %v10707_v8 = vld [vmem:[#allocation393_spill] sm:$0xff] }
 0x2ea   : > { %v2357_v7 = vadd.f32 %v2356_v45, %v10679_v30  ;;  %v2426_v62 = vadd.f32 %v2425_v25, %v10681_v32  ;;  %v10685_v36 = vunpack.c.h.bf16 %v10683_v10  ;;  %v10687_v15 = vunpack.c.l.bf16 %v10686_v56  ;;  %v10710_v30 = vld [vmem:[#allocation457_spill] sm:$0xff] }
 0x2eb   : > { %v2495_v26 = vadd.f32 %v2494_v39, %v10682_v31  ;;  %v2564_v12 = vadd.f32 %v2563_v11, %v10684_v27  ;;  %v10688_v19 = vunpack.c.h.bf16 %v10686_v56  ;;  %v10690_v16 = vunpack.c.l.bf16 %v10689_v58  ;;  %v10713_v31 = vld [vmem:[#allocation266_spill] sm:$0xff] }
 0x2ec   : > { %v2633_v9 = vadd.f32 %v2632_v2, %v10685_v36  ;;  %v2702_v37 = vadd.f32 %v2701_v49, %v10687_v15  ;;  %v10691_v35 = vunpack.c.h.bf16 %v10689_v58  ;;  %v10693_v13 = vunpack.c.l.bf16 %v10692_v40  ;;  %v10716_v36 = vld [vmem:[#allocation330_spill] sm:$0xff] }
 0x2ed   : > { %v2771_v3 = vadd.f32 %v2770_v60, %v10688_v19  ;;  %v2289_v51 = vadd.f32 %v2288_v34, %v10690_v16  ;;  %v10694_v21 = vunpack.c.h.bf16 %v10692_v40  ;;  %v10696_v14 = vunpack.c.l.bf16 %v10695_v59  ;;  %v10719_v19 = vld [vmem:[#allocation394_spill] sm:$0xff] }
 0x2ee   : > { %v2358_v0 = vadd.f32 %v2357_v7, %v10691_v35  ;;  %v2427_v1 = vadd.f32 %v2426_v62, %v10693_v13  ;;  %v10697_v43 = vunpack.c.h.bf16 %v10695_v59  ;;  %v10699_v45 = vunpack.c.l.bf16 %v10698_v63  ;;  %v10722_v35 = vld [vmem:[#allocation458_spill] sm:$0xff] }
 0x2ef   : > { %v2496_v42 = vadd.f32 %v2495_v26, %v10694_v21  ;;  %v2565_v53 = vadd.f32 %v2564_v12, %v10696_v14  ;;  %v10700_v5 = vunpack.c.h.bf16 %v10698_v63  ;;  %v10702_v39 = vunpack.c.l.bf16 %v10701_v47  ;;  %v10725_v21 = vld [vmem:[#allocation267_spill] sm:$0xff] }
 0x2f0   : > { %v2634_v24 = vadd.f32 %v2633_v9, %v10697_v43  ;;  %v2703_v29 = vadd.f32 %v2702_v37, %v10699_v45  ;;  %v10703_v6 = vunpack.c.h.bf16 %v10701_v47  ;;  %v10705_v2 = vunpack.c.l.bf16 %v10704_v48  ;;  %v10728_v43 = vld [vmem:[#allocation331_spill] sm:$0xff] }
 0x2f1   : > { %v2772_v25 = vadd.f32 %v2771_v3, %v10700_v5  ;;  %v2290_v61 = vadd.f32 %v2289_v51, %v10702_v39  ;;  %v10706_v41 = vunpack.c.h.bf16 %v10704_v48  ;;  %v10708_v60 = vunpack.c.l.bf16 %v10707_v8  ;;  %v10731_v5 = vld [vmem:[#allocation395_spill] sm:$0xff] }
 0x2f2   : > { %v2359_v11 = vadd.f32 %v2358_v0, %v10703_v6  ;;  %v2428_v4 = vadd.f32 %v2427_v1, %v10705_v2  ;;  %v10709_v18 = vunpack.c.h.bf16 %v10707_v8  ;;  %v10711_v7 = vunpack.c.l.bf16 %v10710_v30  ;;  %v10734_v6 = vld [vmem:[#allocation459_spill] sm:$0xff] }
 0x2f3   : > { %v2497_v49 = vadd.f32 %v2496_v42, %v10706_v41  ;;  %v2566_v46 = vadd.f32 %v2565_v53, %v10708_v60  ;;  %v10712_v32 = vunpack.c.h.bf16 %v10710_v30  ;;  %v10714_v26 = vunpack.c.l.bf16 %v10713_v31  ;;  %v10737_v41 = vld [vmem:[#allocation268_spill] sm:$0xff] }
 0x2f4   : > { %v2635_v34 = vadd.f32 %v2634_v24, %v10709_v18  ;;  %v2704_v22 = vadd.f32 %v2703_v29, %v10711_v7  ;;  %v10715_v27 = vunpack.c.h.bf16 %v10713_v31  ;;  %v10717_v9 = vunpack.c.l.bf16 %v10716_v36  ;;  %v10740_v18 = vld [vmem:[#allocation332_spill] sm:$0xff] }
 0x2f5   : > { %v2773_v62 = vadd.f32 %v2772_v25, %v10712_v32  ;;  %v2291_v10 = vadd.f32 %v2290_v61, %v10714_v26  ;;  %v10718_v15 = vunpack.c.h.bf16 %v10716_v36  ;;  %v10720_v3 = vunpack.c.l.bf16 %v10719_v19  ;;  %v10743_v32 = vld [vmem:[#allocation396_spill] sm:$0xff] }
 0x2f6   : > { %v2360_v12 = vadd.f32 %v2359_v11, %v10715_v27  ;;  %v2429_v56 = vadd.f32 %v2428_v4, %v10717_v9  ;;  %v10721_v16 = vunpack.c.h.bf16 %v10719_v19  ;;  %v10723_v0 = vunpack.c.l.bf16 %v10722_v35  ;;  %v10746_v27 = vld [vmem:[#allocation460_spill] sm:$0xff] }
 0x2f7   : > { %v2498_v37 = vadd.f32 %v2497_v49, %v10718_v15  ;;  %v2567_v58 = vadd.f32 %v2566_v46, %v10720_v3  ;;  %v10724_v13 = vunpack.c.h.bf16 %v10722_v35  ;;  %v10726_v42 = vunpack.c.l.bf16 %v10725_v21  ;;  %v10749_v15 = vld [vmem:[#allocation269_spill] sm:$0xff] }
 0x2f8   : > { %v2636_v51 = vadd.f32 %v2635_v34, %v10721_v16  ;;  %v2705_v40 = vadd.f32 %v2704_v22, %v10723_v0  ;;  %v10727_v14 = vunpack.c.h.bf16 %v10725_v21  ;;  %v10729_v24 = vunpack.c.l.bf16 %v10728_v43  ;;  %v10752_v16 = vld [vmem:[#allocation333_spill] sm:$0xff] }
 0x2f9   : > { %v2774_v1 = vadd.f32 %v2773_v62, %v10724_v13  ;;  %v2292_v59 = vadd.f32 %v2291_v10, %v10726_v42  ;;  %v10730_v45 = vunpack.c.h.bf16 %v10728_v43  ;;  %v10732_v25 = vunpack.c.l.bf16 %v10731_v5  ;;  %v10755_v13 = vld [vmem:[#allocation397_spill] sm:$0xff] }
 0x2fa   : > { %v2361_v53 = vadd.f32 %v2360_v12, %v10727_v14  ;;  %v2430_v63 = vadd.f32 %v2429_v56, %v10729_v24  ;;  %v10733_v39 = vunpack.c.h.bf16 %v10731_v5  ;;  %v10735_v11 = vunpack.c.l.bf16 %v10734_v6  ;;  %v10758_v14 = vld [vmem:[#allocation461_spill] sm:$0xff] }
 0x2fb   : > { %v2499_v29 = vadd.f32 %v2498_v37, %v10730_v45  ;;  %v2568_v47 = vadd.f32 %v2567_v58, %v10732_v25  ;;  %v10736_v2 = vunpack.c.h.bf16 %v10734_v6  ;;  %v10738_v49 = vunpack.c.l.bf16 %v10737_v41  ;;  %v10761_v45 = vld [vmem:[#allocation270_spill] sm:$0xff] }
 0x2fc   : > { %v2637_v61 = vadd.f32 %v2636_v51, %v10733_v39  ;;  %v2706_v48 = vadd.f32 %v2705_v40, %v10735_v11  ;;  %v10739_v60 = vunpack.c.h.bf16 %v10737_v41  ;;  %v10741_v34 = vunpack.c.l.bf16 %v10740_v18  ;;  %v10764_v39 = vld [vmem:[#allocation334_spill] sm:$0xff] }
 0x2fd   : > { %v2775_v4 = vadd.f32 %v2774_v1, %v10736_v2  ;;  %v2293_v8 = vadd.f32 %v2292_v59, %v10738_v49  ;;  %v10742_v7 = vunpack.c.h.bf16 %v10740_v18  ;;  %v10744_v62 = vunpack.c.l.bf16 %v10743_v32  ;;  %v10767_v2 = vld [vmem:[#allocation398_spill] sm:$0xff] }
 0x2fe   : > { %v2362_v46 = vadd.f32 %v2361_v53, %v10739_v60  ;;  %v2431_v30 = vadd.f32 %v2430_v63, %v10741_v34  ;;  %v10745_v26 = vunpack.c.h.bf16 %v10743_v32  ;;  %v10747_v12 = vunpack.c.l.bf16 %v10746_v27  ;;  %v10770_v60 = vld [vmem:[#allocation462_spill] sm:$0xff] }
 0x2ff   : > { %v2500_v22 = vadd.f32 %v2499_v29, %v10742_v7  ;;  %v2569_v31 = vadd.f32 %v2568_v47, %v10744_v62  ;;  %v10748_v9 = vunpack.c.h.bf16 %v10746_v27  ;;  %v10750_v37 = vunpack.c.l.bf16 %v10749_v15  ;;  %v10773_v7 = vld [vmem:[#allocation271_spill] sm:$0xff] }
 0x300   : > { %v2638_v10 = vadd.f32 %v2637_v61, %v10745_v26  ;;  %v2707_v36 = vadd.f32 %v2706_v48, %v10747_v12  ;;  %v10751_v3 = vunpack.c.h.bf16 %v10749_v15  ;;  %v10753_v51 = vunpack.c.l.bf16 %v10752_v16  ;;  %v10776_v26 = vld [vmem:[#allocation335_spill] sm:$0xff] }
 0x301   : > { %v2776_v56 = vadd.f32 %v2775_v4, %v10748_v9  ;;  %v2294_v19 = vadd.f32 %v2293_v8, %v10750_v37  ;;  %v10754_v0 = vunpack.c.h.bf16 %v10752_v16  ;;  %v10756_v1 = vunpack.c.l.bf16 %v10755_v13  ;;  %v10779_v9 = vld [vmem:[#allocation399_spill] sm:$0xff] }
 0x302   : > { %v2363_v58 = vadd.f32 %v2362_v46, %v10751_v3  ;;  %v2432_v35 = vadd.f32 %v2431_v30, %v10753_v51  ;;  %v10757_v42 = vunpack.c.h.bf16 %v10755_v13  ;;  %v10759_v53 = vunpack.c.l.bf16 %v10758_v14 }
 0x303   : > { %v2501_v40 = vadd.f32 %v2500_v22, %v10754_v0  ;;  %v2570_v21 = vadd.f32 %v2569_v31, %v10756_v1  ;;  %v10760_v24 = vunpack.c.h.bf16 %v10758_v14  ;;  %v10762_v29 = vunpack.c.l.bf16 %v10761_v45 }
 0x304   : > { %v2639_v59 = vadd.f32 %v2638_v10, %v10757_v42  ;;  %v2708_v43 = vadd.f32 %v2707_v36, %v10759_v53  ;;  %v10763_v25 = vunpack.c.h.bf16 %v10761_v45  ;;  %v10765_v61 = vunpack.c.l.bf16 %v10764_v39 }
 0x305   : > { %v2777_v63 = vadd.f32 %v2776_v56, %v10760_v24  ;;  %v2295_v5 = vadd.f32 %v2294_v19, %v10762_v29  ;;  %v10766_v11 = vunpack.c.h.bf16 %v10764_v39  ;;  %v10768_v4 = vunpack.c.l.bf16 %v10767_v2 }
 0x306   : > { %v2364_v47 = vadd.f32 %v2363_v58, %v10763_v25  ;;  %v2433_v6 = vadd.f32 %v2432_v35, %v10765_v61  ;;  %v10769_v49 = vunpack.c.h.bf16 %v10767_v2  ;;  %v10771_v46 = vunpack.c.l.bf16 %v10770_v60  ;;  %v10784_v35 = vld [vmem:[#allocation272_spill] sm:$0xff]  ;;  %v10796_v61 = vld [vmem:[#allocation273_spill] sm:$0xff] }
 0x307   : > { %v2502_v48 = vadd.f32 %v2501_v40, %v10766_v11  ;;  %v2571_v41 = vadd.f32 %v2570_v21, %v10768_v4  ;;  %v10772_v34 = vunpack.c.h.bf16 %v10770_v60  ;;  %v10774_v22 = vunpack.c.l.bf16 %v10773_v7  ;;  %v10787_v21 = vld [vmem:[#allocation336_spill] sm:$0xff]  ;;  %v10799_v4 = vld [vmem:[#allocation337_spill] sm:$0xff] }
 0x308   : > { %v2640_v8 = vadd.f32 %v2639_v59, %v10769_v49  ;;  %v2709_v18 = vadd.f32 %v2708_v43, %v10771_v46  ;;  %v10775_v62 = vunpack.c.h.bf16 %v10773_v7  ;;  %v10777_v10 = vunpack.c.l.bf16 %v10776_v26  ;;  %v10790_v43 = vld [vmem:[#allocation400_spill] sm:$0xff]  ;;  %v10802_v46 = vld [vmem:[#allocation401_spill] sm:$0xff] }
 0x309   : > { %v2778_v30 = vadd.f32 %v2777_v63, %v10772_v34  ;;  %v2296_v32 = vadd.f32 %v2295_v5, %v10774_v22  ;;  %v10778_v12 = vunpack.c.h.bf16 %v10776_v26  ;;  %v10780_v56 = vunpack.c.l.bf16 %v10779_v9  ;;  %v10805_v22 = vld [vmem:[#allocation464_spill] sm:$0xff] }
 0x30a   : > { %v2365_v31 = vadd.f32 %v2364_v47, %v10775_v62  ;;  %v2434_v27 = vadd.f32 %v2433_v6, %v10777_v10  ;;  %v10781_v37 = vunpack.c.h.bf16 %v10779_v9  ;;  %v10782_v3 = vunpack.c.l.bf16 %v5830_v38  ;;  %v10808_v10 = vld [vmem:[#allocation274_spill] sm:$0xff] }
 0x30b   : > { %v2503_v36 = vadd.f32 %v2502_v48, %v10778_v12  ;;  %v2572_v15 = vadd.f32 %v2571_v41, %v10780_v56  ;;  %v10783_v16 = vunpack.c.h.bf16 %v5830_v38  ;;  %v10785_v0 = vunpack.c.l.bf16 %v10784_v35  ;;  %v10793_v38 = vld [vmem:[#allocation463_spill] sm:$0xff]  ;;  %v10811_v56 = vld [vmem:[#allocation338_spill] sm:$0xff] }
 0x30c   : > { %v2641_v19 = vadd.f32 %v2640_v8, %v10781_v37  ;;  %v2710_v58 = vadd.f32 %v2709_v18, %v10782_v3  ;;  %v10786_v13 = vunpack.c.h.bf16 %v10784_v35  ;;  %v10788_v42 = vunpack.c.l.bf16 %v10787_v21 }
 0x30d   : > { %v2779_v51 = vadd.f32 %v2778_v30, %v10783_v16  ;;  %v2297_v40 = vadd.f32 %v2296_v32, %v10785_v0  ;;  %v10789_v14 = vunpack.c.h.bf16 %v10787_v21  ;;  %v10791_v24 = vunpack.c.l.bf16 %v10790_v43 }
 0x30e   : > { %v2366_v1 = vadd.f32 %v2365_v31, %v10786_v13  ;;  %v2435_v59 = vadd.f32 %v2434_v27, %v10788_v42  ;;  %v10792_v45 = vunpack.c.h.bf16 %v10790_v43  ;;  %v10794_v5 = vunpack.c.l.bf16 %v10793_v38 }
 0x30f   : > { %v2504_v53 = vadd.f32 %v2503_v36, %v10789_v14  ;;  %v2573_v63 = vadd.f32 %v2572_v15, %v10791_v24  ;;  %v10795_v47 = vunpack.c.h.bf16 %v10793_v38  ;;  %v10797_v6 = vunpack.c.l.bf16 %v10796_v61 }
 0x310   : > { %v2642_v29 = vadd.f32 %v2641_v19, %v10792_v45  ;;  %v2711_v25 = vadd.f32 %v2710_v58, %v10794_v5  ;;  %v10798_v48 = vunpack.c.h.bf16 %v10796_v61  ;;  %v10800_v41 = vunpack.c.l.bf16 %v10799_v4  ;;  %v10814_v58 = vld [vmem:[#allocation402_spill] sm:$0xff] }
 0x311   : > { %v2780_v39 = vadd.f32 %v2779_v51, %v10795_v47  ;;  %v2298_v11 = vadd.f32 %v2297_v40, %v10797_v6  ;;  %v10801_v8 = vunpack.c.h.bf16 %v10799_v4  ;;  %v10803_v18 = vunpack.c.l.bf16 %v10802_v46  ;;  %v10817_v40 = vld [vmem:[#allocation465_spill] sm:$0xff] }
 0x312   : > { %v2367_v2 = vadd.f32 %v2366_v1, %v10798_v48  ;;  %v2436_v49 = vadd.f32 %v2435_v59, %v10800_v41  ;;  %v10804_v30 = vunpack.c.h.bf16 %v10802_v46  ;;  %v10806_v32 = vunpack.c.l.bf16 %v10805_v22  ;;  %v10820_v59 = vld [vmem:[#allocation275_spill] sm:$0xff]  ;;  %v10831_v41 = vld [vmem:[#allocation276_spill] sm:$0xff] }
 0x313   : > { %v2505_v60 = vadd.f32 %v2504_v53, %v10801_v8  ;;  %v2574_v34 = vadd.f32 %v2573_v63, %v10803_v18  ;;  %v10807_v31 = vunpack.c.h.bf16 %v10805_v22  ;;  %v10809_v27 = vunpack.c.l.bf16 %v10808_v10  ;;  %v10823_v63 = vld [vmem:[#allocation339_spill] sm:$0xff]  ;;  %v10834_v18 = vld [vmem:[#allocation340_spill] sm:$0xff] }
 0x314   : > { %v2643_v7 = vadd.f32 %v2642_v29, %v10804_v30  ;;  %v2712_v62 = vadd.f32 %v2711_v25, %v10806_v32  ;;  %v10810_v36 = vunpack.c.h.bf16 %v10808_v10  ;;  %v10812_v15 = vunpack.c.l.bf16 %v10811_v56  ;;  %v10826_v25 = vld [vmem:[#allocation403_spill] sm:$0xff]  ;;  %v10837_v32 = vld [vmem:[#allocation404_spill] sm:$0xff] }
 0x315   : > { %v2781_v26 = vadd.f32 %v2780_v39, %v10807_v31  ;;  %v2299_v12 = vadd.f32 %v2298_v11, %v10809_v27  ;;  %v10813_v19 = vunpack.c.h.bf16 %v10811_v56  ;;  %v10815_v16 = vunpack.c.l.bf16 %v10814_v58 }
 0x316   : > { %v2368_v9 = vadd.f32 %v2367_v2, %v10810_v36  ;;  %v2437_v37 = vadd.f32 %v2436_v49, %v10812_v15  ;;  %v10816_v35 = vunpack.c.h.bf16 %v10814_v58  ;;  %v10818_v13 = vunpack.c.l.bf16 %v10817_v40 }
 0x317   : > { %v2506_v3 = vadd.f32 %v2505_v60, %v10813_v19  ;;  %v2575_v51 = vadd.f32 %v2574_v34, %v10815_v16  ;;  %v10819_v21 = vunpack.c.h.bf16 %v10817_v40  ;;  %v10821_v14 = vunpack.c.l.bf16 %v10820_v59 }
 0x318   : > { %v2644_v0 = vadd.f32 %v2643_v7, %v10816_v35  ;;  %v2713_v1 = vadd.f32 %v2712_v62, %v10818_v13  ;;  %v10822_v43 = vunpack.c.h.bf16 %v10820_v59  ;;  %v10824_v45 = vunpack.c.l.bf16 %v10823_v63 }
 0x319   : > { %v2782_v42 = vadd.f32 %v2781_v26, %v10819_v21  ;;  %v2300_v53 = vadd.f32 %v2299_v12, %v10821_v14  ;;  %v10825_v38 = vunpack.c.h.bf16 %v10823_v63  ;;  %v10827_v47 = vunpack.c.l.bf16 %v10826_v25 }
 0x31a   : > { %v2369_v24 = vadd.f32 %v2368_v9, %v10822_v43  ;;  %v2438_v29 = vadd.f32 %v2437_v37, %v10824_v45  ;;  %v10828_v61 = vunpack.c.h.bf16 %v10826_v25  ;;  %v10829_v11 = vunpack.c.l.bf16 %v5850_v52  ;;  %v10842_v9 = vld [vmem:[#allocation277_spill] sm:$0xff] }
 0x31b   : > { %v2507_v5 = vadd.f32 %v2506_v3, %v10825_v38  ;;  %v2576_v39 = vadd.f32 %v2575_v51, %v10827_v47  ;;  %v10830_v2 = vunpack.c.h.bf16 %v5850_v52  ;;  %v10832_v49 = vunpack.c.l.bf16 %v10831_v41  ;;  %v10845_v3 = vld [vmem:[#allocation341_spill] sm:$0xff] }
 0x31c   : > { %v2645_v6 = vadd.f32 %v2644_v0, %v10828_v61  ;;  %v2714_v48 = vadd.f32 %v2713_v1, %v10829_v11  ;;  %v10833_v60 = vunpack.c.h.bf16 %v10831_v41  ;;  %v10835_v34 = vunpack.c.l.bf16 %v10834_v18  ;;  %v10848_v0 = vld [vmem:[#allocation405_spill] sm:$0xff] }
 0x31d   : > { %v2783_v4 = vadd.f32 %v2782_v42, %v10830_v2  ;;  %v2301_v8 = vadd.f32 %v2300_v53, %v10832_v49  ;;  %v10836_v7 = vunpack.c.h.bf16 %v10834_v18  ;;  %v10838_v62 = vunpack.c.l.bf16 %v10837_v32  ;;  %v10853_v53 = vld [vmem:[#allocation278_spill] sm:$0xff] }
 0x31e   : > { %v2370_v46 = vadd.f32 %v2369_v24, %v10833_v60  ;;  %v2439_v30 = vadd.f32 %v2438_v29, %v10835_v34  ;;  %v10839_v26 = vunpack.c.h.bf16 %v10837_v32  ;;  %v10840_v52 = vunpack.c.l.bf16 %v5853_v57  ;;  %v10856_v29 = vld [vmem:[#allocation342_spill] sm:$0xff] }
 0x31f   : > { %v2508_v22 = vadd.f32 %v2507_v5, %v10836_v7  ;;  %v2577_v31 = vadd.f32 %v2576_v39, %v10838_v62  ;;  %v10841_v12 = vunpack.c.h.bf16 %v5853_v57  ;;  %v10843_v56 = vunpack.c.l.bf16 %v10842_v9  ;;  %v10859_v39 = vld [vmem:[#allocation406_spill] sm:$0xff] }
 0x320   : > { %v2646_v10 = vadd.f32 %v2645_v6, %v10839_v26  ;;  %v2715_v27 = vadd.f32 %v2714_v48, %v10840_v52  ;;  %v10844_v37 = vunpack.c.h.bf16 %v10842_v9  ;;  %v10846_v58 = vunpack.c.l.bf16 %v10845_v3 }
 0x321   : > { %v2784_v36 = vadd.f32 %v2783_v4, %v10841_v12  ;;  %v2302_v15 = vadd.f32 %v2301_v8, %v10843_v56  ;;  %v10847_v51 = vunpack.c.h.bf16 %v10845_v3  ;;  %v10849_v40 = vunpack.c.l.bf16 %v10848_v0  ;;  %v10865_v8 = vld [vmem:[#allocation279_spill] sm:$0xff] }
 0x322   : > { %v2371_v19 = vadd.f32 %v2370_v46, %v10844_v37  ;;  %v2440_v16 = vadd.f32 %v2439_v30, %v10846_v58  ;;  %v10850_v1 = vunpack.c.h.bf16 %v10848_v0  ;;  %v10851_v57 = vunpack.c.l.bf16 %v5860_v20  ;;  %v10868_v30 = vld [vmem:[#allocation343_spill] sm:$0xff]  ;;  %v10877_v37 = vld [vmem:[#allocation280_spill] sm:$0xff] }
 0x323   : > { %v2509_v35 = vadd.f32 %v2508_v22, %v10847_v51  ;;  %v2578_v13 = vadd.f32 %v2577_v31, %v10849_v40  ;;  %v10852_v59 = vunpack.c.h.bf16 %v5860_v20  ;;  %v10854_v43 = vunpack.c.l.bf16 %v10853_v53  ;;  %v10862_v20 = vld [vmem:[#allocation466_spill] sm:$0xff]  ;;  %v10871_v31 = vld [vmem:[#allocation407_spill] sm:$0xff]  ;;  %v10880_v51 = vld [vmem:[#allocation344_spill] sm:$0xff] }
 0x324   : > { %v2647_v21 = vadd.f32 %v2646_v10, %v10850_v1  ;;  %v2716_v42 = vadd.f32 %v2715_v27, %v10851_v57  ;;  %v10855_v63 = vunpack.c.h.bf16 %v10853_v53  ;;  %v10857_v38 = vunpack.c.l.bf16 %v10856_v29  ;;  %v10874_v12 = vld [vmem:[#allocation467_spill] sm:$0xff]  ;;  %v10883_v1 = vld [vmem:[#allocation408_spill] sm:$0xff] }
 0x325   : > { %v2785_v14 = vadd.f32 %v2784_v36, %v10852_v59  ;;  %v2303_v24 = vadd.f32 %v2302_v15, %v10854_v43  ;;  %v10858_v25 = vunpack.c.h.bf16 %v10856_v29  ;;  %v10860_v61 = vunpack.c.l.bf16 %v10859_v39 }
 0x326   : > { %v2372_v45 = vadd.f32 %v2371_v19, %v10855_v63  ;;  %v2441_v5 = vadd.f32 %v2440_v16, %v10857_v38  ;;  %v10861_v11 = vunpack.c.h.bf16 %v10859_v39  ;;  %v10863_v2 = vunpack.c.l.bf16 %v10862_v20 }
 0x327   : > { %v2510_v47 = vadd.f32 %v2509_v35, %v10858_v25  ;;  %v2579_v6 = vadd.f32 %v2578_v13, %v10860_v61  ;;  %v10864_v41 = vunpack.c.h.bf16 %v10862_v20  ;;  %v10866_v60 = vunpack.c.l.bf16 %v10865_v8 }
 0x328   : > { %v2648_v48 = vadd.f32 %v2647_v21, %v10861_v11  ;;  %v2717_v4 = vadd.f32 %v2716_v42, %v10863_v2  ;;  %v10867_v18 = vunpack.c.h.bf16 %v10865_v8  ;;  %v10869_v7 = vunpack.c.l.bf16 %v10868_v30 }
 0x329   : > { %v2786_v49 = vadd.f32 %v2785_v14, %v10864_v41  ;;  %v2304_v46 = vadd.f32 %v2303_v24, %v10866_v60  ;;  %v10870_v32 = vunpack.c.h.bf16 %v10868_v30  ;;  %v10872_v26 = vunpack.c.l.bf16 %v10871_v31  ;;  %v10886_v14 = vld [vmem:[#allocation468_spill] sm:$0xff] }
 0x32a   : > { %v2373_v34 = vadd.f32 %v2372_v45, %v10867_v18  ;;  %v2442_v22 = vadd.f32 %v2441_v5, %v10869_v7  ;;  %v10873_v52 = vunpack.c.h.bf16 %v10871_v31  ;;  %v10875_v36 = vunpack.c.l.bf16 %v10874_v12  ;;  %v10889_v45 = vld [vmem:[#allocation281_spill] sm:$0xff] }
 0x32b   : > { %v2511_v62 = vadd.f32 %v2510_v47, %v10870_v32  ;;  %v2580_v10 = vadd.f32 %v2579_v6, %v10872_v26  ;;  %v10876_v56 = vunpack.c.h.bf16 %v10874_v12  ;;  %v10878_v19 = vunpack.c.l.bf16 %v10877_v37  ;;  %v10892_v47 = vld [vmem:[#allocation345_spill] sm:$0xff] }
 0x32c   : > { %v2649_v27 = vadd.f32 %v2648_v48, %v10873_v52  ;;  %v2718_v9 = vadd.f32 %v2717_v4, %v10875_v36  ;;  %v10879_v58 = vunpack.c.h.bf16 %v10877_v37  ;;  %v10881_v35 = vunpack.c.l.bf16 %v10880_v51  ;;  %v10895_v48 = vld [vmem:[#allocation409_spill] sm:$0xff] }
 0x32d   : > { %v2787_v15 = vadd.f32 %v2786_v49, %v10876_v56  ;;  %v2305_v3 = vadd.f32 %v2304_v46, %v10878_v19  ;;  %v10882_v40 = vunpack.c.h.bf16 %v10880_v51  ;;  %v10884_v21 = vunpack.c.l.bf16 %v10883_v1  ;;  %v10898_v49 = vld [vmem:[#allocation469_spill] sm:$0xff] }
 0x32e   : > { %v2374_v16 = vadd.f32 %v2373_v34, %v10879_v58  ;;  %v2443_v0 = vadd.f32 %v2442_v22, %v10881_v35  ;;  %v10885_v42 = vunpack.c.h.bf16 %v10883_v1  ;;  %v10887_v53 = vunpack.c.l.bf16 %v10886_v14  ;;  %v10901_v34 = vld [vmem:[#allocation282_spill] sm:$0xff] }
 0x32f   : > { %v2512_v13 = vadd.f32 %v2511_v62, %v10882_v40  ;;  %v2581_v57 = vadd.f32 %v2580_v10, %v10884_v21  ;;  %v10888_v24 = vunpack.c.h.bf16 %v10886_v14  ;;  %v10890_v29 = vunpack.c.l.bf16 %v10889_v45  ;;  %v10904_v62 = vld [vmem:[#allocation346_spill] sm:$0xff] }
 0x330   : > { %v2650_v59 = vadd.f32 %v2649_v27, %v10885_v42  ;;  %v2719_v43 = vadd.f32 %v2718_v9, %v10887_v53  ;;  %v10891_v5 = vunpack.c.h.bf16 %v10889_v45  ;;  %v10893_v39 = vunpack.c.l.bf16 %v10892_v47  ;;  %v10907_v27 = vld [vmem:[#allocation410_spill] sm:$0xff] }
 0x331   : > { %v2788_v63 = vadd.f32 %v2787_v15, %v10888_v24  ;;  %v2306_v38 = vadd.f32 %v2305_v3, %v10890_v29  ;;  %v10894_v6 = vunpack.c.h.bf16 %v10892_v47  ;;  %v10896_v20 = vunpack.c.l.bf16 %v10895_v48  ;;  %v10910_v15 = vld [vmem:[#allocation470_spill] sm:$0xff] }
 0x332   : > { %v2375_v25 = vadd.f32 %v2374_v16, %v10891_v5  ;;  %v2444_v61 = vadd.f32 %v2443_v0, %v10893_v39  ;;  %v10897_v4 = vunpack.c.h.bf16 %v10895_v48  ;;  %v10899_v8 = vunpack.c.l.bf16 %v10898_v49 }
 0x333   : > { %v2513_v11 = vadd.f32 %v2512_v13, %v10894_v6  ;;  %v2582_v2 = vadd.f32 %v2581_v57, %v10896_v20  ;;  %v10900_v46 = vunpack.c.h.bf16 %v10898_v49  ;;  %v10902_v30 = vunpack.c.l.bf16 %v10901_v34 }
 0x334   : > { %v2651_v41 = vadd.f32 %v2650_v59, %v10897_v4  ;;  %v2720_v60 = vadd.f32 %v2719_v43, %v10899_v8  ;;  %v10903_v22 = vunpack.c.h.bf16 %v10901_v34  ;;  %v10905_v31 = vunpack.c.l.bf16 %v10904_v62 }
 0x335   : > { %v2789_v18 = vadd.f32 %v2788_v63, %v10900_v46  ;;  %v2307_v7 = vadd.f32 %v2306_v38, %v10902_v30  ;;  %v10906_v10 = vunpack.c.h.bf16 %v10904_v62  ;;  %v10908_v12 = vunpack.c.l.bf16 %v10907_v27 }
 0x336   : > { %v2376_v32 = vadd.f32 %v2375_v25, %v10903_v22  ;;  %v2445_v26 = vadd.f32 %v2444_v61, %v10905_v31  ;;  %v10909_v9 = vunpack.c.h.bf16 %v10907_v27  ;;  %v10911_v37 = vunpack.c.l.bf16 %v10910_v15 }
 0x337   : > { %v2514_v52 = vadd.f32 %v2513_v11, %v10906_v10  ;;  %v2583_v36 = vadd.f32 %v2582_v2, %v10908_v12  ;;  %v10912_v3 = vunpack.c.h.bf16 %v10910_v15  ;;  %v2308_v16 = vrot.slane %v2307_v7, 4 }
 0x338   : > { %v2652_v56 = vadd.f32 %v2651_v41, %v10909_v9  ;;  %v2721_v19 = vadd.f32 %v2720_v60, %v10911_v37  ;;  %v2377_v51 = vrot.slane %v2376_v32, 4  ;;  %v2446_v35 = vrot.slane %v2445_v26, 4 }
 0x339   : > { %v2790_v58 = vadd.f32 %v2789_v18, %v10912_v3  ;;  %v2515_v0 = vrot.slane %v2514_v52, 4  ;;  %v2584_v40 = vrot.slane %v2583_v36, 4  ;;  %v2309_v57 = vadd.f32 %v2308_v16, %v2307_v7 }
 0x33a   : > { %v2653_v13 = vrot.slane %v2652_v56, 4  ;;  %v2722_v1 = vrot.slane %v2721_v19, 4  ;;  %v2378_v42 = vadd.f32 %v2377_v51, %v2376_v32  ;;  %v2447_v59 = vadd.f32 %v2446_v35, %v2445_v26 }
 0x33b   : > { %v2791_v21 = vrot.slane %v2790_v58, 4  ;;  %v2516_v14 = vadd.f32 %v2515_v0, %v2514_v52  ;;  %v2585_v53 = vadd.f32 %v2584_v40, %v2583_v36  ;;  %v2310_v45 = vrot.slane %v2309_v57, 2 }
 0x33c   : > { %v2654_v43 = vadd.f32 %v2653_v13, %v2652_v56  ;;  %v2723_v24 = vadd.f32 %v2722_v1, %v2721_v19  ;;  %v2379_v29 = vrot.slane %v2378_v42, 2  ;;  %v2448_v38 = vrot.slane %v2447_v59, 2 }
 0x33d   : > { %v2792_v63 = vadd.f32 %v2791_v21, %v2790_v58  ;;  %v2517_v5 = vrot.slane %v2516_v14, 2  ;;  %v2586_v25 = vrot.slane %v2585_v53, 2  ;;  %v2311_v6 = vadd.f32 %v2310_v45, %v2309_v57 }
 0x33e   : > { %v2655_v47 = vrot.slane %v2654_v43, 2  ;;  %v2724_v39 = vrot.slane %v2723_v24, 2  ;;  %v2380_v11 = vadd.f32 %v2379_v29, %v2378_v42  ;;  %v2449_v48 = vadd.f32 %v2448_v38, %v2447_v59 }
 0x33f   : > { %v2793_v61 = vrot.slane %v2792_v63, 2  ;;  %v2518_v20 = vadd.f32 %v2517_v5, %v2516_v14  ;;  %v2587_v2 = vadd.f32 %v2586_v25, %v2585_v53  ;;  %v2312_v8 = vrot.slane %v2311_v6, 1 }
 0x340   : > { %v2656_v4 = vadd.f32 %v2655_v47, %v2654_v43  ;;  %v2725_v41 = vadd.f32 %v2724_v39, %v2723_v24  ;;  %v2381_v60 = vrot.slane %v2380_v11, 1  ;;  %v2450_v46 = vrot.slane %v2449_v48, 1 }
 0x341   : > { %v2794_v49 = vadd.f32 %v2793_v61, %v2792_v63  ;;  %v2519_v18 = vrot.slane %v2518_v20, 1  ;;  %v2588_v34 = vrot.slane %v2587_v2, 1  ;;  %v2313_v32 = vadd.f32 %v2312_v8, %v2311_v6 }
 0x342   : > { %v2657_v30 = vrot.slane %v2656_v4, 1  ;;  %v2726_v7 = vrot.slane %v2725_v41, 1  ;;  %v2382_v62 = vadd.f32 %v2381_v60, %v2380_v11  ;;  %v2451_v31 = vadd.f32 %v2450_v46, %v2449_v48 }
 0x343   : > { %v2795_v22 = vrot.slane %v2794_v49, 1  ;;  %v2520_v26 = vadd.f32 %v2519_v18, %v2518_v20  ;;  %v2589_v10 = vadd.f32 %v2588_v34, %v2587_v2  ;;  %v3018_v36 = vpack.c.bf16 %v6927_v17, %v6925_v54 }
 0x344   : > { %v2658_v52 = vadd.f32 %v2657_v30, %v2656_v4  ;;  %v2727_v27 = vadd.f32 %v2726_v7, %v2725_v41  ;;  %v3019_v9 = vpack.c.bf16 %v6931_v28, %v6929_v50  ;;  %v3020_v56 = vpack.c.bf16 %v6935_v23, %v6933_v44 }
 0x345   : > { %v2796_v12 = vadd.f32 %v2795_v22, %v2794_v49  ;;  %v3021_v15 = vpack.c.bf16 %v6939_v33, %v6937_v55  ;;  %v3022_v37 = vpack.c.bf16 %v2382_v62, %v2313_v32  ;;  %v3023_v19 = vpack.c.bf16 %v2520_v26, %v2451_v31 }
 0x346   : > { %v3024_v3 = vpack.c.bf16 %v2658_v52, %v2589_v10  ;;  %v2853_v16 = vunpack.c.l.b16 %v3018_v36  ;;  %v2855_v51 = vunpack.c.l.b16 %v3019_v9  ;;  %v2854_v35 = vunpack.c.h.b16 %v3018_v36 }
 0x347   : > { %v3025_v58 = vpack.c.bf16 %v2796_v12, %v2727_v27  ;;  %v2856_v0 = vunpack.c.h.b16 %v3019_v9  ;;  %v2857_v40 = vunpack.c.l.b16 %v3020_v56  ;;  %v2858_v54 = vunpack.c.h.b16 %v3020_v56 }
 0x348   : > { %v2859_v17 = vunpack.c.l.b16 %v3021_v15  ;;  %v2860_v13 = vunpack.c.h.b16 %v3021_v15  ;;  %v2861_v50 = vunpack.c.l.b16 %v3022_v37  ;;  %v2862_v28 = vunpack.c.h.b16 %v3022_v37 }
 0x349   : > { %v2863_v44 = vunpack.c.l.b16 %v3023_v19  ;;  %v2864_v23 = vunpack.c.h.b16 %v3023_v19  ;;  %v2865_v55 = vunpack.c.l.b16 %v3024_v3  ;;  %v2870_v33 = vsel %vm2869_vm0, %v2855_v51, %v2853_v16 }
 0x34a   : > { %v2866_v1 = vunpack.c.h.b16 %v3024_v3  ;;  %v2872_v21 = vsel %vm2871_vm1, %v2857_v40, %v2870_v33  ;;  %v2883_v57 = vsel %vm2869_vm0, %v2856_v0, %v2854_v35  ;;  %v2867_v42 = vunpack.c.l.b16 %v3025_v58 }
 0x34b   : > { %v2874_v59 = vsel %vm2873_vm2, %v2859_v17, %v2872_v21  ;;  %v2884_v14 = vsel %vm2871_vm1, %v2858_v54, %v2883_v57  ;;  %v2868_v53 = vunpack.c.h.b16 %v3025_v58 }
 0x34c   : > { %v2876_v43 = vsel %vm2875_vm3, %v2861_v50, %v2874_v59  ;;  %v2885_v24 = vsel %vm2873_vm2, %v2860_v13, %v2884_v14 }
 0x34d   : > { %v2878_v63 = vsel %vm2877_vm4, %v2863_v44, %v2876_v43  ;;  %v2886_v45 = vsel %vm2875_vm3, %v2862_v28, %v2885_v24 }
 0x34e   : > { %v2880_v29 = vsel %vm2879_vm5, %v2865_v55, %v2878_v63  ;;  %v2887_v38 = vsel %vm2877_vm4, %v2864_v23, %v2886_v45 }
 0x34f   : > { %v2882_v5 = vsel %vm2881_vm6, %v2867_v42, %v2880_v29  ;;  %v2888_v25 = vsel %vm2879_vm5, %v2866_v1, %v2887_v38 }
 0x350   : > { %v2889_v47 = vsel %vm2881_vm6, %v2868_v53, %v2888_v25 }
 0x351   : > { %v2890_v39 = vpack.c.b16 %v2889_v47, %v2882_v5 }
 0x353   : > { %2892 = vst [vmem:[%s153_s29] sm:$0xff] %v2890_v39 }
 0x354   : > { %3135 = shalt.err (!%p3132_p3)
}
 0x355   : > { %s3136_s23 = scalar_lea.hbm %s7980_s13, 128  ;;  %s3140_s26 = scalar_lea.hbm %s8030_s1, 256 }
 0x356   : > { %p3137_p4 = scmp.ne.s32.totalorder %s7980_s13, %s3136_s23  ;;  %p3141_p12 = scmp.lt.u32.totalorder %s7980_s13, %s8030_s1 }
 0x357   : > { %p3142_p2 = scmp.lt.u32.totalorder %s3140_s26, %s3136_s23  ;;  %p3144_p8 = scmp.lt.u32.totalorder %s3136_s23, %s7980_s13 }
 0x358   : > { %p3138_p6 = pnand %p3137_p4, %p10913_p9 }
 0x359   : > { %p3143_p5 = por %p3142_p2, %p3141_p12 }
 0x35a   : > { %p3139_p7 = pneg %p3138_p6 }
 0x35b   : > { %p3145_p11 = por %p3144_p8, %p3143_p5 }
 0x35d   : > { %p3146_p0 = pnand %p3145_p11, %p3139_p7 }
 0x35f   : > { %3149 = shalt.err (!%p3146_p0)
}
 0x360   : > { %3029 = dma.vmem_to_hbm [thread:$0]  (%p10913_p9), %s7982_s30, 128, %s7980_s13, %s2894_s15  }
 0x361 PF: > { %s2922_s4 = sand.u32 1, %s3184_s6   ;;  %p10914_p10 = scmp.ne.s32.totalorder %s8961_s21, 0 }
 0x362   : > { %p10915_p13 = scmp.ge.s32.totalorder %s3204_s11, 2  ;;  %s2923_s5 = scalar_lea.sflag [#allocation4], %s2922_s4 }
 0x364   : > { %p3036_p1 = pnand %p10915_p13, %p10914_p10 }
 0x366   : > { %3179 = dma.done.wait (!%p3036_p1), %s2923_s5, 128  }
 0x367   : > { %3181 = vsyncadd (!%p3036_p1), %s2923_s5, 4294967168  ;;  %s17_s11 = sadd.s32 1, %s3204_s11   ;;  %s10916_s6 = smov %s3188_s7 }
 0x368   : > { %p14_p3 = scmp.ge.s32.totalorder %s17_s11, 4   ;;  %s10917_s7 = smov %s3192_s8 }
 0x369   : > { %s10918_s8 = smov %s3277_s20  ;;  %s10919_s9 = smov %s3200_s10 }
 0x36a   : > { %s10920_s10 = smov %s10922_s14  ;;  %16 = sbr.rel (!%p14_p3) target bundleno = 6 (0x6), region = 69 }
 0x371   :  { %2928 = vsyncpa [#allocation3], 1 }
 0x372   :  { %2930 = vsyncpa [#allocation3 + $0x1], 1 }
 0x373   :  { %2931 = vsyncpa [#allocation4], 1 }
 0x374   :  { %2933 = vsyncpa [#allocation4 + $0x1], 1 }

</bundles_post_ra>
